<compile_context>
chip_gen: v5e
topology: v5e:2x2
jax: 0.10.0
libtpu: 0.0.40
codegen_flags: <defaults>
</compile_context>

<pallas_src>
import functools

import jax
import jax.numpy as jnp
from jax.experimental import pallas as pl
from jax.experimental.pallas import tpu as pltpu

HIDDEN_LAYERS = 7          # number of Linear layers in the shared net (1 input + 6 more)
NEURONS = 128
HEAD_NEURONS = 64
INPUT_SIZE = 3


def _granite_pinn_kernel(x_ref, w0t_ref, b_cols_ref, wht_ref, wh1t_ref,
                         wh2_ref, bh2_ref, out_ref, *, compute_dtype, tanh_dtype):
    """Fused MLP forward, transposed-activation layout.

    x_ref     : (3, tile_n)     f32  coordinates (1/cube_size folded into w0t)
    w0t_ref   : (128, 3)        f32  layer-0 weight^T, pre-scaled by 1/cube_size
    b_cols_ref: (128, 8)        f32  col l (0..6): shared bias l; col 7: fused head-1 bias
    wht_ref   : (6, 128, 128)   compute_dtype  hidden weights^T (shared layers 1..6)
    wh1t_ref  : (128, 128)      compute_dtype  fused head-1 weight^T
                                (rows 0:64 pressure branch, rows 64:128 perm branch)
    wh2_ref   : (64, 2)         f32  col 0 = wp2, col 1 = wk2 (64->1 head weights)
    bh2_ref   : (1, 2)          f32  [bp2, bk2]
    out_ref   : (3, tile_n)     f32  rows = [pressure, permeability, log_permeability]
    """
    x = x_ref[...]                                        # (3, tile_n) f32
    w0t = w0t_ref[...]                                    # (128, 3)    f32

    # ---- layer 0: K=3 would leave the MXU empty, so do it as three VPU
    # rank-1 (outer product) updates.  1/cube_size is already folded into w0t.
    pre = (w0t[:, 0:1] * x[0:1, :]
           + w0t[:, 1:2] * x[1:2, :]
           + w0t[:, 2:3] * x[2:3, :]
           + b_cols_ref[:, 0:1])                          # (128, tile_n) f32
    a = jnp.tanh(pre.astype(tanh_dtype)).astype(compute_dtype)

    # ---- shared layers 1..6: lane-dense (128,128) @ (128,tile_n) MXU matmuls
    # with f32 accumulation; f32 bias add; tanh in tanh_dtype.
    for layer in range(HIDDEN_LAYERS - 1):
        acc = jnp.dot(wht_ref[layer], a, preferred_element_type=jnp.float32)
        pre = acc + b_cols_ref[:, layer + 1:layer + 2]
        a = jnp.tanh(pre.astype(tanh_dtype)).astype(compute_dtype)

    # ---- fused heads: ONE 128-wide matmul + tanh (pressure branch rows 0:64,
    # perm branch rows 64:128) ...
    acc = jnp.dot(wh1t_ref[...], a, preferred_element_type=jnp.float32)
    pre = acc + b_cols_ref[:, HIDDEN_LAYERS:HIDDEN_LAYERS + 1]
    a1 = jnp.tanh(pre.astype(tanh_dtype)).astype(jnp.float32)    # (128, tile_n)

    # ---- ... then the 64->1 heads OFF the MXU: VPU multiply + sublane
    # reduction against the original wp2/wk2 columns.
    wp2 = wh2_ref[:, 0:1]                                 # (64, 1)
    wk2 = wh2_ref[:, 1:2]                                 # (64, 1)
    pressure = (jnp.sum(a1[0:HEAD_NEURONS, :] * wp2, axis=0, keepdims=True)
                + bh2_ref[0:1, 0:1])                      # (1, tile_n)
    log_perm = (jnp.sum(a1[HEAD_NEURONS:, :] * wk2, axis=0, keepdims=True)
                + bh2_ref[0:1, 1:2])                      # (1, tile_n)
    perm = jnp.exp(log_perm)                              # in-kernel EUP exp

    out_ref[...] = jnp.concatenate([pressure, perm, log_perm],
                                   axis=0).astype(out_ref.dtype)


def _choose_tile_n(n, requested):
    """Lane tile: multiple of 512 capped at `requested`, small enough that the
    1-D parallel grid keeps >= 4 steps when N allows (v7x: 2 TensorCores)."""
    if n <= 512:
        return n                                   # single (possibly ragged) block
    requested = max(512, (requested // 512) * 512)
    by_steps = max(512, (n // 4) // 512 * 512)     # largest tile keeping >= 4 steps
    return min(requested, by_steps)


def granite_pinn_forward(x, params, cube_size, *, tile_n=2048,
                         compute_dtype=jnp.bfloat16, tanh_dtype=None,
                         vmem_limit_bytes=None):
    """Fused GranitePINN forward.

    x      : (N, 3) f32 coordinates in [0, cube_size]^3.
    params : list [(w, b), ...] with weights stored (in_features, out_features):
             layers 0..6 shared net, then pressure head (2 layers), then perm
             head (2 layers).
    Returns (pressure, permeability, log_permeability), each (N, 1) f32.

    compute_dtype: matmul operand dtype (bf16 default, MXU-native; accumulation
                   is always f32).  Pass jnp.float32 for reference-exact runs.
    tanh_dtype   : dtype of the bias-add + tanh epilogue.  Defaults to
                   compute_dtype (bf16 tanh ~2x on v6e/v7x EUP); pass
                   jnp.float32 on v5e (no bf16 VPU/EUP there).
    """
    n = x.shape[0]
    if tanh_dtype is None:
        tanh_dtype = compute_dtype

    tile = _choose_tile_n(n, tile_n)
    grid = (pl.cdiv(n, tile),)            # ragged last block is masked by Pallas

    # Lane-dense input layout (3, N).  Callers that build collocation points
    # directly as (3, N) can skip this transpose.
    xt = x.T

    # ---- pack / fuse parameters (host side, tiny) --------------------------
    w0t = (params[0][0] / cube_size).T.astype(jnp.float32)                 # (128, 3)
    wht = jnp.stack([params[1 + l][0].T
                     for l in range(HIDDEN_LAYERS - 1)]).astype(compute_dtype)  # (6,128,128)

    wp1, bp1 = params[HIDDEN_LAYERS]
    wp2, bp2 = params[HIDDEN_LAYERS + 1]
    wk1, bk1 = params[HIDDEN_LAYERS + 2]
    wk2, bk2 = params[HIDDEN_LAYERS + 3]

    wh1t = jnp.concatenate([wp1.T, wk1.T], axis=0).astype(compute_dtype)   # (128, 128)
    b_head1 = jnp.concatenate([bp1, bk1])                                  # (128,)
    b_shared = jnp.stack([params[i][1] for i in range(HIDDEN_LAYERS)])     # (7, 128)
    b_cols = jnp.concatenate([b_shared, b_head1[None, :]],
                             axis=0).T.astype(jnp.float32)                 # (128, 8)
    wh2 = jnp.concatenate([wp2, wk2], axis=1).astype(jnp.float32)          # (64, 2)
    bh2 = jnp.concatenate([bp2, bk2]).reshape(1, 2).astype(jnp.float32)    # (1, 2)

    param_arrays = [w0t, b_cols, wht, wh1t, wh2, bh2]
    # Grid-invariant (constant index_map): Pallas keeps these resident in VMEM
    # and does not re-DMA them per grid step.  Total ~0.25 MiB in bf16.
    param_specs = [pl.BlockSpec(p.shape, lambda i, nd=p.ndim: (0,) * nd)
                   for p in param_arrays]

    kernel = functools.partial(_granite_pinn_kernel,
                               compute_dtype=compute_dtype,
                               tanh_dtype=tanh_dtype)

    out = pl.pallas_call(
        kernel,
        out_shape=jax.ShapeDtypeStruct((3, n), jnp.float32),
        grid_spec=pltpu.PrefetchScalarGridSpec(
            num_scalar_prefetch=0,
            grid=grid,
            in_specs=[pl.BlockSpec((INPUT_SIZE, tile), lambda i: (0, i))]
            + param_specs,
            out_specs=pl.BlockSpec((3, tile), lambda i: (0, i)),
        ),
        compiler_params=pltpu.CompilerParams(
            dimension_semantics=("parallel",),
            # Only needed if tile_n is pushed far past ~8192.
            vmem_limit_bytes=vmem_limit_bytes,
        ),
    )(xt, *param_arrays)

    pressure = out[0, :][:, None]
    perm = out[1, :][:, None]
    log_perm = out[2, :][:, None]
    return pressure, perm, log_perm


def init_params(key):
    """Deterministic init matching GranitePINN's layer shapes.
    nn.Linear default: U(-1/sqrt(fan_in), 1/sqrt(fan_in)).  Weights stored
    (in, out) so the reference does x @ W."""
    sizes = []
    sizes.append((INPUT_SIZE, NEURONS))                      # shared layer 0
    for _ in range(HIDDEN_LAYERS - 1):
        sizes.append((NEURONS, NEURONS))                     # shared layers 1..6
    sizes.append((NEURONS, HEAD_NEURONS))                    # pressure head
    sizes.append((HEAD_NEURONS, 1))
    sizes.append((NEURONS, HEAD_NEURONS))                    # perm head
    sizes.append((HEAD_NEURONS, 1))

    params = []
    for i, (fan_in, fan_out) in enumerate(sizes):
        kw, kb = jax.random.split(jax.random.fold_in(key, i))
        bound = 1.0 / (fan_in ** 0.5)
        w = jax.random.uniform(kw, (fan_in, fan_out), jnp.float32, -bound, bound)
        b = jax.random.uniform(kb, (fan_out,), jnp.float32, -bound, bound)
        params.append((w, b))
    return params


def reference_forward(x, params, cube_size):
    """Plain-JAX reference of GranitePINN.forward."""
    h = x / cube_size
    for w, b in params[:HIDDEN_LAYERS]:
        h = jnp.tanh(h @ w + b)
    features = h
    wp1, bp1 = params[HIDDEN_LAYERS]
    wp2, bp2 = params[HIDDEN_LAYERS + 1]
    wk1, bk1 = params[HIDDEN_LAYERS + 2]
    wk2, bk2 = params[HIDDEN_LAYERS + 3]
    pressure = jnp.tanh(features @ wp1 + bp1) @ wp2 + bp2
    log_perm = jnp.tanh(features @ wk1 + bk1) @ wk2 + bk2
    return pressure, jnp.exp(log_perm), log_perm


if __name__ == "__main__":
    key = jax.random.PRNGKey(0)
    cube_size = 10.0
    params = init_params(jax.random.fold_in(key, 1000))

    # --- f32 path: strict check vs the plain-JAX reference (divisible N). ---
    N = 1024
    x = jax.random.uniform(jax.random.fold_in(key, 2000), (N, INPUT_SIZE),
                           jnp.float32, 0.0, cube_size)
    pressure, perm, log_perm = granite_pinn_forward(
        x, params, cube_size, compute_dtype=jnp.float32)
    jax.block_until_ready((pressure, perm, log_perm))

    p_ref, k_ref, lp_ref = reference_forward(x, params, cube_size)
    assert pressure.shape == (N, 1) and perm.shape == (N, 1) and log_perm.shape == (N, 1)
    assert jnp.allclose(pressure, p_ref, atol=5e-4, rtol=5e-4)
    assert jnp.allclose(perm, k_ref, atol=5e-4, rtol=5e-4)
    assert jnp.allclose(log_perm, lp_ref, atol=5e-4, rtol=5e-4)

    # --- f32 path, ragged last block (N not a multiple of the lane tile). ---
    N2 = 1000
    x2 = x[:N2]
    p2, k2, lp2 = granite_pinn_forward(x2, params, cube_size,
                                       compute_dtype=jnp.float32)
    jax.block_until_ready((p2, k2, lp2))
    assert p2.shape == (N2, 1) and k2.shape == (N2, 1) and lp2.shape == (N2, 1)
    assert jnp.allclose(p2, p_ref[:N2], atol=5e-4, rtol=5e-4)
    assert jnp.allclose(lp2, lp_ref[:N2], atol=5e-4, rtol=5e-4)

    # --- default bf16 fast path (v6e/v7x): sanity + loose agreement only. ---
    pb, kb, lpb = granite_pinn_forward(x2, params, cube_size)   # bf16 matmuls/tanh
    jax.block_until_ready((pb, kb, lpb))
    assert pb.shape == (N2, 1) and kb.shape == (N2, 1) and lpb.shape == (N2, 1)
    assert bool(jnp.all(jnp.isfinite(pb)) & jnp.all(jnp.isfinite(kb))
                & jnp.all(jnp.isfinite(lpb)))
    assert float(jnp.max(jnp.abs(lpb - lp_ref[:N2]))) < 0.2

    # TODO(synk): compute_pde_residual relies on torch.autograd higher-order
    # grads; it is a training-time utility, not part of the forward hot path.
    # In JAX it would be built with jax.grad / jax.jvp around this wrapper.
    print("KERNEL_OK")
</pallas_src>

<mosaic_0001>
module attributes {stable_mosaic.version = 11 : i64} {
  func.func @_granite_pinn_kernel(%arg0: i32, %arg1: memref<3x512xf32, #tpu.memory_space<vmem>>, %arg2: memref<128x3xf32, #tpu.memory_space<vmem>>, %arg3: memref<128x8xf32, #tpu.memory_space<vmem>>, %arg4: memref<6x128x128xf32, #tpu.memory_space<vmem>>, %arg5: memref<128x128xf32, #tpu.memory_space<vmem>>, %arg6: memref<64x2xf32, #tpu.memory_space<vmem>>, %arg7: memref<1x2xf32, #tpu.memory_space<vmem>>, %arg8: memref<3x512xf32, #tpu.memory_space<vmem>>) attributes {dimension_semantics = [#tpu.dimension_semantics<parallel>], iteration_bounds = array<i64: 2>, scalar_prefetch = 0 : i64, scratch_operands = 0 : i64, tpu.core_type = #tpu.core_type<tc>, window_params = [{transform_indices = @transform_0, window_bounds = array<i64: 3, 512>}, {pipeline_mode = #tpu.pipeline_mode<synchronous>, transform_indices = @transform_1, window_bounds = array<i64: 128, 3>}, {pipeline_mode = #tpu.pipeline_mode<synchronous>, transform_indices = @transform_2, window_bounds = array<i64: 128, 8>}, {pipeline_mode = #tpu.pipeline_mode<synchronous>, transform_indices = @transform_3, window_bounds = array<i64: 6, 128, 128>}, {pipeline_mode = #tpu.pipeline_mode<synchronous>, transform_indices = @transform_4, window_bounds = array<i64: 128, 128>}, {pipeline_mode = #tpu.pipeline_mode<synchronous>, transform_indices = @transform_5, window_bounds = array<i64: 64, 2>}, {pipeline_mode = #tpu.pipeline_mode<synchronous>, transform_indices = @transform_6, window_bounds = array<i64: 1, 2>}, {transform_indices = @transform_7, window_bounds = array<i64: 3, 512>}]} {
    %c0 = arith.constant 0 : index
    %c0_0 = arith.constant 0 : index
    %0 = vector.load %arg1[%c0, %c0_0] : memref<3x512xf32, #tpu.memory_space<vmem>>, vector<3x512xf32>
    %c0_1 = arith.constant 0 : index
    %c0_2 = arith.constant 0 : index
    %1 = vector.load %arg2[%c0_1, %c0_2] : memref<128x3xf32, #tpu.memory_space<vmem>>, vector<128x3xf32>
    %2 = vector.extract_strided_slice %1 {offsets = [0, 0], sizes = [128, 1], strides = [1, 1]} : vector<128x3xf32> to vector<128x1xf32>
    %3 = vector.extract_strided_slice %0 {offsets = [0, 0], sizes = [1, 512], strides = [1, 1]} : vector<3x512xf32> to vector<1x512xf32>
    %4 = vector.broadcast %2 : vector<128x1xf32> to vector<128x512xf32>
    %5 = vector.broadcast %3 : vector<1x512xf32> to vector<128x512xf32>
    %6 = arith.mulf %4, %5 : vector<128x512xf32>
    %7 = vector.extract_strided_slice %1 {offsets = [0, 1], sizes = [128, 1], strides = [1, 1]} : vector<128x3xf32> to vector<128x1xf32>
    %8 = vector.extract_strided_slice %0 {offsets = [1, 0], sizes = [1, 512], strides = [1, 1]} : vector<3x512xf32> to vector<1x512xf32>
    %9 = vector.broadcast %7 : vector<128x1xf32> to vector<128x512xf32>
    %10 = vector.broadcast %8 : vector<1x512xf32> to vector<128x512xf32>
    %11 = arith.mulf %9, %10 : vector<128x512xf32>
    %12 = arith.addf %6, %11 : vector<128x512xf32>
    %13 = vector.extract_strided_slice %1 {offsets = [0, 2], sizes = [128, 1], strides = [1, 1]} : vector<128x3xf32> to vector<128x1xf32>
    %14 = vector.extract_strided_slice %0 {offsets = [2, 0], sizes = [1, 512], strides = [1, 1]} : vector<3x512xf32> to vector<1x512xf32>
    %15 = vector.broadcast %13 : vector<128x1xf32> to vector<128x512xf32>
    %16 = vector.broadcast %14 : vector<1x512xf32> to vector<128x512xf32>
    %17 = arith.mulf %15, %16 : vector<128x512xf32>
    %18 = arith.addf %12, %17 : vector<128x512xf32>
    %c0_3 = arith.constant 0 : index
    %c0_4 = arith.constant 0 : index
    %19 = vector.load %arg3[%c0_3, %c0_4] : memref<128x8xf32, #tpu.memory_space<vmem>>, vector<128x1xf32>
    %20 = vector.broadcast %19 : vector<128x1xf32> to vector<128x512xf32>
    %21 = arith.addf %18, %20 : vector<128x512xf32>
    %22 = math.tanh %21 : vector<128x512xf32>
    %c0_5 = arith.constant 0 : index
    %c0_6 = arith.constant 0 : index
    %c0_7 = arith.constant 0 : index
    %23 = vector.load %arg4[%c0_5, %c0_6, %c0_7] : memref<6x128x128xf32, #tpu.memory_space<vmem>>, vector<1x128x128xf32>
    %24 = vector.shape_cast %23 : vector<1x128x128xf32> to vector<128x128xf32>
    %cst = arith.constant dense<0.000000e+00> : vector<128x512xf32>
    %25 = tpu.matmul %24, %22, %cst {dimension_numbers = #tpu.dot_dimension_numbers<[1], [0], [0], [1], [0, 0, 1, 1], [], []>} : vector<128x128xf32>, vector<128x512xf32>, vector<128x512xf32> -> vector<128x512xf32>
    %c0_8 = arith.constant 0 : index
    %c1 = arith.constant 1 : index
    %26 = vector.load %arg3[%c0_8, %c1] : memref<128x8xf32, #tpu.memory_space<vmem>>, vector<128x1xf32>
    %27 = vector.broadcast %26 : vector<128x1xf32> to vector<128x512xf32>
    %28 = arith.addf %25, %27 : vector<128x512xf32>
    %29 = math.tanh %28 : vector<128x512xf32>
    %c1_9 = arith.constant 1 : index
    %c0_10 = arith.constant 0 : index
    %c0_11 = arith.constant 0 : index
    %30 = vector.load %arg4[%c1_9, %c0_10, %c0_11] : memref<6x128x128xf32, #tpu.memory_space<vmem>>, vector<1x128x128xf32>
    %31 = vector.shape_cast %30 : vector<1x128x128xf32> to vector<128x128xf32>
    %cst_12 = arith.constant dense<0.000000e+00> : vector<128x512xf32>
    %32 = tpu.matmul %31, %29, %cst_12 {dimension_numbers = #tpu.dot_dimension_numbers<[1], [0], [0], [1], [0, 0, 1, 1], [], []>} : vector<128x128xf32>, vector<128x512xf32>, vector<128x512xf32> -> vector<128x512xf32>
    %c0_13 = arith.constant 0 : index
    %c2 = arith.constant 2 : index
    %33 = vector.load %arg3[%c0_13, %c2] : memref<128x8xf32, #tpu.memory_space<vmem>>, vector<128x1xf32>
    %34 = vector.broadcast %33 : vector<128x1xf32> to vector<128x512xf32>
    %35 = arith.addf %32, %34 : vector<128x512xf32>
    %36 = math.tanh %35 : vector<128x512xf32>
    %c2_14 = arith.constant 2 : index
    %c0_15 = arith.constant 0 : index
    %c0_16 = arith.constant 0 : index
    %37 = vector.load %arg4[%c2_14, %c0_15, %c0_16] : memref<6x128x128xf32, #tpu.memory_space<vmem>>, vector<1x128x128xf32>
    %38 = vector.shape_cast %37 : vector<1x128x128xf32> to vector<128x128xf32>
    %cst_17 = arith.constant dense<0.000000e+00> : vector<128x512xf32>
    %39 = tpu.matmul %38, %36, %cst_17 {dimension_numbers = #tpu.dot_dimension_numbers<[1], [0], [0], [1], [0, 0, 1, 1], [], []>} : vector<128x128xf32>, vector<128x512xf32>, vector<128x512xf32> -> vector<128x512xf32>
    %c0_18 = arith.constant 0 : index
    %c3 = arith.constant 3 : index
    %40 = vector.load %arg3[%c0_18, %c3] : memref<128x8xf32, #tpu.memory_space<vmem>>, vector<128x1xf32>
    %41 = vector.broadcast %40 : vector<128x1xf32> to vector<128x512xf32>
    %42 = arith.addf %39, %41 : vector<128x512xf32>
    %43 = math.tanh %42 : vector<128x512xf32>
    %c3_19 = arith.constant 3 : index
    %c0_20 = arith.constant 0 : index
    %c0_21 = arith.constant 0 : index
    %44 = vector.load %arg4[%c3_19, %c0_20, %c0_21] : memref<6x128x128xf32, #tpu.memory_space<vmem>>, vector<1x128x128xf32>
    %45 = vector.shape_cast %44 : vector<1x128x128xf32> to vector<128x128xf32>
    %cst_22 = arith.constant dense<0.000000e+00> : vector<128x512xf32>
    %46 = tpu.matmul %45, %43, %cst_22 {dimension_numbers = #tpu.dot_dimension_numbers<[1], [0], [0], [1], [0, 0, 1, 1], [], []>} : vector<128x128xf32>, vector<128x512xf32>, vector<128x512xf32> -> vector<128x512xf32>
    %c0_23 = arith.constant 0 : index
    %c4 = arith.constant 4 : index
    %47 = vector.load %arg3[%c0_23, %c4] : memref<128x8xf32, #tpu.memory_space<vmem>>, vector<128x1xf32>
    %48 = vector.broadcast %47 : vector<128x1xf32> to vector<128x512xf32>
    %49 = arith.addf %46, %48 : vector<128x512xf32>
    %50 = math.tanh %49 : vector<128x512xf32>
    %c4_24 = arith.constant 4 : index
    %c0_25 = arith.constant 0 : index
    %c0_26 = arith.constant 0 : index
    %51 = vector.load %arg4[%c4_24, %c0_25, %c0_26] : memref<6x128x128xf32, #tpu.memory_space<vmem>>, vector<1x128x128xf32>
    %52 = vector.shape_cast %51 : vector<1x128x128xf32> to vector<128x128xf32>
    %cst_27 = arith.constant dense<0.000000e+00> : vector<128x512xf32>
    %53 = tpu.matmul %52, %50, %cst_27 {dimension_numbers = #tpu.dot_dimension_numbers<[1], [0], [0], [1], [0, 0, 1, 1], [], []>} : vector<128x128xf32>, vector<128x512xf32>, vector<128x512xf32> -> vector<128x512xf32>
    %c0_28 = arith.constant 0 : index
    %c5 = arith.constant 5 : index
    %54 = vector.load %arg3[%c0_28, %c5] : memref<128x8xf32, #tpu.memory_space<vmem>>, vector<128x1xf32>
    %55 = vector.broadcast %54 : vector<128x1xf32> to vector<128x512xf32>
    %56 = arith.addf %53, %55 : vector<128x512xf32>
    %57 = math.tanh %56 : vector<128x512xf32>
    %c5_29 = arith.constant 5 : index
    %c0_30 = arith.constant 0 : index
    %c0_31 = arith.constant 0 : index
    %58 = vector.load %arg4[%c5_29, %c0_30, %c0_31] : memref<6x128x128xf32, #tpu.memory_space<vmem>>, vector<1x128x128xf32>
    %59 = vector.shape_cast %58 : vector<1x128x128xf32> to vector<128x128xf32>
    %cst_32 = arith.constant dense<0.000000e+00> : vector<128x512xf32>
    %60 = tpu.matmul %59, %57, %cst_32 {dimension_numbers = #tpu.dot_dimension_numbers<[1], [0], [0], [1], [0, 0, 1, 1], [], []>} : vector<128x128xf32>, vector<128x512xf32>, vector<128x512xf32> -> vector<128x512xf32>
    %c0_33 = arith.constant 0 : index
    %c6 = arith.constant 6 : index
    %61 = vector.load %arg3[%c0_33, %c6] : memref<128x8xf32, #tpu.memory_space<vmem>>, vector<128x1xf32>
    %62 = vector.broadcast %61 : vector<128x1xf32> to vector<128x512xf32>
    %63 = arith.addf %60, %62 : vector<128x512xf32>
    %64 = math.tanh %63 : vector<128x512xf32>
    %c0_34 = arith.constant 0 : index
    %c0_35 = arith.constant 0 : index
    %65 = vector.load %arg5[%c0_34, %c0_35] : memref<128x128xf32, #tpu.memory_space<vmem>>, vector<128x128xf32>
    %cst_36 = arith.constant dense<0.000000e+00> : vector<128x512xf32>
    %66 = tpu.matmul %65, %64, %cst_36 {dimension_numbers = #tpu.dot_dimension_numbers<[1], [0], [0], [1], [0, 0, 1, 1], [], []>} : vector<128x128xf32>, vector<128x512xf32>, vector<128x512xf32> -> vector<128x512xf32>
    %c0_37 = arith.constant 0 : index
    %c7 = arith.constant 7 : index
    %67 = vector.load %arg3[%c0_37, %c7] : memref<128x8xf32, #tpu.memory_space<vmem>>, vector<128x1xf32>
    %68 = vector.broadcast %67 : vector<128x1xf32> to vector<128x512xf32>
    %69 = arith.addf %66, %68 : vector<128x512xf32>
    %70 = math.tanh %69 : vector<128x512xf32>
    %c0_38 = arith.constant 0 : index
    %c0_39 = arith.constant 0 : index
    %71 = vector.load %arg6[%c0_38, %c0_39] : memref<64x2xf32, #tpu.memory_space<vmem>>, vector<64x1xf32>
    %c0_40 = arith.constant 0 : index
    %c1_41 = arith.constant 1 : index
    %72 = vector.load %arg6[%c0_40, %c1_41] : memref<64x2xf32, #tpu.memory_space<vmem>>, vector<64x1xf32>
    %73 = vector.extract_strided_slice %70 {offsets = [0, 0], sizes = [64, 512], strides = [1, 1]} : vector<128x512xf32> to vector<64x512xf32>
    %74 = vector.broadcast %71 : vector<64x1xf32> to vector<64x512xf32>
    %75 = arith.mulf %73, %74 : vector<64x512xf32>
    %cst_42 = arith.constant dense<0.000000e+00> : vector<512xf32>
    %76 = vector.multi_reduction <add>, %75, %cst_42 [0] : vector<64x512xf32> to vector<512xf32>
    %77 = vector.shape_cast %76 : vector<512xf32> to vector<1x512xf32>
    %c0_43 = arith.constant 0 : index
    %c0_44 = arith.constant 0 : index
    %78 = vector.load %arg7[%c0_43, %c0_44] : memref<1x2xf32, #tpu.memory_space<vmem>>, vector<1x1xf32>
    %79 = vector.broadcast %78 : vector<1x1xf32> to vector<1x512xf32>
    %80 = arith.addf %77, %79 : vector<1x512xf32>
    %81 = vector.extract_strided_slice %70 {offsets = [64, 0], sizes = [64, 512], strides = [1, 1]} : vector<128x512xf32> to vector<64x512xf32>
    %82 = vector.broadcast %72 : vector<64x1xf32> to vector<64x512xf32>
    %83 = arith.mulf %81, %82 : vector<64x512xf32>
    %cst_45 = arith.constant dense<0.000000e+00> : vector<512xf32>
    %84 = vector.multi_reduction <add>, %83, %cst_45 [0] : vector<64x512xf32> to vector<512xf32>
    %85 = vector.shape_cast %84 : vector<512xf32> to vector<1x512xf32>
    %c0_46 = arith.constant 0 : index
    %c1_47 = arith.constant 1 : index
    %86 = vector.load %arg7[%c0_46, %c1_47] : memref<1x2xf32, #tpu.memory_space<vmem>>, vector<1x1xf32>
    %87 = vector.broadcast %86 : vector<1x1xf32> to vector<1x512xf32>
    %88 = arith.addf %85, %87 : vector<1x512xf32>
    %89 = math.exp %88 : vector<1x512xf32>
    %90 = tpu.concatenate %80, %89, %88 in 0 : vector<1x512xf32>, vector<1x512xf32>, vector<1x512xf32> -> vector<3x512xf32>
    %c0_48 = arith.constant 0 : index
    %c0_49 = arith.constant 0 : index
    %91 = vector.load %arg8[%c0_48, %c0_49] : memref<3x512xf32, #tpu.memory_space<vmem>>, vector<3x512xf32>
    tpu.vector_store %arg8[%c0_48, %c0_49], %90 {strides = array<i32>} : memref<3x512xf32, #tpu.memory_space<vmem>>, vector<3x512xf32>,
    return
  }
  func.func @transform_0(%arg0: i32) -> (i32, i32) {
    %c0_i32 = arith.constant 0 : i32
    %c0_i32_0 = arith.constant 0 : i32
    return %c0_i32, %arg0 : i32, i32
  }
  func.func @transform_1(%arg0: i32) -> (i32, i32) {
    %c0_i32 = arith.constant 0 : i32
    %c0_i32_0 = arith.constant 0 : i32
    %c0_i32_1 = arith.constant 0 : i32
    return %c0_i32, %c0_i32_0 : i32, i32
  }
  func.func @transform_2(%arg0: i32) -> (i32, i32) {
    %c0_i32 = arith.constant 0 : i32
    %c0_i32_0 = arith.constant 0 : i32
    %c0_i32_1 = arith.constant 0 : i32
    return %c0_i32, %c0_i32_0 : i32, i32
  }
  func.func @transform_3(%arg0: i32) -> (i32, i32, i32) {
    %c0_i32 = arith.constant 0 : i32
    %c0_i32_0 = arith.constant 0 : i32
    %c0_i32_1 = arith.constant 0 : i32
    %c0_i32_2 = arith.constant 0 : i32
    return %c0_i32, %c0_i32_0, %c0_i32_1 : i32, i32, i32
  }
  func.func @transform_4(%arg0: i32) -> (i32, i32) {
    %c0_i32 = arith.constant 0 : i32
    %c0_i32_0 = arith.constant 0 : i32
    %c0_i32_1 = arith.constant 0 : i32
    return %c0_i32, %c0_i32_0 : i32, i32
  }
  func.func @transform_5(%arg0: i32) -> (i32, i32) {
    %c0_i32 = arith.constant 0 : i32
    %c0_i32_0 = arith.constant 0 : i32
    %c0_i32_1 = arith.constant 0 : i32
    return %c0_i32, %c0_i32_0 : i32, i32
  }
  func.func @transform_6(%arg0: i32) -> (i32, i32) {
    %c0_i32 = arith.constant 0 : i32
    %c0_i32_0 = arith.constant 0 : i32
    %c0_i32_1 = arith.constant 0 : i32
    return %c0_i32, %c0_i32_0 : i32, i32
  }
  func.func @transform_7(%arg0: i32) -> (i32, i32) {
    %c0_i32 = arith.constant 0 : i32
    %c0_i32_0 = arith.constant 0 : i32
    return %c0_i32, %arg0 : i32, i32
  }
}

</mosaic_0001>

<bundles_post_ra>
// kernel: tpu_custom_call.1
= control target key start
LH: loop header
LB: loop body
LE: loop exit
PB: predicated region body
PF: predicated region fallthrough
CT: control target
= control target key end

     0   :  { %12 = vsyncpa [#allocation3], 0  ;;  %s8956_s0 = inlined_call_operand.vmem [shape: f32[3,1024], index: 0, kind: input, shape index: {}]   ;;  %s8957_s1 = inlined_call_operand.vmem [shape: f32[128,3], index: 1, kind: input, shape index: {}]   ;;  %s8958_s2 = inlined_call_operand.vmem [shape: f32[128,8], index: 2, kind: input, shape index: {}]   ;;  %s8959_s3 = inlined_call_operand.hbm [shape: f32[6,128,128], index: 3, kind: input, shape index: {}]   ;;  %s8960_s4 = inlined_call_operand.vmem [shape: f32[128,128], index: 4, kind: input, shape index: {}]   ;;  %s8961_s5 = inlined_call_operand.vmem [shape: f32[64,2], index: 5, kind: input, shape index: {}]   ;;  %s8962_s6 = inlined_call_operand.vmem [shape: f32[1,2], index: 6, kind: input, shape index: {}]   ;;  %s8963_s7 = inlined_call_operand.hbm [shape: f32[3,1024], index: 7, kind: output, shape index: {}]  }
   0x1   :  { %13 = vsyncpa [#allocation4], 0 }
   0x2   :  { %15 = vsyncpa [#allocation4 + $0x1], 0  ;;  %s5713_s24 = smov 0   ;;  %s5715_s25 = smov 0  }
   0x3   :  { %s5717_s26 = smov 0   ;;  %s5719_s27 = smov 0  }
   0x4 LB: > { %s5734_s28 = sadd.s32 4294967295, %s5660_s27   ;;  %s4325_s29 = sadd.s32 4294967294, %s5660_s27   ;;  %s5660_s27 = sphi %s5719_s27, %s9281_s27   ;;  %s5656_s26 = sphi %s5717_s26, %s9280_s26   ;;  %s5652_s25 = sphi %s5715_s25, %s9279_s25   ;;  %s5648_s24 = sphi %s5713_s24, %s9278_s24  }
   0x5   : > { %s5738_s30 = sadd.s32 1, %s5660_s27   ;;  %s180_s8 = sadd.s32 1, %s5656_s26 }
   0x6   : > { %s177_s9 = ssub.s32 %s5660_s27, %s5738_s30  ;;  %p190_p0 = scmp.ne.s32.totalorder %s5656_s26, %s5652_s25 }
   0x7   : > { %p178_p1 = scmp.eq.s32.totalorder %s177_s9, 0  ;;  %p191_p2 = scmp.eq.s32.totalorder %s5734_s28, 1 }
   0x8   : > { %p196_p3 = scmp.ne.s32.totalorder %s5652_s25, %s5648_s24  ;;  %p197_p4 = scmp.eq.s32.totalorder %s4325_s29, 1 }
   0x9   : > { %s5749_s10 = scalar_select %p178_p1, %s5656_s26, %s180_s8  }
   0xa   : > { %p5751_p5 = por %p191_p2, %p190_p0  ;;  %p5755_p6 = por %p197_p4, %p196_p3 }
   0xb   : > { %p4326_p7 = scmp.ge.s32.totalorder %s5660_s27, 1  ;;  %p204_p8 = scmp.lt.s32.totalorder %s5660_s27, 3 }
   0xc   : > { %p4354_p9 = scmp.eq.s32.totalorder %s5734_s28, 0  ;;  %s221_s15 = sshll.u32 %s8959_s3, 4  ;;  %s222_s15 = int_to_ptr.hbm [resolvable:$true] %s221_s15 }
   0xd   : > { %p205_p10 = pnand %p4326_p7, %p204_p8  ;;  %s5662_s16 = smov [#allocation2]  }
   0xe   : > { %s223_s17 = sshll.u32 %s5662_s16, 4  ;;  %s5663_s18 = smov 128   ;;  %s224_s17 = int_to_ptr.vmem [resolvable:$true] %s223_s17 }
   0xf   : > { %p4346_p11 = pneg %p205_p10  ;;  %s5664_s19 = smov 8  }
  0x10   : > { %257 = sbr.rel (%p205_p10) target bundleno = 2415 (0x96f), region = 48 }
  0x11   : > { %p4347_p12 = pnand %p4354_p9, %p4346_p11 }
  0x13   : > { %4349 = dma.hbm_to_vmem [thread:$0]  (!%p4347_p12), %s222_s15, 12288, %s224_s17, [#allocation3], %s5663_s18, %s5663_s18, %s5664_s19  }
  0x15   : > { %5639 = dma.done.wait (%p4354_p9), [#allocation3], 12288  }
  0x16   : > { %5641 = vsyncadd (%p4354_p9), [#allocation3], 4294955008  ;;  %v8966_v0 = vmov 2   ;;  %v8968_v1 = vmov 1   ;;  %v8964_v2 = vmov 0   ;;  %v314_v3 = vld [vmem:[%s8957_s1 + $0x78] sm:$0xff] }
  0x17   : > { %4403 = vset.pattern.permute.xlu2 %v8966_v0  ;;  %4400 = vset.pattern.permute.xlu0 %v8968_v1  ;;  %v313_v4 = vld [vmem:[%s8957_s1 + $0x70] sm:$0xff]  ;;  %v5783_v5 = vld [vmem:[%s8957_s1 + $0x58] sm:$0xff]  ;;  %v312_v6 = vld [vmem:[%s8957_s1 + $0x68] sm:$0xff]  ;;  %s4332_s18 = sshll.u32 %s5734_s28, 2  ;;  %s287_s17 = sand.u32 1, %s5652_s25   ;;  %vm4214_vm0 = vcmask 1040384  }
  0x18   : > { %4401 = vset.pattern.permute.xlu1 %v8964_v2  ;;  %738 = vperm.xlu2 %4403, %v314_v3   ;;  %v311_v7 = vld [vmem:[%s8957_s1 + $0x60] sm:$0xff]  ;;  %v5804_v9 = vld [vmem:[%s8958_s2 + $0x78] sm:$0xff]  ;;  %v5817_v11 = vld [vmem:[%s8958_s2 + $0x70] sm:$0xff]  ;;  %p291_p13 = scmp.lt.s32.totalorder %s4332_s18, 7  ;;  %vm4219_vm1 = vcmask 1041408   ;;  %vm4230_vm2 = vcmask 1043456  }
  0x19   : > { %534 = vperm.xlu0 %4400, %v314_v3   ;;  %387 = vperm.xlu1 %4401, %v313_v4   ;;  %v5799_v8 = vld [vmem:[%s8958_s2 + $0x60] sm:$0xff]  ;;  %v306_v10 = vld [vmem:[%s8957_s1 + $0x38] sm:$0xff]  ;;  %v891_v12 = vld [vmem:[%s8958_s2 + $0x50] sm:$0xff]  ;;  %s4339_s20 = sshll.u32 %s5734_s28, 4  ;;  %s4238_s28 = scalar_lea.sflag [#allocation4], %s287_s17 }
  0x1a   : > { %v309_v13 = vld [vmem:[%s8957_s1 + $0x50] sm:$0xff]  ;;  %v5832_v14 = vld [vmem:[%s8958_s2 + $0x40] sm:$0xff]  ;;  %v5838_v15 = vld [vmem:[%s8958_s2 + $0x68] sm:$0xff]  ;;  %s9283_s18 = smov (!%p291_p13, %s4332_s18), 7  ;;  %s5614_s16 = scalar_lea.hbm %s8963_s7, 32 }
  0x1b   : > { %v308_v16 = vld [vmem:[%s8957_s1 + $0x48] sm:$0xff]  ;;  %v5848_v17 = vld [vmem:[%s8957_s1 + $0x18] sm:$0xff]  ;;  %v5856_v18 = vld [vmem:[%s8958_s2 + $0x30] sm:$0xff]  ;;  %s4333_s23 = sshll.u32 %s9283_s18, 2  ;;  %s4331_s18 = sshll.u32 %s287_s17, 4 }
  0x1c   : > { %v307_v19 = vld [vmem:[%s8957_s1 + $0x40] sm:$0xff]  ;;  %v5870_v21 = vld [vmem:[%s8958_s2 + $0x58] sm:$0xff]  ;;  %v305_v24 = vld [vmem:[%s8957_s1 + $0x30] sm:$0xff]  ;;  %s294_s9 = scalar_lea.vmem %s8956_s0, %s4333_s23  ;;  %s8898_s19 = scalar_lea.vmem [#allocation5], %s4331_s18 }
  0x1d   : > { %v885_v20 = vld [vmem:[%s8958_s2 + $0x20] sm:$0xff]  ;;  %9026 = vst [vmem:[#allocation8_spill] sm:$0xff] %v5870_v21  ;;  %v5895_v26 = vld [vmem:[%s8958_s2 + $0x48] sm:$0xff]  ;;  %s4249_s23 = scalar_lea.hbm %s8963_s7, %s4339_s20  ;;  %s4251_s29 = sshll.u32 %s8898_s19, 4  ;;  %s4252_s29 = int_to_ptr.vmem [resolvable:$true] %s4251_s29 }
  0x1e   : > { %v5900_v27 = vld [vmem:[%s8957_s1 + $0x28] sm:$0xff]  ;;  %v297_v34 = vld [vmem:[%s294_s9] sm:$0x77]  ;;  %s4253_s8 = sshll.u32 %s4249_s23, 4  ;;  %s4254_s8 = int_to_ptr.hbm [resolvable:$true] %s4253_s8 }
  0x1f   : > { %v298_v35 = vld [vmem:[%s294_s9 + $0x8] sm:$0x77]  ;;  %v537_v36 = vperm.slane %v297_v34, 1  ;;  %v538_v37 = vperm.slane %v297_v34, 5  ;;  %v5926_v38 = vld [vmem:[%s8957_s1 + $0x20] sm:$0xff]  ;;  %v397_v39 = vperm.slane %v297_v34, 0 }
  0x20   : > { %4404 = vset.pattern.permute.xlu2 %v8964_v2  ;;  %v398_v40 = vperm.slane %v297_v34, 4  ;;  %v399_v41 = vperm.slane %v298_v35, 0  ;;  %v400_v43 = vperm.slane %v298_v35, 4  ;;  %v741_v44 = vperm.slane %v297_v34, 2  ;;  %s5608_s9 = sshra.s32 %s4254_s8, 4  ;;  %s5609_s9 = int_to_ptr.hbm [resolvable:$true] %s5608_s9 }
  0x21   : > { %518 = vperm.xlu0 %4400, %v5783_v5   ;;  %4402 = vset.pattern.permute.xlu1 %v8968_v1  ;;  %v742_v45 = vperm.slane %v297_v34, 6  ;;  %v5929_v46 = vperm.slane %v537_v36, 1  ;;  %v743_v48 = vperm.slane %v298_v35, 2  ;;  %v539_v49 = vperm.slane %v298_v35, 1  ;;  %s5610_s13 = scalar_lea.hbm %s5609_s9, 16  ;;  %p5615_p3 = scmp.lt.s32.totalorder %s5609_s9, %s8963_s7 }
  0x22   : > { %382 = vperm.xlu2 %4404, %v312_v6   ;;  %530 = vperm.xlu1 %4402, %v313_v4   ;;  %v5934_v50 = vperm.slane %v538_v37, 1  ;;  %v5937_v51 = vperm.slane %v397_v39, 0  ;;  %v540_v52 = vperm.slane %v298_v35, 5  ;;  %v5942_v54 = vperm.slane %v398_v40, 0  ;;  %p5611_p0 = scmp.ne.s32.totalorder %s5609_s9, %s5610_s13  ;;  %p5616_p4 = scmp.lt.s32.totalorder %s5614_s16, %s5610_s13 }
  0x23   : > { %v5944_v55 = vperm.slane %v399_v41, 0  ;;  %v5946_v56 = vperm.slane %v400_v43, 0  ;;  %v5948_v57 = vperm.slane %v741_v44, 2  ;;  %v5950_v58 = vperm.slane %v742_v45, 2 }
  0x24   : > { %v744_v60 = vperm.slane %v298_v35, 6  ;;  %v5954_v61 = vperm.slane %v743_v48, 2  ;;  %v5956_v62 = vperm.slane %v539_v49, 1  ;;  %p5612_p1 = pnand %p5611_p0, %p5751_p5  ;;  %p5617_p7 = por %p5616_p4, %p5615_p3 }
  0x26   : > { %v5998_v44 = vperm.slane %v744_v60, 2  ;;  %p5613_p2 = pneg %p5612_p1 }
  0x28   : > { %p5618_p8 = pnand %p5617_p7, %p5613_p2 }
  0x29   : > { %4408 = vset.pattern.permute.xlu0 %v8964_v2 }
  0x2a   : > { %4405 = vset.pattern.permute.xlu2 %v8966_v0  ;;  %392 = vperm.xlu0 %4408, %v314_v3  }
  0x2b   : > { %526 = vperm.xlu1 %4402, %v312_v6   ;;  %734 = vperm.xlu2 %4405, %v313_v4  }
  0x32   : > { %377 = vperm.xlu0 %4408, %v311_v7  }
  0x33   : > { %522 = vperm.xlu1 %4402, %v311_v7   ;;  %730 = vperm.xlu2 %4405, %v312_v6   ;;  %v5966_v6 = vperm.slane %v540_v52, 1 }
  0x3a   : > { %959 = vperm.xlu0 %4408, %v5799_v8  }
  0x3b   : > { %4406 = vset.pattern.permute.xlu1 %v8964_v2  ;;  %4407 = vset.pattern.permute.xlu2 %v8964_v2 }
  0x3c   : > { %974 = vperm.xlu1 %4406, %v5804_v9   ;;  %372 = vperm.xlu2 %4407, %v5783_v5  }
  0x42   : > { %352 = vperm.xlu0 %4408, %v306_v10  }
  0x44   : > { %4409 = vset.pattern.permute.xlu1 %v8966_v0  ;;  %969 = vperm.xlu2 %4407, %v5817_v11  }
  0x45   : > { %726 = vperm.xlu1 %4409, %v311_v7  }
  0x4a   : > { %949 = vperm.xlu0 %4408, %v891_v12  }
  0x4c   : > { %4411 = vset.pattern.permute.xlu2 %v8968_v1 }
  0x4d   : > { %4410 = vset.pattern.permute.xlu1 %v8964_v2  ;;  %514 = vperm.xlu2 %4411, %v309_v13  }
  0x4e   : > { %367 = vperm.xlu1 %4410, %v309_v13  }
  0x52   : > { %939 = vperm.xlu0 %4408, %v5832_v14  }
  0x55   : > { %4412 = vset.pattern.permute.xlu2 %v8964_v2 }
  0x56   : > { %964 = vperm.xlu1 %4410, %v5838_v15   ;;  %362 = vperm.xlu2 %4412, %v308_v16  }
  0x5a   : > { %332 = vperm.xlu0 %4408, %v5848_v17  }
  0x5e   : > { %4413 = vset.pattern.permute.xlu1 %v8968_v1  ;;  %4414 = vset.pattern.permute.xlu2 %v8966_v0 }
  0x5f   : > { %510 = vperm.xlu1 %4413, %v308_v16   ;;  %718 = vperm.xlu2 %4414, %v309_v13  }
  0x62   : > { %929 = vperm.xlu0 %4408, %v5856_v18  }
  0x67   : > { %4415 = vset.pattern.permute.xlu1 %v8964_v2  ;;  %4416 = vset.pattern.permute.xlu2 %v8968_v1 }
  0x68   : > { %357 = vperm.xlu1 %4415, %v307_v19   ;;  %506 = vperm.xlu2 %4416, %v307_v19  }
  0x6a   : > { %919 = vperm.xlu0 %4408, %v885_v20  }
  0x70   : > { %4417 = vset.pattern.permute.xlu1 %v8966_v0  ;;  %4418 = vset.pattern.permute.xlu2 %v8964_v2 }
  0x71   : > { %714 = vperm.xlu1 %4417, %v308_v16   ;;  %954 = vperm.xlu2 %4418, %v5870_v21  }
  0x72   : > { %4437 = vset.pattern.permute.xlu0 %v8966_v0  ;;  %v5877_v22 = vpop.permute.xlu2 %738 }
  0x73   : > { %722 = vperm.xlu0 %4437, %v5783_v5  }
  0x79   : > { %4419 = vset.pattern.permute.xlu1 %v8968_v1  ;;  %4420 = vset.pattern.permute.xlu2 %v8966_v0 }
  0x7a   : > { %502 = vperm.xlu1 %4419, %v306_v10   ;;  %710 = vperm.xlu2 %4420, %v307_v19  }
  0x7b   : > { %706 = vperm.xlu0 %4437, %v306_v10  }
  0x7c   : > { %v5881_v23 = vpop.permute.xlu2 %382 }
  0x82   : > { %4421 = vset.pattern.permute.xlu1 %v8964_v2  ;;  %4422 = vset.pattern.permute.xlu2 %v8968_v1 }
  0x83   : > { %347 = vperm.xlu1 %4421, %v305_v24   ;;  %498 = vperm.xlu2 %4422, %v305_v24  }
  0x84   : > { %690 = vperm.xlu0 %4437, %v5848_v17  }
  0x85   : > { %v5889_v25 = vpop.permute.xlu2 %734 }
  0x86   : > { %v809_v3 = vmul.f32 %v5948_v57, %v5889_v25  ;;  %v810_v4 = vmul.f32 %v5950_v58, %v5889_v25  ;;  %v811_v45 = vmul.f32 %v5954_v61, %v5889_v25 }
  0x8b   : > { %944 = vperm.xlu1 %4421, %v5895_v26   ;;  %4423 = vset.pattern.permute.xlu2 %v8964_v2  ;;  %v5904_v28 = vpop.permute.xlu0 %534  ;;  %v5906_v29 = vpop.permute.xlu1 %387 }
  0x8c   : > { %342 = vperm.xlu2 %4423, %v5900_v27   ;;  %v465_v5 = vmul.f32 %v5937_v51, %v5906_v29  ;;  %v466_v7 = vmul.f32 %v5942_v54, %v5906_v29  ;;  %v609_v12 = vmul.f32 %v5929_v46, %v5904_v28  ;;  %v610_v13 = vmul.f32 %v5934_v50, %v5904_v28 }
  0x8d   : > { %v5909_v30 = vpop.permute.xlu2 %730  ;;  %v611_v16 = vmul.f32 %v5956_v62, %v5904_v28  ;;  %v612_v41 = vmul.f32 %v5966_v6, %v5904_v28  ;;  %v467_v48 = vmul.f32 %v5944_v55, %v5906_v29 }
  0x93   : > { %4424 = vset.pattern.permute.xlu1 %v8968_v1  ;;  %v5912_v31 = vpop.permute.xlu0 %518 }
  0x94   : > { %494 = vperm.xlu1 %4424, %v5900_v27   ;;  %v5918_v32 = vpop.permute.xlu1 %530  ;;  %4425 = vset.pattern.permute.xlu2 %v8966_v0 }
  0x95   : > { %702 = vperm.xlu2 %4425, %v305_v24   ;;  %v605_v59 = vmul.f32 %v5929_v46, %v5918_v32  ;;  %v606_v63 = vmul.f32 %v5934_v50, %v5918_v32  ;;  %v5984_v24 = vld [vmem:[%s8958_s2 + $0x38] sm:$0xff]  ;;  %v607_v37 = vmul.f32 %v5956_v62, %v5918_v32 }
  0x96   : > { %v5921_v33 = vpop.permute.xlu2 %372  ;;  %9027 = vst [vmem:[#allocation9_spill] sm:$0xff] %v5984_v24 }
  0x97   : > { %v669_v19 = vadd.f32 %v605_v59, %v465_v5  ;;  %v670_v39 = vadd.f32 %v606_v63, %v466_v7  ;;  %v468_v59 = vmul.f32 %v5946_v56, %v5906_v29  ;;  %v671_v60 = vadd.f32 %v607_v37, %v467_v48 }
  0x98   : > { %v813_v7 = vmul.f32 %v5948_v57, %v5877_v22  ;;  %v816_v29 = vmul.f32 %v5998_v44, %v5877_v22 }
  0x99   : > { %v873_v52 = vadd.f32 %v809_v3, %v669_v19  ;;  %v874_v5 = vadd.f32 %v810_v4, %v670_v39  ;;  %v812_v3 = vmul.f32 %v5998_v44, %v5889_v25  ;;  %v875_v39 = vadd.f32 %v811_v45, %v671_v60 }
  0x9a   : > { %v9028_v60 = vmov 0  }
  0x9c   : > { %4426 = vset.pattern.permute.xlu1 %v8964_v2  ;;  %v393_v42 = vpop.permute.xlu0 %392 }
  0x9d   : > { %v5931_v47 = vpop.permute.xlu1 %526  ;;  %337 = vperm.xlu1 %4426, %v5926_v38   ;;  %4427 = vset.pattern.permute.xlu2 %v8968_v1  ;;  %v469_v34 = vmul.f32 %v5937_v51, %v393_v42  ;;  %v470_v35 = vmul.f32 %v5942_v54, %v393_v42  ;;  %v471_v36 = vmul.f32 %v5944_v55, %v393_v42 }
  0x9e   : > { %v5939_v53 = vpop.permute.xlu2 %969  ;;  %490 = vperm.xlu2 %4427, %v5926_v38   ;;  %v472_v40 = vmul.f32 %v5946_v56, %v393_v42 }
  0x9f   : > { %v673_v42 = vadd.f32 %v609_v12, %v469_v34  ;;  %v674_v49 = vadd.f32 %v610_v13, %v470_v35  ;;  %v675_v28 = vadd.f32 %v611_v16, %v471_v36  ;;  %v1033_v12 = vadd.f32 %v5939_v53, %v873_v52  ;;  %v6026_v36 = vld [vmem:[%s8957_s1] sm:$0xff] }
  0xa0   : > { %v676_v63 = vadd.f32 %v612_v41, %v472_v40  ;;  %v1034_v4 = vadd.f32 %v5939_v53, %v874_v5  ;;  %678 = vperm.xlu0 %4437, %v6026_v36   ;;  %v1035_v45 = vadd.f32 %v5939_v53, %v875_v39 }
  0xa1   : > { %v877_v19 = vadd.f32 %v813_v7, %v673_v42  ;;  %4474 = vtanh.f32 %v1033_v12 }
  0xa2   : > { %v880_v25 = vadd.f32 %v816_v29, %v676_v63  ;;  %4476 = vtanh.f32 %v1034_v4  ;;  %v6061_v29 = vld [vmem:[%s8958_s2 + $0x28] sm:$0xff]  ;;  %v461_v4 = vmul.f32 %v5937_v51, %v5881_v23 }
  0xa4   : > { %v5970_v10 = vpop.permute.xlu0 %377 }
  0xa5   : > { %v5978_v20 = vpop.permute.xlu1 %522  ;;  %4428 = vset.pattern.permute.xlu1 %v8966_v0 }
  0xa6   : > { %698 = vperm.xlu1 %4428, %v5900_v27   ;;  %4429 = vset.pattern.permute.xlu2 %v8964_v2  ;;  %v608_v27 = vmul.f32 %v5966_v6, %v5918_v32  ;;  %v814_v2 = vmul.f32 %v5950_v58, %v5877_v22  ;;  %v815_v32 = vmul.f32 %v5954_v61, %v5877_v22 }
  0xa7   : > { %v5996_v43 = vpop.permute.xlu2 %514  ;;  %934 = vperm.xlu2 %4429, %v5984_v24   ;;  %v598_v39 = vmul.f32 %v5934_v50, %v5978_v20 }
  0xa8   : > { %v672_v13 = vadd.f32 %v608_v27, %v468_v59  ;;  %v878_v34 = vadd.f32 %v814_v2, %v674_v49  ;;  %v879_v35 = vadd.f32 %v815_v32, %v675_v28  ;;  %v4475_v49 = vpop.eup %4474  ;;  %v6042_v28 = vld [vmem:[%s8957_s1 + $0x10] sm:$0xff]  ;;  %4444 = vset.pattern.permute.xlu0 %v8968_v1 }
  0xa9   : > { %v4477_v52 = vpop.eup %4476  ;;  %1178 = vperm.xlu0 %4444, %v5817_v11   ;;  %v597_v11 = vmul.f32 %v5929_v46, %v5978_v20 }
  0xaa   : > { %v876_v27 = vadd.f32 %v812_v3, %v672_v13  ;;  %v457_v3 = vmul.f32 %v5937_v51, %v5970_v10 }
  0xac   : > { %v6018_v16 = vpop.permute.xlu0 %959  ;;  %v1036_v42 = vadd.f32 %v5939_v53, %v876_v27  ;;  %v661_v27 = vadd.f32 %v597_v11, %v457_v3  ;;  %v460_v11 = vmul.f32 %v5946_v56, %v5970_v10 }
  0xae   : > { %v975_v37 = vpop.permute.xlu1 %974  ;;  %4430 = vset.pattern.permute.xlu1 %v8968_v1 }
  0xaf   : > { %486 = vperm.xlu1 %4430, %v5848_v17   ;;  %v1037_v22 = vadd.f32 %v975_v37, %v877_v19  ;;  %v1038_v40 = vadd.f32 %v975_v37, %v878_v34  ;;  %v1039_v41 = vadd.f32 %v975_v37, %v879_v35  ;;  %4431 = vset.pattern.permute.xlu2 %v8966_v0 }
  0xb0   : > { %v1040_v2 = vadd.f32 %v975_v37, %v880_v25  ;;  %v6032_v48 = vpop.permute.xlu2 %362  ;;  %694 = vperm.xlu2 %4431, %v5926_v38   ;;  %v462_v19 = vmul.f32 %v5942_v54, %v5881_v23  ;;  %v601_v34 = vmul.f32 %v5929_v46, %v5931_v47  ;;  %v463_v37 = vmul.f32 %v5944_v55, %v5881_v23 }
  0xb1   : > { %4478 = vtanh.f32 %v1037_v22  ;;  %v602_v25 = vmul.f32 %v5934_v50, %v5931_v47  ;;  %v458_v22 = vmul.f32 %v5942_v54, %v5970_v10  ;;  %1158 = vperm.xlu0 %4444, %v5895_v26   ;;  %v806_v26 = vmul.f32 %v5950_v58, %v5909_v30 }
  0xb2   : > { %4480 = vtanh.f32 %v1038_v40  ;;  %v464_v40 = vmul.f32 %v5946_v56, %v5881_v23  ;;  %v807_v23 = vmul.f32 %v5954_v61, %v5909_v30 }
  0xb3   : > { %4482 = vtanh.f32 %v1039_v41  ;;  %v603_v41 = vmul.f32 %v5956_v62, %v5931_v47  ;;  %v662_v3 = vadd.f32 %v598_v39, %v458_v22 }
  0xb4   : > { %v6037_v17 = vpop.permute.xlu0 %352  ;;  %4484 = vtanh.f32 %v1040_v2  ;;  %v604_v2 = vmul.f32 %v5966_v6, %v5931_v47  ;;  %v6098_v47 = vld [vmem:[%s8957_s1 + $0x8] sm:$0xff] }
  0xb5   : > { %4486 = vtanh.f32 %v1035_v45 }
  0xb6   : > { %4488 = vtanh.f32 %v1036_v42  ;;  %v805_v42 = vmul.f32 %v5948_v57, %v5909_v30  ;;  %v668_v0 = vadd.f32 %v604_v2, %v464_v40 }
  0xb7   : > { %v4479_v38 = vpop.eup %4478  ;;  %v727_v59 = vpop.permute.xlu1 %726  ;;  %4432 = vset.pattern.permute.xlu1 %v9028_v60 }
  0xb8   : > { %v4481_v53 = vpop.eup %4480  ;;  %327 = vperm.xlu1 %4432, %v6042_v28   ;;  %1185 = vmatpush.msra.mxu0 %v4479_v38  ;;  %v801_v35 = vmul.f32 %v5948_v57, %v727_v59  ;;  %v599_v38 = vmul.f32 %v5956_v62, %v5978_v20 }
  0xb9   : > { %v4483_v63 = vpop.eup %4482  ;;  %1250 = vmatpush.msra.mxu1 %v4481_v53  ;;  %v6048_v5 = vpop.permute.xlu2 %718  ;;  %4433 = vset.pattern.permute.xlu2 %v8968_v1  ;;  %v459_v53 = vmul.f32 %v5944_v55, %v5970_v10  ;;  %v803_v1 = vmul.f32 %v5954_v61, %v727_v59 }
  0xba   : > { %v4485_v7 = vpop.eup %4484  ;;  %1315 = vmatpush.msra.mxu2 %v4483_v63  ;;  %482 = vperm.xlu2 %4433, %v6042_v28  }
  0xbb   : > { %v4487_v32 = vpop.eup %4486  ;;  %1380 = vmatpush.msra.mxu3 %v4485_v7  ;;  %1186 = vmatpush.msra.mxu0 %v4475_v49  ;;  %v802_v49 = vmul.f32 %v5950_v58, %v727_v59  ;;  %v865_v7 = vadd.f32 %v801_v35, %v661_v27 }
  0xbc   : > { %v4489_v12 = vpop.eup %4488  ;;  %1251 = vmatpush.msra.mxu1 %v4477_v52  ;;  %v6056_v13 = vpop.permute.xlu0 %949  ;;  %1316 = vmatpush.msra.mxu2 %v4487_v32  ;;  %v665_v52 = vadd.f32 %v601_v34, %v461_v4  ;;  %v666_v32 = vadd.f32 %v602_v25, %v462_v19  ;;  %v808_v4 = vmul.f32 %v5998_v44, %v5909_v30 }
  0xbd   : > { %1381 = vmatpush.msra.mxu3 %v4489_v12  ;;  %v600_v12 = vmul.f32 %v5966_v6, %v5978_v20  ;;  %v667_v34 = vadd.f32 %v603_v41, %v463_v37  ;;  %v804_v19 = vmul.f32 %v5998_v44, %v727_v59  ;;  %v866_v20 = vadd.f32 %v802_v49, %v662_v3 }
  0xbe   : > { %v663_v25 = vadd.f32 %v599_v38, %v459_v53  ;;  %v1025_v10 = vadd.f32 %v6018_v16, %v865_v7  ;;  %v869_v22 = vadd.f32 %v805_v42, %v665_v52  ;;  %v870_v27 = vadd.f32 %v806_v26, %v666_v32  ;;  %1146 = vperm.xlu0 %4444, %v5856_v18  }
  0xbf   : > { %v664_v39 = vadd.f32 %v600_v12, %v460_v11  ;;  %v9029_v37 = vmov 1   ;;  %v871_v40 = vadd.f32 %v807_v23, %v667_v34  ;;  %v872_v41 = vadd.f32 %v808_v4, %v668_v0  ;;  %v6134_v23 = vld [vmem:[%s8958_s2 + $0x18] sm:$0xff]  ;;  %v6150_v34 = vld [vmem:[%s8958_s2] sm:$0xff] }
  0xc0   : > { %v6085_v45 = vpop.permute.xlu1 %367  ;;  %924 = vperm.xlu1 %4432, %v6061_v29   ;;  %v867_v2 = vadd.f32 %v803_v1, %v663_v25  ;;  %v1026_v59 = vadd.f32 %v6018_v16, %v866_v20  ;;  %4490 = vtanh.f32 %v1025_v10  ;;  %v9030_v18 = vmov 2   ;;  %9032 = vst [vmem:[#allocation11_spill] sm:$0xff] %v6134_v23 }
  0xc1   : > { %v868_v49 = vadd.f32 %v804_v19, %v664_v39  ;;  %v589_v19 = vmul.f32 %v5929_v46, %v5996_v43  ;;  %v449_v20 = vmul.f32 %v5937_v51, %v6085_v45  ;;  %v594_v10 = vmul.f32 %v5934_v50, %v5912_v31 }
  0xc2   : > { %v6104_v63 = vpop.permute.xlu2 %506  ;;  %4434 = vset.pattern.permute.xlu2 %v9028_v60  ;;  %v1027_v0 = vadd.f32 %v6018_v16, %v867_v2  ;;  %v595_v39 = vmul.f32 %v5956_v62, %v5912_v31 }
  0xc3   : > { %322 = vperm.xlu2 %4434, %v6098_v47   ;;  %v1028_v1 = vadd.f32 %v6018_v16, %v868_v49  ;;  %v455_v49 = vmul.f32 %v5944_v55, %v5921_v33 }
  0xc4   : > { %v6115_v35 = vpop.permute.xlu0 %939 }
  0xc6   : > { %1134 = vperm.xlu0 %4444, %v6134_v23  }
  0xc8   : > { %v965_v30 = vpop.permute.xlu1 %964  ;;  %4435 = vset.pattern.permute.xlu1 %v9029_v37 }
  0xc9   : > { %478 = vperm.xlu1 %4435, %v6098_v47   ;;  %v1029_v24 = vadd.f32 %v965_v30, %v869_v22  ;;  %v1030_v21 = vadd.f32 %v965_v30, %v870_v27  ;;  %v1031_v38 = vadd.f32 %v965_v30, %v871_v40  ;;  %v1032_v42 = vadd.f32 %v965_v30, %v872_v41 }
  0xca   : > { %v596_v22 = vmul.f32 %v5966_v6, %v5912_v31  ;;  %v590_v30 = vmul.f32 %v5934_v50, %v5996_v43  ;;  %v653_v40 = vadd.f32 %v589_v19, %v449_v20  ;;  %v793_v41 = vmul.f32 %v5948_v57, %v6048_v5 }
  0xcb   : > { %v6123_v53 = vpop.permute.xlu2 %954  ;;  %4492 = vtanh.f32 %v1029_v24  ;;  %4436 = vset.pattern.permute.xlu2 %v9030_v18  ;;  %v4491_v24 = vpop.eup %4490  ;;  %v6215_v19 = vmul.f32 %v5944_v55, %v6032_v48 }
  0xcc   : > { %v6126_v26 = vpop.permute.xlu0 %332  ;;  %4494 = vtanh.f32 %v1030_v21  ;;  %686 = vperm.xlu2 %4436, %v6042_v28  }
  0xcd   : > { %9031 = vst [vmem:[#allocation10_spill] sm:$0xff] %v6126_v26  ;;  %4496 = vtanh.f32 %v1026_v59  ;;  %v453_v59 = vmul.f32 %v5937_v51, %v5921_v33 }
  0xce   : > { %4498 = vtanh.f32 %v1031_v38  ;;  %1122 = vperm.xlu0 %4444, %v6150_v34   ;;  %v456_v38 = vmul.f32 %v5946_v56, %v5921_v33 }
  0xcf   : > { %4500 = vtanh.f32 %v1032_v42  ;;  %v591_v42 = vmul.f32 %v5956_v62, %v5996_v43 }
  0xd0   : > { %4502 = vtanh.f32 %v1027_v0  ;;  %v592_v0 = vmul.f32 %v5966_v6, %v5996_v43  ;;  %v857_v43 = vadd.f32 %v793_v41, %v653_v40 }
  0xd1   : > { %v4493_v52 = vpop.eup %4492  ;;  %v6137_v21 = vpop.permute.xlu1 %510  ;;  %4438 = vset.pattern.permute.xlu1 %v9028_v60  ;;  %4504 = vtanh.f32 %v1028_v1  ;;  %v451_v1 = vmul.f32 %v5944_v55, %v6085_v45 }
  0xd2   : > { %v4495_v28 = vpop.eup %4494  ;;  %317 = vperm.xlu1 %4438, %v6026_v36   ;;  %1187 = vmatpush.msra.mxu0 %v4493_v52  ;;  %v1017_v41 = vadd.f32 %v6056_v13, %v857_v43 }
  0xd3   : > { %v4497_v16 = vpop.eup %4496  ;;  %1252 = vmatpush.msra.mxu1 %v4495_v28  ;;  %v794_v28 = vmul.f32 %v5950_v58, %v6048_v5 }
  0xd4   : > { %v4499_v7 = vpop.eup %4498  ;;  %v6141_v32 = vpop.permute.xlu0 %929  ;;  %4439 = vset.pattern.permute.xlu2 %v9029_v37  ;;  %1188 = vmatpush.msra.mxu0 %v4491_v24  ;;  %v452_v24 = vmul.f32 %v5946_v56, %v6085_v45  ;;  %4506 = vtanh.f32 %v1017_v41 }
  0xd5   : > { %9033 = vst [vmem:[#allocation12_spill] sm:$0xff] %v6141_v32  ;;  %v6143_v12 = vpop.permute.xlu2 %710  ;;  %v4501_v11 = vpop.eup %4500  ;;  %1317 = vmatpush.msra.mxu2 %v4499_v7  ;;  %1253 = vmatpush.msra.mxu1 %v4497_v16 }
  0xd6   : > { %v4503_v3 = vpop.eup %4502  ;;  %1382 = vmatpush.msra.mxu3 %v4501_v11  ;;  %474 = vperm.xlu2 %4439, %v6026_v36   ;;  %v593_v36 = vmul.f32 %v5929_v46, %v5912_v31  ;;  %v454_v31 = vmul.f32 %v5942_v54, %v5921_v33  ;;  %v6202_v33 = vld [vmem:[%s8958_s2 + $0x10] sm:$0xff]  ;;  %v659_v11 = vadd.f32 %v595_v39, %v455_v49 }
  0xd7   : > { %v4505_v4 = vpop.eup %4504  ;;  %1318 = vmatpush.msra.mxu2 %v4503_v3  ;;  %9035 = vst [vmem:[#allocation14_spill] sm:$0xff] %v6202_v33  ;;  %v660_v3 = vadd.f32 %v596_v22, %v456_v38  ;;  %4448 = vset.pattern.permute.xlu0 %v9030_v18  ;;  %v655_v39 = vadd.f32 %v591_v42, %v451_v1 }
  0xd8   : > { %1383 = vmatpush.msra.mxu3 %v4505_v4  ;;  %v657_v16 = vadd.f32 %v593_v36, %v453_v59  ;;  %v658_v7 = vadd.f32 %v594_v10, %v454_v31  ;;  %v6211_v4 = vmul.f32 %v5942_v54, %v6032_v48  ;;  %1579 = vperm.xlu0 %4448, %v5838_v15  }
  0xd9   : > { %v6223_v36 = vmul.f32 %v5937_v51, %v6037_v17  ;;  %v6227_v10 = vmul.f32 %v5946_v56, %v6032_v48  ;;  %v795_v22 = vmul.f32 %v5954_v61, %v6048_v5  ;;  %v581_v31 = vmul.f32 %v5929_v46, %v6104_v63 }
  0xda   : > { %v6157_v25 = vpop.permute.xlu1 %357  ;;  %4440 = vset.pattern.permute.xlu1 %v9030_v18  ;;  %v583_v1 = vmul.f32 %v5956_v62, %v6104_v63  ;;  %v785_v18 = vmul.f32 %v5948_v57, %v6143_v12  ;;  %v786_v32 = vmul.f32 %v5950_v58, %v6143_v12 }
  0xdb   : > { %682 = vperm.xlu1 %4440, %v6098_v47   ;;  %v450_v47 = vmul.f32 %v5942_v54, %v6085_v45  ;;  %v6207_v45 = vmul.f32 %v5937_v51, %v6032_v48  ;;  %v441_v48 = vmul.f32 %v5937_v51, %v6157_v25 }
  0xdc   : > { %v6169_v27 = vpop.permute.xlu0 %919 }
  0xdd   : > { %9034 = vst [vmem:[#allocation13_spill] sm:$0xff] %v6169_v27  ;;  %v6177_v2 = vpop.permute.xlu2 %498  ;;  %v654_v52 = vadd.f32 %v590_v30, %v450_v47  ;;  %v656_v30 = vadd.f32 %v592_v0, %v452_v24  ;;  %v796_v47 = vmul.f32 %v5998_v44, %v6048_v5  ;;  %v6246_v5 = vld [vmem:[%s8958_s2 + $0x8] sm:$0xff]  ;;  %v582_v0 = vmul.f32 %v5934_v50, %v6104_v63 }
  0xde   : > { %4441 = vset.pattern.permute.xlu2 %v9028_v60  ;;  %v442_v24 = vmul.f32 %v5942_v54, %v6157_v25  ;;  %v584_v27 = vmul.f32 %v5966_v6, %v6104_v63  ;;  %v444_v63 = vmul.f32 %v5946_v56, %v6157_v25 }
  0xdf   : > { %914 = vperm.xlu2 %4441, %v6134_v23   ;;  %v858_v59 = vadd.f32 %v794_v28, %v654_v52  ;;  %v859_v23 = vadd.f32 %v795_v22, %v655_v39  ;;  %v860_v26 = vadd.f32 %v796_v47, %v656_v30 }
  0xe0   : > { %v646_v39 = vadd.f32 %v582_v0, %v442_v24  ;;  %1559 = vperm.xlu0 %4448, %v5832_v14   ;;  %v588_v14 = vmul.f32 %v5966_v6, %v6137_v21  ;;  %v6290_v24 = vmul.f32 %v5942_v54, %v6037_v17 }
  0xe1   : > { %v1019_v41 = vadd.f32 %v6056_v13, %v859_v23 }
  0xe2   : > { %v850_v0 = vadd.f32 %v786_v32, %v646_v39  ;;  %v1020_v32 = vadd.f32 %v6056_v13, %v860_v26  ;;  %v573_v26 = vmul.f32 %v5929_v46, %v6177_v2  ;;  %v576_v39 = vmul.f32 %v5966_v6, %v6177_v2 }
  0xe3   : > { %v6217_v20 = vpop.permute.xlu1 %714  ;;  %4442 = vset.pattern.permute.xlu1 %v9028_v60 }
  0xe4   : > { %909 = vperm.xlu1 %4442, %v6202_v33   ;;  %v645_v33 = vadd.f32 %v581_v31, %v441_v48  ;;  %v4507_v31 = vpop.eup %4506 }
  0xe5   : > { %v723_v40 = vpop.permute.xlu0 %722 }
  0xe6   : > { %v797_v49 = vmul.f32 %v5948_v57, %v723_v40  ;;  %v798_v38 = vmul.f32 %v5950_v58, %v723_v40  ;;  %v6241_v42 = vpop.permute.xlu2 %342  ;;  %v799_v52 = vmul.f32 %v5954_v61, %v723_v40  ;;  %v800_v28 = vmul.f32 %v5998_v44, %v723_v40 }
  0xe7   : > { %9036 = vst [vmem:[#allocation15_spill] sm:$0xff] %v6241_v42  ;;  %v1018_v42 = vadd.f32 %v6056_v13, %v858_v59  ;;  %904 = vperm.xlu2 %4441, %v6246_v5   ;;  %v585_v59 = vmul.f32 %v5929_v46, %v6137_v21  ;;  %v849_v23 = vadd.f32 %v785_v18, %v645_v33 }
  0xe8   : > { %v861_v43 = vadd.f32 %v797_v49, %v657_v16  ;;  %v862_v60 = vadd.f32 %v798_v38, %v658_v7  ;;  %v443_v7 = vmul.f32 %v5944_v55, %v6157_v25  ;;  %v863_v22 = vadd.f32 %v799_v52, %v659_v11  ;;  %1547 = vperm.xlu0 %4448, %v6061_v29  }
  0xe9   : > { %v864_v30 = vadd.f32 %v800_v28, %v660_v3  ;;  %v586_v25 = vmul.f32 %v5934_v50, %v6137_v21  ;;  %v587_v11 = vmul.f32 %v5956_v62, %v6137_v21  ;;  %v787_v3 = vmul.f32 %v5954_v61, %v6143_v12 }
  0xea   : > { %v1021_v16 = vadd.f32 %v6123_v53, %v861_v43  ;;  %v1022_v40 = vadd.f32 %v6123_v53, %v862_v60  ;;  %v788_v60 = vmul.f32 %v5998_v44, %v6143_v12  ;;  %v647_v48 = vadd.f32 %v583_v1, %v443_v7 }
  0xeb   : > { %v648_v49 = vadd.f32 %v584_v27, %v444_v63  ;;  %v1023_v38 = vadd.f32 %v6123_v53, %v863_v22  ;;  %v6294_v21 = vmul.f32 %v5944_v55, %v6037_v17  ;;  %v1024_v12 = vadd.f32 %v6123_v53, %v864_v30 }
  0xec   : > { %v6270_v47 = vpop.permute.xlu1 %502  ;;  %899 = vperm.xlu1 %4442, %v6150_v34   ;;  %4508 = vtanh.f32 %v1021_v16  ;;  %v6301_v18 = vmul.f32 %v5946_v56, %v6037_v17  ;;  %v649_v27 = vadd.f32 %v585_v59, %v6207_v45  ;;  %v650_v1 = vadd.f32 %v586_v25, %v6211_v4 }
  0xed   : > { %4510 = vtanh.f32 %v1018_v42  ;;  %v651_v52 = vadd.f32 %v587_v11, %v6215_v19  ;;  %v652_v28 = vadd.f32 %v588_v14, %v6227_v10  ;;  %v1009_v53 = vadd.f32 %v6115_v35, %v849_v23 }
  0xee   : > { %4512 = vtanh.f32 %v1022_v40  ;;  %v1010_v45 = vadd.f32 %v6115_v35, %v850_v0  ;;  %v851_v43 = vadd.f32 %v787_v3, %v647_v48  ;;  %v852_v13 = vadd.f32 %v788_v60, %v648_v49 }
  0xef   : > { %v6296_v42 = vpop.permute.xlu2 %702  ;;  %4514 = vtanh.f32 %v1019_v41  ;;  %4443 = vset.pattern.permute.xlu2 %v9029_v37  ;;  %v789_v4 = vmul.f32 %v5948_v57, %v6217_v20  ;;  %v790_v19 = vmul.f32 %v5950_v58, %v6217_v20  ;;  %v575_v10 = vmul.f32 %v5956_v62, %v6177_v2  ;;  %v707_v41 = vpop.permute.xlu0 %706 }
  0xf0   : > { %1182 = vperm.xlu2 %4443, %v5804_v9   ;;  %4516 = vtanh.f32 %v1023_v38  ;;  %v574_v9 = vmul.f32 %v5934_v50, %v6177_v2  ;;  %v791_v16 = vmul.f32 %v5954_v61, %v6217_v20  ;;  %v792_v22 = vmul.f32 %v5998_v44, %v6217_v20 }
  0xf1   : > { %4518 = vtanh.f32 %v1024_v12  ;;  %v1011_v25 = vadd.f32 %v6115_v35, %v851_v43  ;;  %v777_v11 = vmul.f32 %v5948_v57, %v6296_v42  ;;  %v853_v14 = vadd.f32 %v789_v4, %v649_v27 }
  0xf2   : > { %v4509_v33 = vpop.eup %4508  ;;  %4520 = vtanh.f32 %v1020_v32  ;;  %v854_v3 = vadd.f32 %v790_v19, %v650_v1  ;;  %v577_v60 = vmul.f32 %v5929_v46, %v6270_v47  ;;  %v578_v23 = vmul.f32 %v5934_v50, %v6270_v47 }
  0xf3   : > { %v4511_v17 = vpop.eup %4510  ;;  %1189 = vmatpush.msra.mxu0 %v4509_v33  ;;  %4522 = vtanh.f32 %v1009_v53  ;;  %v580_v38 = vmul.f32 %v5966_v6, %v6270_v47  ;;  %v781_v0 = vmul.f32 %v5948_v57, %v707_v41  ;;  %v856_v27 = vadd.f32 %v792_v22, %v652_v28 }
  0xf4   : > { %4445 = vset.pattern.permute.xlu1 %v9029_v37  ;;  %v4513_v63 = vpop.eup %4512  ;;  %4524 = vtanh.f32 %v1010_v45  ;;  %v782_v33 = vmul.f32 %v5950_v58, %v707_v41  ;;  %v783_v1 = vmul.f32 %v5954_v61, %v707_v41  ;;  %v778_v53 = vmul.f32 %v5950_v58, %v6296_v42 }
  0xf5   : > { %v348_v7 = vpop.permute.xlu1 %347  ;;  %1190 = vmatpush.msra.mxu0 %v4507_v31  ;;  %1174 = vperm.xlu1 %4445, %v5838_v15   ;;  %v4515_v40 = vpop.eup %4514  ;;  %v1012_v15 = vadd.f32 %v6115_v35, %v852_v13  ;;  %v579_v31 = vmul.f32 %v5956_v62, %v6270_v47  ;;  %v855_v35 = vadd.f32 %v791_v16, %v651_v52  ;;  %4526 = vtanh.f32 %v1011_v25 }
  0xf6   : > { %v433_v30 = vmul.f32 %v5937_v51, %v348_v7  ;;  %1254 = vmatpush.msra.mxu1 %v4513_v63  ;;  %v434_v59 = vmul.f32 %v5942_v54, %v348_v7  ;;  %v4517_v20 = vpop.eup %4516  ;;  %v435_v12 = vmul.f32 %v5944_v55, %v348_v7  ;;  %v784_v47 = vmul.f32 %v5998_v44, %v707_v41  ;;  %v9038_v41 = vld [vmem:[#allocation14_spill] sm:$0xff] }
  0xf7   : > { %v4519_v49 = vpop.eup %4518  ;;  %1319 = vmatpush.msra.mxu2 %v4517_v20  ;;  %v436_v45 = vmul.f32 %v5946_v56, %v348_v7  ;;  %v641_v13 = vadd.f32 %v577_v60, %v6223_v36  ;;  %v643_v4 = vadd.f32 %v579_v31, %v6294_v21  ;;  %v779_v19 = vmul.f32 %v5954_v61, %v6296_v42 }
  0xf8   : > { %v637_v2 = vadd.f32 %v573_v26, %v433_v30  ;;  %1255 = vmatpush.msra.mxu1 %v4511_v17  ;;  %v6343_v48 = vpop.permute.xlu2 %490  ;;  %v4521_v32 = vpop.eup %4520  ;;  %1384 = vmatpush.msra.mxu3 %v4519_v49  ;;  %v638_v52 = vadd.f32 %v574_v9, %v434_v59  ;;  %v642_v26 = vadd.f32 %v578_v23, %v6290_v24  ;;  %v9037_v30 = vld [vmem:[#allocation8_spill] sm:$0xff]  ;;  %4528 = vtanh.f32 %v1012_v15 }
  0xf9   : > { %v6353_v17 = vpop.eup %4522  ;;  %1320 = vmatpush.msra.mxu2 %v4515_v40  ;;  %1170 = vperm.xlu2 %4443, %v5799_v8   ;;  %v639_v16 = vadd.f32 %v575_v10, %v435_v12  ;;  %v644_v8 = vadd.f32 %v580_v38, %v6301_v18  ;;  %v780_v24 = vmul.f32 %v5998_v44, %v6296_v42  ;;  %v9039_v59 = vld [vmem:[#allocation12_spill] sm:$0xff] }
  0xfa   : > { %v841_v43 = vadd.f32 %v777_v11, %v637_v2  ;;  %v4525_v28 = vpop.eup %4524  ;;  %1385 = vmatpush.msra.mxu3 %v4521_v32  ;;  %v842_v36 = vadd.f32 %v778_v53, %v638_v52  ;;  %1535 = vperm.xlu0 %4448, %v9038_v41   ;;  %v640_v21 = vadd.f32 %v576_v39, %v436_v45  ;;  %v6373_v39 = vld [vmem:[%s8958_s2 + $0x50] sm:$0xff]  ;;  %v5507_v12 = vld [vmem:[%s8958_s2 + $0x40] sm:$0xff] }
  0xfb   : > { %v845_v10 = vadd.f32 %v781_v0, %v641_v13  ;;  %v846_v11 = vadd.f32 %v782_v33, %v642_v26  ;;  %v4527_v2 = vpop.eup %4526  ;;  %v843_v18 = vadd.f32 %v779_v19, %v639_v16  ;;  %v848_v23 = vadd.f32 %v784_v47, %v644_v8  ;;  %v9040_v26 = vld [vmem:[#allocation9_spill] sm:$0xff] }
  0xfc   : > { %v1001_v25 = vadd.f32 %v9039_v59, %v841_v43  ;;  %v1002_v60 = vadd.f32 %v9039_v59, %v842_v36  ;;  %v844_v42 = vadd.f32 %v780_v24, %v640_v21  ;;  %v5510_v21 = vld [vmem:[%s8958_s2 + $0x70] sm:$0xff] }
  0xfd   : > { %v945_v9 = vpop.permute.xlu1 %944  ;;  %1166 = vperm.xlu1 %4445, %v9037_v30   ;;  %v1003_v32 = vadd.f32 %v9039_v59, %v843_v18  ;;  %v5509_v30 = vld [vmem:[%s8958_s2 + $0x78] sm:$0xff]  ;;  %v567_v18 = vmul.f32 %v5956_v62, %v6343_v48 }
  0xfe   : > { %v1013_v63 = vadd.f32 %v945_v9, %v853_v14  ;;  %v1014_v7 = vadd.f32 %v945_v9, %v854_v3  ;;  %v1015_v22 = vadd.f32 %v945_v9, %v855_v35  ;;  %v1016_v40 = vadd.f32 %v945_v9, %v856_v27  ;;  %v4529_v35 = vpop.eup %4528 }
  0xff   : > { %v847_v14 = vadd.f32 %v783_v1, %v643_v4  ;;  %v1004_v1 = vadd.f32 %v9039_v59, %v844_v42  ;;  %v5511_v59 = vld [vmem:[%s8958_s2 + $0x60] sm:$0xff]  ;;  %v9043_v42 = vld [vmem:[#allocation15_spill] sm:$0xff] }
 0x100   : > { %4530 = vtanh.f32 %v1013_v63  ;;  %v6393_v63 = vld [vmem:[%s8958_s2 + $0x20] sm:$0xff] }
 0x101   : > { %4532 = vtanh.f32 %v1014_v7  ;;  %v935_v3 = vpop.permute.xlu2 %934  ;;  %1162 = vperm.xlu2 %4443, %v6373_v39  }
 0x102   : > { %4534 = vtanh.f32 %v1015_v22  ;;  %v1005_v15 = vadd.f32 %v935_v3, %v845_v10  ;;  %v1006_v20 = vadd.f32 %v935_v3, %v846_v11  ;;  %v1007_v31 = vadd.f32 %v935_v3, %v847_v14 }
 0x103   : > { %4536 = vtanh.f32 %v1016_v40  ;;  %v1008_v0 = vadd.f32 %v935_v3, %v848_v23  ;;  %v9041_v22 = vmov 2   ;;  %v565_v40 = vmul.f32 %v5929_v46, %v6343_v48 }
 0x104   : > { %4538 = vtanh.f32 %v1001_v25  ;;  %v9042_v25 = vld [vmem:[#allocation10_spill] sm:$0xff] }
 0x105   : > { %4540 = vtanh.f32 %v1005_v15  ;;  %1154 = vperm.xlu1 %4445, %v5507_v12   ;;  %v6419_v10 = vmul.f32 %v5937_v51, %v9042_v25  ;;  %v6423_v11 = vmul.f32 %v5942_v54, %v9042_v25  ;;  %v423_v23 = vmul.f32 %v5944_v55, %v9042_v25 }
 0x106   : > { %v4531_v49 = vpop.eup %4530  ;;  %v6376_v38 = vpop.permute.xlu1 %494  ;;  %4542 = vtanh.f32 %v1006_v20  ;;  %v430_v12 = vmul.f32 %v5942_v54, %v9043_v42 }
 0x107   : > { %v4533_v27 = vpop.eup %4532  ;;  %1191 = vmatpush.msra.mxu0 %v4531_v49  ;;  %4544 = vtanh.f32 %v1002_v60  ;;  %v569_v49 = vmul.f32 %v5929_v46, %v6376_v38 }
 0x108   : > { %v4535_v33 = vpop.eup %4534  ;;  %1256 = vmatpush.msra.mxu1 %v4533_v27  ;;  %4546 = vtanh.f32 %v1007_v31  ;;  %v424_v31 = vmul.f32 %v5946_v56, %v9042_v25  ;;  %v568_v27 = vmul.f32 %v5966_v6, %v6343_v48 }
 0x109   : > { %v4537_v53 = vpop.eup %4536  ;;  %1321 = vmatpush.msra.mxu2 %v4535_v33  ;;  %1192 = vmatpush.msra.mxu0 %v6353_v17  ;;  %4548 = vtanh.f32 %v1008_v0 }
 0x10a   : > { %v4539_v52 = vpop.eup %4538  ;;  %1386 = vmatpush.msra.mxu3 %v4537_v53  ;;  %1257 = vmatpush.msra.mxu1 %v4525_v28  ;;  %4550 = vtanh.f32 %v1003_v32  ;;  %v6384_v45 = vpop.permute.xlu2 %694  ;;  %v570_v32 = vmul.f32 %v5934_v50, %v6376_v38  ;;  %v572_v53 = vmul.f32 %v5966_v6, %v6376_v38 }
 0x10b   : > { %v4541_v47 = vpop.eup %4540  ;;  %1322 = vmatpush.msra.mxu2 %v4527_v2  ;;  %4552 = vtanh.f32 %v1004_v1  ;;  %1150 = vperm.xlu2 %4443, %v9040_v26   ;;  %v769_v14 = vmul.f32 %v5948_v57, %v6384_v45  ;;  %v770_v60 = vmul.f32 %v5950_v58, %v6384_v45  ;;  %v571_v1 = vmul.f32 %v5956_v62, %v6376_v38  ;;  %v691_v26 = vpop.permute.xlu0 %690 }
 0x10c   : > { %v4543_v43 = vpop.eup %4542  ;;  %1387 = vmatpush.msra.mxu3 %v4529_v35  ;;  %1193 = vmatpush.msra.mxu0 %v4541_v47  ;;  %v429_v35 = vmul.f32 %v5937_v51, %v9043_v42 }
 0x10d   : > { %v4545_v13 = vpop.eup %4544  ;;  %1258 = vmatpush.msra.mxu1 %v4543_v43  ;;  %1142 = vperm.xlu1 %4445, %v6061_v29  }
 0x10e   : > { %v4547_v4 = vpop.eup %4546  ;;  %1194 = vmatpush.msra.mxu0 %v4539_v52  ;;  %v771_v52 = vmul.f32 %v5954_v61, %v6384_v45 }
 0x10f   : > { %1323 = vmatpush.msra.mxu2 %v4547_v4  ;;  %1259 = vmatpush.msra.mxu1 %v4545_v13  ;;  %v338_v17 = vpop.permute.xlu1 %337  ;;  %v4549_v28 = vpop.eup %4548 }
 0x110   : > { %v4551_v19 = vpop.eup %4550  ;;  %1388 = vmatpush.msra.mxu3 %v4549_v28  ;;  %v425_v36 = vmul.f32 %v5937_v51, %v338_v17  ;;  %v426_v24 = vmul.f32 %v5942_v54, %v338_v17  ;;  %v427_v15 = vmul.f32 %v5944_v55, %v338_v17  ;;  %v428_v33 = vmul.f32 %v5946_v56, %v338_v17 }
 0x111   : > { %v4553_v9 = vpop.eup %4552  ;;  %1324 = vmatpush.msra.mxu2 %v4551_v19  ;;  %v431_v17 = vmul.f32 %v5944_v55, %v9043_v42  ;;  %v432_v28 = vmul.f32 %v5946_v56, %v9043_v42  ;;  %v633_v19 = vadd.f32 %v569_v49, %v429_v35  ;;  %v766_v49 = vmul.f32 %v5950_v58, %v691_v26 }
 0x112   : > { %1389 = vmatpush.msra.mxu3 %v4553_v9  ;;  %v629_v2 = vadd.f32 %v565_v40, %v425_v36  ;;  %v631_v43 = vadd.f32 %v567_v18, %v427_v15  ;;  %v5512_v9 = vld [vmem:[%s8958_s2 + $0x58] sm:$0xff]  ;;  %v772_v40 = vmul.f32 %v5998_v44, %v6384_v45 }
 0x113   : > { %1138 = vperm.xlu2 %4443, %v6393_v63  }
 0x114   : > { %v6388_v16 = vpop.permute.xlu2 %482  ;;  %v833_v47 = vadd.f32 %v769_v14, %v629_v2  ;;  %v835_v15 = vadd.f32 %v771_v52, %v631_v43 }
 0x115   : > { %1130 = vperm.xlu1 %4445, %v9038_v41   ;;  %v566_v41 = vmul.f32 %v5934_v50, %v6343_v48 }
 0x117   : > { %v630_v20 = vadd.f32 %v566_v41, %v426_v24  ;;  %v635_v41 = vadd.f32 %v571_v1, %v431_v17  ;;  %v636_v24 = vadd.f32 %v572_v53, %v432_v28  ;;  %v767_v53 = vmul.f32 %v5954_v61, %v691_v26 }
 0x118   : > { %v699_v29 = vpop.permute.xlu1 %698 }
 0x119   : > { %v773_v13 = vmul.f32 %v5948_v57, %v699_v29  ;;  %v774_v48 = vmul.f32 %v5950_v58, %v699_v29  ;;  %v834_v4 = vadd.f32 %v770_v60, %v630_v20  ;;  %v775_v38 = vmul.f32 %v5954_v61, %v699_v29 }
 0x11a   : > { %v776_v36 = vmul.f32 %v5998_v44, %v699_v29 }
 0x11b   : > { %1126 = vperm.xlu2 %4443, %v6246_v5   ;;  %v837_v2 = vadd.f32 %v773_v13, %v633_v19  ;;  %v839_v42 = vadd.f32 %v775_v38, %v635_v41  ;;  %v5514_v19 = vld [vmem:[%s8958_s2 + $0x38] sm:$0xff] }
 0x11d   : > { %v6398_v7 = vpop.permute.xlu2 %322  ;;  %4446 = vset.pattern.permute.xlu1 %v9041_v22 }
 0x11e   : > { %1587 = vperm.xlu1 %4446, %v5509_v30   ;;  %v632_v30 = vadd.f32 %v568_v27, %v428_v33 }
 0x120   : > { %v836_v27 = vadd.f32 %v772_v40, %v632_v30 }
 0x121   : > { %v487_v8 = vpop.permute.xlu1 %486 }
 0x122   : > { %v561_v20 = vmul.f32 %v5929_v46, %v487_v8  ;;  %v562_v60 = vmul.f32 %v5934_v50, %v487_v8  ;;  %v563_v45 = vmul.f32 %v5956_v62, %v487_v8  ;;  %v564_v35 = vmul.f32 %v5966_v6, %v487_v8  ;;  %v5513_v8 = vld [vmem:[%s8958_s2 + $0x48] sm:$0xff] }
 0x123   : > { %4447 = vset.pattern.permute.xlu2 %v9041_v22  ;;  %v634_v22 = vadd.f32 %v570_v32, %v430_v12  ;;  %v840_v12 = vadd.f32 %v776_v36, %v636_v24 }
 0x124   : > { %1583 = vperm.xlu2 %4447, %v5510_v21   ;;  %v765_v21 = vmul.f32 %v5948_v57, %v691_v26  ;;  %v625_v43 = vadd.f32 %v561_v20, %v6419_v10  ;;  %v626_v13 = vadd.f32 %v562_v60, %v6423_v11  ;;  %v628_v17 = vadd.f32 %v564_v35, %v424_v31 }
 0x125   : > { %v838_v14 = vadd.f32 %v774_v48, %v634_v22  ;;  %v627_v48 = vadd.f32 %v563_v45, %v423_v23  ;;  %v557_v35 = vmul.f32 %v5929_v46, %v6388_v16 }
 0x126   : > { %1575 = vperm.xlu1 %4446, %v5511_v59   ;;  %v6427_v3 = vpop.permute.xlu2 %686  ;;  %v9044_v59 = vld [vmem:[#allocation13_spill] sm:$0xff]  ;;  %v829_v11 = vadd.f32 %v765_v21, %v625_v43  ;;  %v830_v23 = vadd.f32 %v766_v49, %v626_v13  ;;  %v5515_v21 = vld [vmem:[%s8958_s2 + $0x30] sm:$0xff]  ;;  %v558_v49 = vmul.f32 %v5934_v50, %v6388_v16 }
 0x127   : > { %v993_v25 = vadd.f32 %v9044_v59, %v833_v47  ;;  %v994_v18 = vadd.f32 %v9044_v59, %v834_v4  ;;  %v995_v47 = vadd.f32 %v9044_v59, %v835_v15  ;;  %v768_v4 = vmul.f32 %v5998_v44, %v691_v26 }
 0x128   : > { %v996_v28 = vadd.f32 %v9044_v59, %v836_v27  ;;  %v831_v38 = vadd.f32 %v767_v53, %v627_v48  ;;  %v560_v53 = vmul.f32 %v5966_v6, %v6388_v16  ;;  %v762_v43 = vmul.f32 %v5950_v58, %v6427_v3 }
 0x129   : > { %4554 = vtanh.f32 %v993_v25  ;;  %v832_v30 = vadd.f32 %v768_v4, %v628_v17 }
 0x12a   : > { %v6442_v0 = vpop.permute.xlu1 %327  ;;  %4556 = vtanh.f32 %v994_v18 }
 0x12b   : > { %v420_v13 = vmul.f32 %v5946_v56, %v6442_v0 }
 0x12c   : > { %1571 = vperm.xlu2 %4447, %v5512_v9  }
 0x12e   : > { %1567 = vperm.xlu1 %4446, %v6373_v39  }
 0x12f   : > { %v4555_v10 = vpop.eup %4554 }
 0x130   : > { %v6477_v29 = vpop.permute.xlu2 %474  ;;  %v4557_v9 = vpop.eup %4556 }
 0x132   : > { %v925_v39 = vpop.permute.xlu1 %924 }
 0x133   : > { %v997_v32 = vadd.f32 %v925_v39, %v837_v2  ;;  %v998_v33 = vadd.f32 %v925_v39, %v838_v14  ;;  %v999_v1 = vadd.f32 %v925_v39, %v839_v42  ;;  %v1000_v52 = vadd.f32 %v925_v39, %v840_v12  ;;  %v9045_v39 = vld [vmem:[#allocation11_spill] sm:$0xff] }
 0x134   : > { %1563 = vperm.xlu2 %4447, %v5513_v8   ;;  %v418_v12 = vmul.f32 %v5942_v54, %v6442_v0 }
 0x135   : > { %4558 = vtanh.f32 %v997_v32 }
 0x136   : > { %4560 = vtanh.f32 %v998_v33  ;;  %1555 = vperm.xlu1 %4446, %v5514_v19   ;;  %v559_v33 = vmul.f32 %v5956_v62, %v6388_v16  ;;  %v622_v4 = vadd.f32 %v558_v49, %v418_v12 }
 0x137   : > { %4562 = vtanh.f32 %v999_v1  ;;  %v419_v1 = vmul.f32 %v5944_v55, %v6442_v0 }
 0x138   : > { %4564 = vtanh.f32 %v1000_v52  ;;  %v413_v52 = vmul.f32 %v5937_v51, %v6398_v7 }
 0x139   : > { %4566 = vtanh.f32 %v995_v47  ;;  %v915_v22 = vpop.permute.xlu2 %914  ;;  %v761_v47 = vmul.f32 %v5948_v57, %v6427_v3 }
 0x13a   : > { %4568 = vtanh.f32 %v996_v28  ;;  %v989_v40 = vadd.f32 %v915_v22, %v829_v11  ;;  %v990_v36 = vadd.f32 %v915_v22, %v830_v23  ;;  %v991_v41 = vadd.f32 %v915_v22, %v831_v38 }
 0x13b   : > { %v6493_v26 = vpop.permute.xlu1 %478  ;;  %v4559_v31 = vpop.eup %4558  ;;  %v992_v59 = vadd.f32 %v915_v22, %v832_v30  ;;  %v623_v23 = vadd.f32 %v559_v33, %v419_v1  ;;  %v415_v30 = vmul.f32 %v5944_v55, %v6398_v7 }
 0x13c   : > { %v4561_v24 = vpop.eup %4560  ;;  %1195 = vmatpush.msra.mxu0 %v4559_v31  ;;  %4570 = vtanh.f32 %v989_v40  ;;  %1551 = vperm.xlu2 %4447, %v5515_v21   ;;  %v553_v27 = vmul.f32 %v5929_v46, %v6493_v26  ;;  %v554_v32 = vmul.f32 %v5934_v50, %v6493_v26  ;;  %v555_v11 = vmul.f32 %v5956_v62, %v6493_v26 }
 0x13d   : > { %v4563_v25 = vpop.eup %4562  ;;  %1260 = vmatpush.msra.mxu1 %v4561_v24  ;;  %4572 = vtanh.f32 %v990_v36  ;;  %v416_v31 = vmul.f32 %v5946_v56, %v6398_v7 }
 0x13e   : > { %v4565_v2 = vpop.eup %4564  ;;  %1325 = vmatpush.msra.mxu2 %v4563_v25  ;;  %1196 = vmatpush.msra.mxu0 %v4555_v10  ;;  %4574 = vtanh.f32 %v991_v41  ;;  %v617_v28 = vadd.f32 %v553_v27, %v413_v52  ;;  %v763_v10 = vmul.f32 %v5954_v61, %v6427_v3  ;;  %v624_v41 = vadd.f32 %v560_v53, %v420_v13  ;;  %v679_v27 = vpop.permute.xlu0 %678 }
 0x13f   : > { %v4567_v14 = vpop.eup %4566  ;;  %1390 = vmatpush.msra.mxu3 %v4565_v2  ;;  %1261 = vmatpush.msra.mxu1 %v4557_v9  ;;  %4576 = vtanh.f32 %v992_v59  ;;  %v826_v59 = vadd.f32 %v762_v43, %v622_v4  ;;  %v619_v25 = vadd.f32 %v555_v11, %v415_v30  ;;  %v756_v53 = vmul.f32 %v5998_v44, %v679_v27  ;;  %v1105_v11 = vld [vmem:[#allocation2] sm:$0xff]  ;;  %v1107_v30 = vld [vmem:[#allocation2 + $0x10] sm:$0xff] }
 0x140   : > { %v4569_v18 = vpop.eup %4568  ;;  %1326 = vmatpush.msra.mxu2 %v4567_v14  ;;  %1543 = vperm.xlu1 %4446, %v6393_v63   ;;  %v417_v63 = vmul.f32 %v5937_v51, %v6442_v0  ;;  %v556_v0 = vmul.f32 %v5966_v6, %v6493_v26  ;;  %v549_v26 = vmul.f32 %v5929_v46, %v6477_v29 }
 0x141   : > { %1391 = vmatpush.msra.mxu3 %v4569_v18  ;;  %v905_v38 = vpop.permute.xlu2 %904  ;;  %v827_v2 = vadd.f32 %v763_v10, %v623_v23  ;;  %v550_v14 = vmul.f32 %v5934_v50, %v6477_v29  ;;  %v552_v46 = vmul.f32 %v5966_v6, %v6477_v29 }
 0x142   : > { %v4571_v15 = vpop.eup %4570  ;;  %v621_v8 = vadd.f32 %v557_v35, %v417_v63  ;;  %v620_v18 = vadd.f32 %v556_v0, %v416_v31  ;;  %v1108_v31 = vld [vmem:[#allocation2 + $0x18] sm:$0xff] }
 0x143   : > { %v4573_v60 = vpop.eup %4572  ;;  %1197 = vmatpush.msra.mxu0 %v4571_v15  ;;  %v551_v15 = vmul.f32 %v5956_v62, %v6477_v29  ;;  %v754_v29 = vmul.f32 %v5950_v58, %v679_v27 }
 0x144   : > { %v318_v20 = vpop.permute.xlu1 %317  ;;  %v4575_v45 = vpop.eup %4574  ;;  %1262 = vmatpush.msra.mxu1 %v4573_v60  ;;  %1539 = vperm.xlu2 %4447, %v9045_v39   ;;  %v825_v24 = vadd.f32 %v761_v47, %v621_v8 }
 0x145   : > { %v4577_v42 = vpop.eup %4576  ;;  %1327 = vmatpush.msra.mxu2 %v4575_v45  ;;  %v410_v60 = vmul.f32 %v5942_v54, %v318_v20  ;;  %v411_v45 = vmul.f32 %v5944_v55, %v318_v20 }
 0x146   : > { %1392 = vmatpush.msra.mxu3 %v4577_v42  ;;  %v412_v42 = vmul.f32 %v5946_v56, %v318_v20  ;;  %v753_v56 = vmul.f32 %v5948_v57, %v679_v27 }
 0x147   : > { %v614_v55 = vadd.f32 %v550_v14, %v410_v60  ;;  %v615_v33 = vadd.f32 %v551_v15, %v411_v45  ;;  %v1119_v14 = vld [vmem:[#allocation2 + $0x70] sm:$0xff] }
 0x148   : > { %1531 = vperm.xlu1 %4446, %v6246_v5   ;;  %v414_v5 = vmul.f32 %v5942_v54, %v6398_v7  ;;  %v409_v7 = vmul.f32 %v5937_v51, %v318_v20  ;;  %v616_v6 = vadd.f32 %v552_v46, %v412_v42  ;;  %v755_v20 = vmul.f32 %v5954_v61, %v679_v27 }
 0x149   : > { %v818_v47 = vadd.f32 %v754_v29, %v614_v55 }
 0x14a   : > { %v618_v19 = vadd.f32 %v554_v32, %v414_v5  ;;  %v613_v32 = vadd.f32 %v549_v26, %v409_v7  ;;  %v819_v43 = vadd.f32 %v755_v20, %v615_v33  ;;  %v820_v8 = vadd.f32 %v756_v53, %v616_v6  ;;  %v1115_v26 = vld [vmem:[#allocation2 + $0x50] sm:$0xff]  ;;  %v1120_v7 = vld [vmem:[#allocation2 + $0x78] sm:$0xff] }
 0x14c   : > { %1527 = vperm.xlu2 %4447, %v6150_v34   ;;  %v764_v34 = vmul.f32 %v5998_v44, %v6427_v3  ;;  %v817_v5 = vadd.f32 %v753_v56, %v613_v32  ;;  %v6600_v56 = vpop.permute.xlu2 %1182 }
 0x14d   : > { %v683_v48 = vpop.permute.xlu1 %682 }
 0x14e   : > { %v757_v16 = vmul.f32 %v5948_v57, %v683_v48  ;;  %v758_v17 = vmul.f32 %v5950_v58, %v683_v48  ;;  %v759_v40 = vmul.f32 %v5954_v61, %v683_v48  ;;  %v760_v36 = vmul.f32 %v5998_v44, %v683_v48 }
 0x14f   : > { %v828_v50 = vadd.f32 %v764_v34, %v624_v41  ;;  %v1109_v34 = vld [vmem:[#allocation2 + $0x20] sm:$0xff]  ;;  %v1112_v41 = vld [vmem:[#allocation2 + $0x38] sm:$0xff] }
 0x150   : > { %v821_v9 = vadd.f32 %v757_v16, %v617_v28  ;;  %v822_v22 = vadd.f32 %v758_v17, %v618_v19  ;;  %v823_v39 = vadd.f32 %v759_v40, %v619_v25  ;;  %v824_v35 = vadd.f32 %v760_v36, %v620_v18  ;;  %v1110_v40 = vld [vmem:[#allocation2 + $0x28] sm:$0xff]  ;;  %v1111_v36 = vld [vmem:[#allocation2 + $0x30] sm:$0xff]  ;;  %v1116_v25 = vld [vmem:[#allocation2 + $0x58] sm:$0xff] }
 0x152   : > { %v981_v21 = vadd.f32 %v905_v38, %v821_v9  ;;  %v982_v3 = vadd.f32 %v905_v38, %v822_v22  ;;  %v983_v54 = vadd.f32 %v905_v38, %v823_v39  ;;  %v984_v1 = vadd.f32 %v905_v38, %v824_v35  ;;  %v1106_v22 = vld [vmem:[#allocation2 + $0x8] sm:$0xff] }
 0x154   : > { %4578 = vtanh.f32 %v981_v21  ;;  %v1117_v21 = vld [vmem:[#allocation2 + $0x60] sm:$0xff] }
 0x155   : > { %4580 = vtanh.f32 %v982_v3 }
 0x156   : > { %v910_v49 = vpop.permute.xlu1 %909 }
 0x157   : > { %v985_v51 = vadd.f32 %v910_v49, %v825_v24  ;;  %v986_v63 = vadd.f32 %v910_v49, %v826_v59  ;;  %v987_v12 = vadd.f32 %v910_v49, %v827_v2  ;;  %v988_v62 = vadd.f32 %v910_v49, %v828_v50  ;;  %v1113_v24 = vld [vmem:[#allocation2 + $0x40] sm:$0xff]  ;;  %v1114_v59 = vld [vmem:[#allocation2 + $0x48] sm:$0xff] }
 0x158   : > { %v1118_v2 = vld [vmem:[#allocation2 + $0x68] sm:$0xff] }
 0x159   : > { %4582 = vtanh.f32 %v985_v51 }
 0x15a   : > { %4584 = vtanh.f32 %v986_v63  ;;  %v4579_v52 = vpop.eup %4578 }
 0x15b   : > { %4586 = vtanh.f32 %v987_v12  ;;  %v4581_v13 = vpop.eup %4580 }
 0x15c   : > { %4588 = vtanh.f32 %v988_v62 }
 0x15d   : > { %4590 = vtanh.f32 %v983_v54 }
 0x15e   : > { %4592 = vtanh.f32 %v984_v1  ;;  %v900_v48 = vpop.permute.xlu1 %899 }
 0x15f   : > { %v4583_v4 = vpop.eup %4582  ;;  %v977_v16 = vadd.f32 %v900_v48, %v817_v5  ;;  %v978_v57 = vadd.f32 %v900_v48, %v818_v47  ;;  %v979_v17 = vadd.f32 %v900_v48, %v819_v43  ;;  %v980_v28 = vadd.f32 %v900_v48, %v820_v8  ;;  %v6610_v5 = vpop.permute.xlu0 %1178 }
 0x160   : > { %v4585_v58 = vpop.eup %4584  ;;  %1198 = vmatpush.msra.mxu0 %v4583_v4  ;;  %v6612_v47 = vpop.permute.xlu2 %1170 }
 0x161   : > { %v4587_v61 = vpop.eup %4586  ;;  %4594 = vtanh.f32 %v977_v16  ;;  %1263 = vmatpush.msra.mxu1 %v4585_v58 }
 0x162   : > { %v4589_v44 = vpop.eup %4588  ;;  %4596 = vtanh.f32 %v978_v57  ;;  %1328 = vmatpush.msra.mxu2 %v4587_v61  ;;  %1199 = vmatpush.msra.mxu0 %v4579_v52 }
 0x163   : > { %v4591_v19 = vpop.eup %4590  ;;  %4598 = vtanh.f32 %v979_v17  ;;  %1393 = vmatpush.msra.mxu3 %v4589_v44  ;;  %1264 = vmatpush.msra.mxu1 %v4581_v13 }
 0x164   : > { %v4593_v10 = vpop.eup %4592  ;;  %4600 = vtanh.f32 %v980_v28  ;;  %1329 = vmatpush.msra.mxu2 %v4591_v19 }
 0x165   : > { %1394 = vmatpush.msra.mxu3 %v4593_v10 }
 0x167   : > { %v4595_v23 = vpop.eup %4594  ;;  %v6614_v43 = vpop.permute.xlu1 %1174 }
 0x168   : > { %v4597_v0 = vpop.eup %4596  ;;  %1200 = vmatpush.msra.mxu0 %v4595_v23  ;;  %v6624_v16 = vpop.permute.xlu0 %1158 }
 0x169   : > { %v4599_v38 = vpop.eup %4598  ;;  %1265 = vmatpush.msra.mxu1 %v4597_v0  ;;  %1201 = vmatmul.f32.vlgmr.msra.gmra.mxu0 %v1105_v11  ;;  %v6626_v57 = vpop.permute.xlu2 %1162 }
 0x16a   : > { %v4601_v9 = vpop.eup %4600  ;;  %1330 = vmatpush.msra.mxu2 %v4599_v38  ;;  %1266 = vmatmul.f32.vlgmr.msra.gmra.mxu1 %v1105_v11 }
 0x16b   : > { %1395 = vmatpush.msra.mxu3 %v4601_v9  ;;  %1331 = vmatmul.f32.vlgmr.msra.gmra.mxu2 %v1105_v11 }
 0x16c   : > { %1396 = vmatmul.f32.vlgmr.msra.gmra.mxu3 %v1105_v11 }
 0x16f   : > { %v6636_v44 = vpop.permute.xlu1 %1166 }
 0x170   : > { %v6646_v0 = vpop.permute.xlu0 %1146 }
 0x171   : > { %1204 = vmatmul.f32.gmra.mxu0 %v1106_v22  ;;  %v6648_v38 = vpop.permute.xlu2 %1150 }
 0x172   : > { %1269 = vmatmul.f32.gmra.mxu1 %v1106_v22 }
 0x173   : > { %1334 = vmatmul.f32.gmra.mxu2 %v1106_v22 }
 0x174   : > { %1399 = vmatmul.f32.gmra.mxu3 %v1106_v22 }
 0x177   : > { %v6650_v9 = vpop.permute.xlu1 %1154 }
 0x179   : > { %1207 = vmatmul.f32.gmra.mxu0 %v1107_v30 }
 0x17a   : > { %1272 = vmatmul.f32.gmra.mxu1 %v1107_v30 }
 0x17b   : > { %1337 = vmatmul.f32.gmra.mxu2 %v1107_v30 }
 0x17c   : > { %1402 = vmatmul.f32.gmra.mxu3 %v1107_v30 }
 0x181   : > { %1210 = vmatmul.f32.gmra.mxu0 %v1108_v31 }
 0x182   : > { %1275 = vmatmul.f32.gmra.mxu1 %v1108_v31 }
 0x183   : > { %1340 = vmatmul.f32.gmra.mxu2 %v1108_v31 }
 0x184   : > { %1405 = vmatmul.f32.gmra.mxu3 %v1108_v31 }
 0x189   : > { %1213 = vmatmul.f32.gmra.mxu0 %v1109_v34 }
 0x18a   : > { %1278 = vmatmul.f32.gmra.mxu1 %v1109_v34 }
 0x18b   : > { %1343 = vmatmul.f32.gmra.mxu2 %v1109_v34 }
 0x18c   : > { %1408 = vmatmul.f32.gmra.mxu3 %v1109_v34 }
 0x191   : > { %1216 = vmatmul.f32.gmra.mxu0 %v1110_v40 }
 0x192   : > { %1281 = vmatmul.f32.gmra.mxu1 %v1110_v40 }
 0x193   : > { %1346 = vmatmul.f32.gmra.mxu2 %v1110_v40 }
 0x194   : > { %1411 = vmatmul.f32.gmra.mxu3 %v1110_v40  ;;  %v6660_v40 = vpop.permute.xlu0 %1134 }
 0x199   : > { %1219 = vmatmul.f32.gmra.mxu0 %v1111_v36 }
 0x19a   : > { %1284 = vmatmul.f32.gmra.mxu1 %v1111_v36 }
 0x19b   : > { %1349 = vmatmul.f32.gmra.mxu2 %v1111_v36 }
 0x19c   : > { %1414 = vmatmul.f32.gmra.mxu3 %v1111_v36  ;;  %v6662_v36 = vpop.permute.xlu2 %1138 }
 0x1a1   : > { %1222 = vmatmul.f32.gmra.mxu0 %v1112_v41 }
 0x1a2   : > { %1287 = vmatmul.f32.gmra.mxu1 %v1112_v41 }
 0x1a3   : > { %1352 = vmatmul.f32.gmra.mxu2 %v1112_v41 }
 0x1a4   : > { %1417 = vmatmul.f32.gmra.mxu3 %v1112_v41  ;;  %v6664_v41 = vpop.permute.xlu1 %1142 }
 0x1a9   : > { %1225 = vmatmul.f32.gmra.mxu0 %v1113_v24 }
 0x1aa   : > { %1290 = vmatmul.f32.gmra.mxu1 %v1113_v24 }
 0x1ab   : > { %1355 = vmatmul.f32.gmra.mxu2 %v1113_v24 }
 0x1ac   : > { %1420 = vmatmul.f32.gmra.mxu3 %v1113_v24 }
 0x1b1   : > { %1228 = vmatmul.f32.gmra.mxu0 %v1114_v59 }
 0x1b2   : > { %1293 = vmatmul.f32.gmra.mxu1 %v1114_v59 }
 0x1b3   : > { %1358 = vmatmul.f32.gmra.mxu2 %v1114_v59 }
 0x1b4   : > { %1423 = vmatmul.f32.gmra.mxu3 %v1114_v59 }
 0x1b9   : > { %1231 = vmatmul.f32.gmra.mxu0 %v1115_v26 }
 0x1ba   : > { %1296 = vmatmul.f32.gmra.mxu1 %v1115_v26 }
 0x1bb   : > { %1361 = vmatmul.f32.gmra.mxu2 %v1115_v26 }
 0x1bc   : > { %1426 = vmatmul.f32.gmra.mxu3 %v1115_v26 }
 0x1c1   : > { %1234 = vmatmul.f32.gmra.mxu0 %v1116_v25 }
 0x1c2   : > { %1299 = vmatmul.f32.gmra.mxu1 %v1116_v25 }
 0x1c3   : > { %1364 = vmatmul.f32.gmra.mxu2 %v1116_v25 }
 0x1c4   : > { %1429 = vmatmul.f32.gmra.mxu3 %v1116_v25 }
 0x1c9   : > { %1237 = vmatmul.f32.gmra.mxu0 %v1117_v21 }
 0x1ca   : > { %1302 = vmatmul.f32.gmra.mxu1 %v1117_v21 }
 0x1cb   : > { %1367 = vmatmul.f32.gmra.mxu2 %v1117_v21 }
 0x1cc   : > { %1432 = vmatmul.f32.gmra.mxu3 %v1117_v21  ;;  %v6674_v21 = vpop.permute.xlu0 %1122 }
 0x1cd   : > { %9052 = vst [vmem:[#allocation13_spill] sm:$0xff] %v6674_v21 }
 0x1d1   : > { %1240 = vmatmul.f32.gmra.mxu0 %v1118_v2 }
 0x1d2   : > { %1305 = vmatmul.f32.gmra.mxu1 %v1118_v2 }
 0x1d3   : > { %1370 = vmatmul.f32.gmra.mxu2 %v1118_v2 }
 0x1d4   : > { %1435 = vmatmul.f32.gmra.mxu3 %v1118_v2 }
 0x1d9   : > { %1243 = vmatmul.f32.gmra.mxu0 %v1119_v14 }
 0x1da   : > { %1308 = vmatmul.f32.gmra.mxu1 %v1119_v14 }
 0x1db   : > { %1373 = vmatmul.f32.gmra.mxu2 %v1119_v14 }
 0x1dc   : > { %1438 = vmatmul.f32.gmra.mxu3 %v1119_v14  ;;  %v6677_v14 = vpop.permute.xlu2 %1126 }
 0x1dd   : > { %9053 = vst [vmem:[#allocation11_spill] sm:$0xff] %v6677_v14 }
 0x1e1   : > { %1246 = vmatmul.f32.gmra.mxu0 %v1120_v7 }
 0x1e2   : > { %1311 = vmatmul.f32.gmra.mxu1 %v1120_v7 }
 0x1e3   : > { %1376 = vmatmul.f32.gmra.mxu2 %v1120_v7 }
 0x1e4   : > { %1441 = vmatmul.f32.gmra.mxu3 %v1120_v7 }
 0x1e6   : > { %v1202_v18 = vpop.f32.mrf.mxu0 }
 0x1e7   : > { %v1267_v3 = vpop.f32.mrf.mxu1  ;;  %v1203_v2 = vadd.f32 %v1202_v18, %v6674_v21 }
 0x1e8   : > { %v1268_v7 = vadd.f32 %v1267_v3, %v6674_v21 }
 0x1e9   : > { %4602 = vtanh.f32 %v1203_v2 }
 0x1ea   : > { %4604 = vtanh.f32 %v1268_v7 }
 0x1ee   : > { %v6562_v15 = vpop.f32.mrf.mxu2  ;;  %v1205_v60 = vpop.f32.mrf.mxu0 }
 0x1ef   : > { %9046 = vst [vmem:[#allocation8_spill] sm:$0xff] %v6562_v15  ;;  %v6564_v45 = vpop.f32.mrf.mxu3  ;;  %v6566_v39 = vpop.f32.mrf.mxu1  ;;  %v1206_v15 = vadd.f32 %v1205_v60, %v6677_v14 }
 0x1f0   : > { %9047 = vst [vmem:[#allocation14_spill] sm:$0xff] %v6564_v45 }
 0x1f1   : > { %4606 = vtanh.f32 %v1206_v15  ;;  %v6709_v15 = vpop.eup %4602 }
 0x1f2   : > { %9055 = vst [vmem:[#allocation17_spill] sm:$0xff] %v6709_v15 }
 0x1f6   : > { %v6568_v46 = vpop.f32.mrf.mxu2  ;;  %v6570_v42 = vpop.f32.mrf.mxu0 }
 0x1f7   : > { %9048 = vst [vmem:[#allocation12_spill] sm:$0xff] %v6568_v46  ;;  %v6572_v35 = vpop.f32.mrf.mxu3  ;;  %v6574_v49 = vpop.f32.mrf.mxu1 }
 0x1f8   : > { %9049 = vst [vmem:[#allocation9_spill] sm:$0xff] %v6572_v35 }
 0x1fe   : > { %v6576_v50 = vpop.f32.mrf.mxu2  ;;  %v6578_v51 = vpop.f32.mrf.mxu0 }
 0x1ff   : > { %9050 = vst [vmem:[#allocation10_spill] sm:$0xff] %v6576_v50  ;;  %v6580_v63 = vpop.f32.mrf.mxu3  ;;  %v6582_v12 = vpop.f32.mrf.mxu1  ;;  %v1212_v60 = vadd.f32 %v6578_v51, %v6660_v40 }
 0x200   : > { %9051 = vst [vmem:[#allocation15_spill] sm:$0xff] %v6580_v63  ;;  %v1271_v63 = vadd.f32 %v6566_v39, %v6677_v14  ;;  %v6691_v50 = vpop.permute.xlu1 %1130  ;;  %v1277_v21 = vadd.f32 %v6582_v12, %v6660_v40  ;;  %v6717_v12 = vpop.eup %4604 }
 0x201   : > { %9054 = vst [vmem:[#allocation16_spill] sm:$0xff] %v6691_v50  ;;  %v1209_v18 = vadd.f32 %v6570_v42, %v6691_v50  ;;  %v1274_v3 = vadd.f32 %v6574_v49, %v6691_v50 }
 0x202   : > { %4608 = vtanh.f32 %v1271_v63  ;;  %9056 = vst [vmem:[#allocation18_spill] sm:$0xff] %v6717_v12 }
 0x203   : > { %4610 = vtanh.f32 %v1209_v18 }
 0x204   : > { %4612 = vtanh.f32 %v1274_v3 }
 0x205   : > { %4614 = vtanh.f32 %v1212_v60 }
 0x206   : > { %v6584_v27 = vpop.f32.mrf.mxu2  ;;  %v6586_v62 = vpop.f32.mrf.mxu0  ;;  %4616 = vtanh.f32 %v1277_v21 }
 0x207   : > { %v6588_v32 = vpop.f32.mrf.mxu3  ;;  %v6590_v54 = vpop.f32.mrf.mxu1  ;;  %v1215_v39 = vadd.f32 %v6586_v62, %v6662_v36 }
 0x208   : > { %v1280_v42 = vadd.f32 %v6590_v54, %v6662_v36  ;;  %v6721_v54 = vpop.eup %4606 }
 0x209   : > { %9057 = vst [vmem:[#allocation19_spill] sm:$0xff] %v6721_v54  ;;  %4618 = vtanh.f32 %v1215_v39  ;;  %v6725_v3 = vpop.eup %4608 }
 0x20a   : > { %9058 = vst [vmem:[#allocation20_spill] sm:$0xff] %v6725_v3  ;;  %4620 = vtanh.f32 %v1280_v42  ;;  %v6729_v60 = vpop.eup %4610 }
 0x20b   : > { %9059 = vst [vmem:[#allocation21_spill] sm:$0xff] %v6729_v60  ;;  %v6733_v12 = vpop.eup %4612 }
 0x20c   : > { %9060 = vst [vmem:[#allocation22_spill] sm:$0xff] %v6733_v12  ;;  %v6737_v39 = vpop.eup %4614 }
 0x20d   : > { %9061 = vst [vmem:[#allocation23_spill] sm:$0xff] %v6737_v39  ;;  %v6741_v42 = vpop.eup %4616 }
 0x20e   : > { %v6592_v55 = vpop.f32.mrf.mxu2  ;;  %v6594_v33 = vpop.f32.mrf.mxu0  ;;  %9062 = vst [vmem:[#allocation24_spill] sm:$0xff] %v6741_v42 }
 0x20f   : > { %v6596_v1 = vpop.f32.mrf.mxu3  ;;  %v6598_v6 = vpop.f32.mrf.mxu1  ;;  %v1218_v49 = vadd.f32 %v6594_v33, %v6664_v41 }
 0x210   : > { %v1283_v62 = vadd.f32 %v6598_v6, %v6664_v41  ;;  %v6747_v15 = vpop.eup %4618 }
 0x211   : > { %4622 = vtanh.f32 %v1218_v49  ;;  %9063 = vst [vmem:[#allocation25_spill] sm:$0xff] %v6747_v15  ;;  %v6753_v3 = vpop.eup %4620 }
 0x212   : > { %4624 = vtanh.f32 %v1283_v62  ;;  %9064 = vst [vmem:[#allocation26_spill] sm:$0xff] %v6753_v3 }
 0x216   : > { %v6602_v29 = vpop.f32.mrf.mxu2  ;;  %v6604_v20 = vpop.f32.mrf.mxu0 }
 0x217   : > { %v6606_v53 = vpop.f32.mrf.mxu3  ;;  %v6608_v52 = vpop.f32.mrf.mxu1  ;;  %v1221_v18 = vadd.f32 %v6604_v20, %v6646_v0 }
 0x218   : > { %v1286_v33 = vadd.f32 %v6608_v52, %v6646_v0 }
 0x219   : > { %4626 = vtanh.f32 %v1221_v18 }
 0x21a   : > { %4628 = vtanh.f32 %v1286_v33  ;;  %v6757_v33 = vpop.eup %4622 }
 0x21b   : > { %v6761_v54 = vpop.eup %4624 }
 0x21c   : > { %9065 = vst [vmem:[#allocation27_spill] sm:$0xff] %v6761_v54 }
 0x21e   : > { %v6616_v13 = vpop.f32.mrf.mxu2  ;;  %v6618_v48 = vpop.f32.mrf.mxu0 }
 0x21f   : > { %v6620_v8 = vpop.f32.mrf.mxu3  ;;  %v6622_v4 = vpop.f32.mrf.mxu1  ;;  %v1224_v21 = vadd.f32 %v6618_v48, %v6648_v38 }
 0x220   : > { %v1289_v6 = vadd.f32 %v6622_v4, %v6648_v38 }
 0x221   : > { %4630 = vtanh.f32 %v1224_v21  ;;  %v6765_v21 = vpop.eup %4626 }
 0x222   : > { %4632 = vtanh.f32 %v1289_v6  ;;  %v6769_v12 = vpop.eup %4628 }
 0x226   : > { %v6628_v17 = vpop.f32.mrf.mxu2  ;;  %v6630_v58 = vpop.f32.mrf.mxu0 }
 0x227   : > { %v6632_v28 = vpop.f32.mrf.mxu3  ;;  %v6634_v61 = vpop.f32.mrf.mxu1  ;;  %v1227_v20 = vadd.f32 %v6630_v58, %v6650_v9 }
 0x228   : > { %v1292_v52 = vadd.f32 %v6634_v61, %v6650_v9 }
 0x229   : > { %4634 = vtanh.f32 %v1227_v20  ;;  %v6773_v20 = vpop.eup %4630 }
 0x22a   : > { %4636 = vtanh.f32 %v1292_v52  ;;  %v6776_v52 = vpop.eup %4632 }
 0x22e   : > { %v6638_v19 = vpop.f32.mrf.mxu2  ;;  %v6640_v10 = vpop.f32.mrf.mxu0 }
 0x22f   : > { %v6642_v11 = vpop.f32.mrf.mxu3  ;;  %v6644_v23 = vpop.f32.mrf.mxu1  ;;  %v1230_v4 = vadd.f32 %v6640_v10, %v6624_v16 }
 0x230   : > { %v1295_v58 = vadd.f32 %v6644_v23, %v6624_v16  ;;  %v6779_v42 = vpop.eup %4634 }
 0x231   : > { %4638 = vtanh.f32 %v1230_v4 }
 0x232   : > { %4640 = vtanh.f32 %v1295_v58 }
 0x236   : > { %v6652_v22 = vpop.f32.mrf.mxu2  ;;  %v6654_v30 = vpop.f32.mrf.mxu0 }
 0x237   : > { %v6656_v31 = vpop.f32.mrf.mxu3  ;;  %v6658_v34 = vpop.f32.mrf.mxu1  ;;  %v1233_v61 = vadd.f32 %v6654_v30, %v6626_v57 }
 0x238   : > { %v1298_v10 = vadd.f32 %v6658_v34, %v6626_v57 }
 0x239   : > { %4642 = vtanh.f32 %v1233_v61 }
 0x23a   : > { %4644 = vtanh.f32 %v1298_v10 }
 0x23e   : > { %v6666_v24 = vpop.f32.mrf.mxu2  ;;  %v6668_v59 = vpop.f32.mrf.mxu0 }
 0x23f   : > { %v6670_v26 = vpop.f32.mrf.mxu3  ;;  %v6672_v25 = vpop.f32.mrf.mxu1  ;;  %v1236_v6 = vadd.f32 %v6668_v59, %v6636_v44 }
 0x240   : > { %v1301_v23 = vadd.f32 %v6672_v25, %v6636_v44  ;;  %v6782_v25 = vpop.eup %4636 }
 0x241   : > { %4646 = vtanh.f32 %v1236_v6 }
 0x242   : > { %4648 = vtanh.f32 %v1301_v23 }
 0x246   : > { %v6680_v37 = vpop.f32.mrf.mxu2  ;;  %v6682_v45 = vpop.f32.mrf.mxu0 }
 0x247   : > { %v6685_v35 = vpop.f32.mrf.mxu3  ;;  %v6687_v46 = vpop.f32.mrf.mxu1  ;;  %v1239_v10 = vadd.f32 %v6682_v45, %v6612_v47 }
 0x248   : > { %v1304_v6 = vadd.f32 %v6687_v46, %v6612_v47 }
 0x24e   : > { %v6705_v2 = vpop.f32.mrf.mxu2  ;;  %v6707_v7 = vpop.f32.mrf.mxu0 }
 0x24f   : > { %v6713_v51 = vpop.f32.mrf.mxu3  ;;  %v6715_v63 = vpop.f32.mrf.mxu1 }
 0x256   : > { %v6745_v49 = vpop.f32.mrf.mxu2  ;;  %v1244_v48 = vpop.f32.mrf.mxu0 }
 0x257   : > { %v6751_v62 = vpop.f32.mrf.mxu3  ;;  %v1309_v18 = vpop.f32.mrf.mxu1  ;;  %v1245_v30 = vadd.f32 %v1244_v48, %v6610_v5 }
 0x258   : > { %v1310_v34 = vadd.f32 %v1309_v18, %v6610_v5  ;;  %v6785_v48 = vpop.eup %4638 }
 0x259   : > { %4650 = vtanh.f32 %v1245_v30  ;;  %v6789_v18 = vpop.eup %4640 }
 0x25a   : > { %4652 = vtanh.f32 %v1310_v34  ;;  %v6793_v3 = vpop.eup %4642 }
 0x25b   : > { %v6797_v23 = vpop.eup %4644 }
 0x25c   : > { %v4647_v45 = vpop.eup %4646 }
 0x25d   : > { %v4649_v30 = vpop.eup %4648 }
 0x25e   : > { %v1374_v4 = vpop.f32.mrf.mxu2  ;;  %v1247_v60 = vpop.f32.mrf.mxu0 }
 0x25f   : > { %v1439_v59 = vpop.f32.mrf.mxu3  ;;  %v1248_v58 = vadd.f32 %v1247_v60, %v6600_v56  ;;  %v1312_v39 = vpop.f32.mrf.mxu1  ;;  %v1242_v60 = vadd.f32 %v6707_v7, %v6614_v43  ;;  %v1375_v46 = vadd.f32 %v1374_v4, %v6610_v5 }
 0x260   : > { %v1313_v61 = vadd.f32 %v1312_v39, %v6600_v56  ;;  %v1307_v39 = vadd.f32 %v6715_v63, %v6614_v43  ;;  %v4651_v15 = vpop.eup %4650 }
 0x261   : > { %4654 = vtanh.f32 %v1248_v58  ;;  %v4653_v7 = vpop.eup %4652  ;;  %v1440_v58 = vadd.f32 %v1439_v59, %v6610_v5 }
 0x262   : > { %4656 = vtanh.f32 %v1313_v61  ;;  %v1372_v61 = vadd.f32 %v6745_v49, %v6614_v43  ;;  %v1366_v49 = vadd.f32 %v6680_v37, %v6636_v44 }
 0x263   : > { %4658 = vtanh.f32 %v1239_v10 }
 0x264   : > { %4660 = vtanh.f32 %v1304_v6  ;;  %v1437_v6 = vadd.f32 %v6751_v62, %v6614_v43  ;;  %v1431_v43 = vadd.f32 %v6685_v35, %v6636_v44  ;;  %v1363_v62 = vadd.f32 %v6666_v24, %v6626_v57 }
 0x265   : > { %4662 = vtanh.f32 %v1242_v60  ;;  %v1425_v44 = vadd.f32 %v6656_v31, %v6624_v16  ;;  %v1419_v31 = vadd.f32 %v6632_v28, %v6648_v38  ;;  %v9070_v60 = vld [vmem:[#allocation25_spill] sm:$0xff] }
 0x266   : > { %v1377_v14 = vpop.f32.mrf.mxu2  ;;  %4664 = vtanh.f32 %v1307_v39  ;;  %v9073_v39 = vld [vmem:[#allocation26_spill] sm:$0xff] }
 0x267   : > { %v1378_v34 = vadd.f32 %v1377_v14, %v6600_v56  ;;  %v1442_v54 = vpop.f32.mrf.mxu3  ;;  %v4655_v63 = vpop.eup %4654  ;;  %v1369_v14 = vadd.f32 %v6705_v2, %v6612_v47 }
 0x268   : > { %v1443_v50 = vadd.f32 %v1442_v54, %v6600_v56  ;;  %v4657_v10 = vpop.eup %4656  ;;  %1590 = vmatpush.msrb.mxu0 %v4655_v63  ;;  %v1434_v56 = vadd.f32 %v6713_v51, %v6612_v47  ;;  %v1360_v51 = vadd.f32 %v6652_v22, %v6624_v16  ;;  %v1422_v22 = vadd.f32 %v6642_v11, %v6650_v9  ;;  %v9077_v63 = vld [vmem:[#allocation8_spill] sm:$0xff] }
 0x269   : > { %4666 = vtanh.f32 %v1378_v34  ;;  %v4659_v4 = vpop.eup %4658  ;;  %1655 = vmatpush.msrb.mxu1 %v4657_v10  ;;  %v1354_v16 = vadd.f32 %v6628_v17, %v6648_v38  ;;  %v1348_v38 = vadd.f32 %v6602_v29, %v6664_v41  ;;  %v9075_v34 = vld [vmem:[#allocation23_spill] sm:$0xff]  ;;  %v9078_v10 = vld [vmem:[#allocation24_spill] sm:$0xff] }
 0x26a   : > { %4668 = vtanh.f32 %v1443_v50  ;;  %v4661_v5 = vpop.eup %4660  ;;  %1591 = vmatpush.msrb.mxu0 %v4651_v15  ;;  %v1428_v15 = vadd.f32 %v6670_v26, %v6626_v57  ;;  %v1357_v57 = vadd.f32 %v6638_v19, %v6650_v9  ;;  %v1351_v9 = vadd.f32 %v6616_v13, %v6646_v0 }
 0x26b   : > { %4670 = vtanh.f32 %v1375_v46  ;;  %v4663_v54 = vpop.eup %4662  ;;  %1656 = vmatpush.msrb.mxu1 %v4653_v7 }
 0x26c   : > { %4672 = vtanh.f32 %v1440_v58  ;;  %v4665_v50 = vpop.eup %4664  ;;  %1592 = vmatpush.msrb.mxu0 %v4663_v54  ;;  %v9076_v58 = vld [vmem:[#allocation13_spill] sm:$0xff]  ;;  %v9081_v54 = vld [vmem:[#allocation22_spill] sm:$0xff] }
 0x26d   : > { %4674 = vtanh.f32 %v1372_v61  ;;  %1657 = vmatpush.msrb.mxu1 %v4665_v50  ;;  %v1333_v61 = vadd.f32 %v9077_v63, %v9076_v58  ;;  %v9082_v50 = vld [vmem:[#allocation19_spill] sm:$0xff] }
 0x26e   : > { %4676 = vtanh.f32 %v1437_v6  ;;  %1593 = vmatpush.msrb.mxu0 %v4659_v4  ;;  %v9079_v4 = vld [vmem:[#allocation14_spill] sm:$0xff] }
 0x26f   : > { %v4667_v2 = vpop.eup %4666  ;;  %4678 = vtanh.f32 %v1369_v14  ;;  %1658 = vmatpush.msrb.mxu1 %v4661_v5  ;;  %v1398_v14 = vadd.f32 %v9079_v4, %v9076_v58  ;;  %v9080_v5 = vld [vmem:[#allocation21_spill] sm:$0xff]  ;;  %v6933_v58 = vpop.permute.xlu1 %1587 }
 0x270   : > { %v4669_v47 = vpop.eup %4668  ;;  %4680 = vtanh.f32 %v1434_v56  ;;  %1720 = vmatpush.msrb.mxu2 %v4667_v2  ;;  %1594 = vmatpush.msrb.mxu0 %v4647_v45  ;;  %v9083_v2 = vld [vmem:[#allocation20_spill] sm:$0xff] }
 0x271   : > { %v4671_v37 = vpop.eup %4670  ;;  %4682 = vtanh.f32 %v1366_v49  ;;  %1785 = vmatpush.msrb.mxu3 %v4669_v47  ;;  %1659 = vmatpush.msrb.mxu1 %v4649_v30  ;;  %v9074_v30 = vld [vmem:[#allocation9_spill] sm:$0xff] }
 0x272   : > { %v4673_v35 = vpop.eup %4672  ;;  %4684 = vtanh.f32 %v1431_v43  ;;  %1721 = vmatpush.msrb.mxu2 %v4671_v37  ;;  %1595 = vmatpush.msrb.mxu0 %v6793_v3  ;;  %v1416_v3 = vadd.f32 %v6620_v8, %v6646_v0  ;;  %v1345_v0 = vadd.f32 %v6592_v55, %v6662_v36 }
 0x273   : > { %v4675_v24 = vpop.eup %4674  ;;  %4686 = vtanh.f32 %v1363_v62  ;;  %1786 = vmatpush.msrb.mxu3 %v4673_v35  ;;  %1660 = vmatpush.msrb.mxu1 %v6797_v23  ;;  %v1510_v62 = vld [vmem:[#allocation2 + $0x80] sm:$0xff] }
 0x274   : > { %v4677_v26 = vpop.eup %4676  ;;  %4688 = vtanh.f32 %v1428_v15  ;;  %1722 = vmatpush.msrb.mxu2 %v4675_v24  ;;  %1596 = vmatpush.msrb.mxu0 %v6785_v48  ;;  %v1413_v48 = vadd.f32 %v6606_v53, %v6664_v41  ;;  %v1342_v41 = vadd.f32 %v6584_v27, %v6660_v40  ;;  %v9084_v15 = vld [vmem:[#allocation17_spill] sm:$0xff] }
 0x275   : > { %v4679_v59 = vpop.eup %4678  ;;  %4690 = vtanh.f32 %v1360_v51  ;;  %1787 = vmatpush.msrb.mxu3 %v4677_v26  ;;  %1661 = vmatpush.msrb.mxu1 %v6789_v18  ;;  %v9085_v51 = vld [vmem:[#allocation18_spill] sm:$0xff] }
 0x276   : > { %v4681_v19 = vpop.eup %4680  ;;  %4692 = vtanh.f32 %v1425_v44  ;;  %1723 = vmatpush.msrb.mxu2 %v4679_v59  ;;  %1597 = vmatpush.msrb.mxu0 %v6779_v42  ;;  %v1410_v42 = vadd.f32 %v6596_v1, %v6662_v36  ;;  %v9066_v36 = vld [vmem:[#allocation16_spill] sm:$0xff]  ;;  %v1512_v59 = vld [vmem:[#allocation2 + $0x90] sm:$0xff] }
 0x277   : > { %v4683_v11 = vpop.eup %4682  ;;  %4694 = vtanh.f32 %v1357_v57  ;;  %1788 = vmatpush.msrb.mxu3 %v4681_v19  ;;  %1662 = vmatpush.msrb.mxu1 %v6782_v25  ;;  %v9068_v25 = vld [vmem:[#allocation27_spill] sm:$0xff]  ;;  %v1514_v19 = vld [vmem:[#allocation2 + $0xa0] sm:$0xff] }
 0x278   : > { %v4685_v17 = vpop.eup %4684  ;;  %4696 = vtanh.f32 %v1422_v22  ;;  %1724 = vmatpush.msrb.mxu2 %v4683_v11  ;;  %1598 = vmatpush.msrb.mxu0 %v6773_v20  ;;  %v1407_v20 = vadd.f32 %v6588_v32, %v6660_v40  ;;  %v9071_v40 = vld [vmem:[#allocation11_spill] sm:$0xff]  ;;  %v1511_v22 = vld [vmem:[#allocation2 + $0x88] sm:$0xff]  ;;  %v1516_v11 = vld [vmem:[#allocation2 + $0xb0] sm:$0xff] }
 0x279   : > { %v4687_v28 = vpop.eup %4686  ;;  %4698 = vtanh.f32 %v1354_v16  ;;  %1789 = vmatpush.msrb.mxu3 %v4685_v17  ;;  %1663 = vmatpush.msrb.mxu1 %v6776_v52  ;;  %v1401_v46 = vadd.f32 %v9074_v30, %v9071_v40  ;;  %v1513_v16 = vld [vmem:[#allocation2 + $0x98] sm:$0xff]  ;;  %v1518_v17 = vld [vmem:[#allocation2 + $0xc0] sm:$0xff] }
 0x27a   : > { %v4689_v13 = vpop.eup %4688  ;;  %4700 = vtanh.f32 %v1419_v31  ;;  %1725 = vmatpush.msrb.mxu2 %v4687_v28  ;;  %1599 = vmatpush.msrb.mxu0 %v6765_v21  ;;  %v9067_v21 = vld [vmem:[#allocation10_spill] sm:$0xff]  ;;  %v1515_v31 = vld [vmem:[#allocation2 + $0xa8] sm:$0xff] }
 0x27b   : > { %v4691_v8 = vpop.eup %4690  ;;  %4702 = vtanh.f32 %v1351_v9  ;;  %1790 = vmatpush.msrb.mxu3 %v4689_v13  ;;  %1664 = vmatpush.msrb.mxu1 %v6769_v12  ;;  %v1339_v52 = vadd.f32 %v9067_v21, %v9066_v36  ;;  %v9069_v12 = vld [vmem:[#allocation15_spill] sm:$0xff]  ;;  %v1520_v28 = vld [vmem:[#allocation2 + $0xd0] sm:$0xff]  ;;  %v1522_v13 = vld [vmem:[#allocation2 + $0xe0] sm:$0xff] }
 0x27c   : > { %v4693_v29 = vpop.eup %4692  ;;  %4704 = vtanh.f32 %v1416_v3  ;;  %1726 = vmatpush.msrb.mxu2 %v4691_v8  ;;  %1600 = vmatpush.msrb.mxu0 %v6757_v33  ;;  %v1404_v18 = vadd.f32 %v9069_v12, %v9066_v36  ;;  %v9072_v33 = vld [vmem:[#allocation12_spill] sm:$0xff]  ;;  %v1517_v9 = vld [vmem:[#allocation2 + $0xb8] sm:$0xff]  ;;  %v1519_v3 = vld [vmem:[#allocation2 + $0xc8] sm:$0xff] }
 0x27d   : > { %v4695_v53 = vpop.eup %4694  ;;  %4706 = vtanh.f32 %v1348_v38  ;;  %1791 = vmatpush.msrb.mxu3 %v4693_v29  ;;  %1665 = vmatpush.msrb.mxu1 %v9068_v25  ;;  %v1336_v23 = vadd.f32 %v9072_v33, %v9071_v40  ;;  %v1521_v38 = vld [vmem:[#allocation2 + $0xd8] sm:$0xff]  ;;  %v1524_v8 = vld [vmem:[#allocation2 + $0xf0] sm:$0xff] }
 0x27e   : > { %v4697_v55 = vpop.eup %4696  ;;  %4708 = vtanh.f32 %v1413_v48  ;;  %1727 = vmatpush.msrb.mxu2 %v4695_v53  ;;  %1601 = vmatpush.msrb.mxu0 %v9070_v60  ;;  %v1523_v48 = vld [vmem:[#allocation2 + $0xe8] sm:$0xff] }
 0x27f   : > { %v4699_v1 = vpop.eup %4698  ;;  %4710 = vtanh.f32 %v1345_v0  ;;  %1792 = vmatpush.msrb.mxu3 %v4697_v55  ;;  %1666 = vmatpush.msrb.mxu1 %v9073_v39  ;;  %v1525_v0 = vld [vmem:[#allocation2 + $0xf8] sm:$0xff] }
 0x280   : > { %v4701_v27 = vpop.eup %4700  ;;  %4712 = vtanh.f32 %v1410_v42  ;;  %1728 = vmatpush.msrb.mxu2 %v4699_v1  ;;  %1602 = vmatpush.msrb.mxu0 %v9075_v34 }
 0x281   : > { %v4703_v32 = vpop.eup %4702  ;;  %4714 = vtanh.f32 %v1342_v41  ;;  %1793 = vmatpush.msrb.mxu3 %v4701_v27  ;;  %1667 = vmatpush.msrb.mxu1 %v9078_v10 }
 0x282   : > { %v4705_v45 = vpop.eup %4704  ;;  %4716 = vtanh.f32 %v1407_v20  ;;  %1729 = vmatpush.msrb.mxu2 %v4703_v32  ;;  %1603 = vmatpush.msrb.mxu0 %v9080_v5 }
 0x283   : > { %v4707_v7 = vpop.eup %4706  ;;  %4718 = vtanh.f32 %v1339_v52  ;;  %1794 = vmatpush.msrb.mxu3 %v4705_v45  ;;  %1668 = vmatpush.msrb.mxu1 %v9081_v54 }
 0x284   : > { %v4709_v6 = vpop.eup %4708  ;;  %4720 = vtanh.f32 %v1404_v18  ;;  %1730 = vmatpush.msrb.mxu2 %v4707_v7  ;;  %1604 = vmatpush.msrb.mxu0 %v9082_v50 }
 0x285   : > { %v4711_v56 = vpop.eup %4710  ;;  %4722 = vtanh.f32 %v1336_v23  ;;  %1795 = vmatpush.msrb.mxu3 %v4709_v6  ;;  %1669 = vmatpush.msrb.mxu1 %v9083_v2 }
 0x286   : > { %v4713_v49 = vpop.eup %4712  ;;  %4724 = vtanh.f32 %v1401_v46  ;;  %1731 = vmatpush.msrb.mxu2 %v4711_v56  ;;  %1605 = vmatpush.msrb.mxu0 %v9084_v15  ;;  %v6927_v46 = vpop.permute.xlu2 %1583 }
 0x287   : > { %v4715_v43 = vpop.eup %4714  ;;  %4726 = vtanh.f32 %v1333_v61  ;;  %1796 = vmatpush.msrb.mxu3 %v4713_v49  ;;  %1670 = vmatpush.msrb.mxu1 %v9085_v51 }
 0x288   : > { %v4717_v47 = vpop.eup %4716  ;;  %4728 = vtanh.f32 %v1398_v14  ;;  %1732 = vmatpush.msrb.mxu2 %v4715_v43  ;;  %1606 = vmatmul.f32.vlgmr.msrb.gmra.mxu0 %v1510_v62  ;;  %v6945_v14 = vpop.permute.xlu1 %1575 }
 0x289   : > { %v4719_v37 = vpop.eup %4718  ;;  %1797 = vmatpush.msrb.mxu3 %v4717_v47  ;;  %1671 = vmatmul.f32.vlgmr.msrb.gmra.mxu1 %v1510_v62  ;;  %v6963_v47 = vpop.permute.xlu0 %1579 }
 0x28a   : > { %v4721_v35 = vpop.eup %4720  ;;  %1733 = vmatpush.msrb.mxu2 %v4719_v37 }
 0x28b   : > { %v4723_v44 = vpop.eup %4722  ;;  %1798 = vmatpush.msrb.mxu3 %v4721_v35 }
 0x28c   : > { %v4725_v24 = vpop.eup %4724  ;;  %1734 = vmatpush.msrb.mxu2 %v4723_v44 }
 0x28d   : > { %v4727_v57 = vpop.eup %4726  ;;  %1799 = vmatpush.msrb.mxu3 %v4725_v24 }
 0x28e   : > { %v4729_v26 = vpop.eup %4728  ;;  %1735 = vmatpush.msrb.mxu2 %v4727_v57  ;;  %v6943_v4 = vpop.permute.xlu2 %1571 }
 0x28f   : > { %1800 = vmatpush.msrb.mxu3 %v4729_v26  ;;  %1736 = vmatmul.f32.vlgmr.msrb.gmra.mxu2 %v1510_v62 }
 0x290   : > { %1801 = vmatmul.f32.vlgmr.msrb.gmra.mxu3 %v1510_v62  ;;  %1609 = vmatmul.f32.gmra.mxu0 %v1511_v22  ;;  %v6961_v62 = vpop.permute.xlu1 %1567 }
 0x291   : > { %1674 = vmatmul.f32.gmra.mxu1 %v1511_v22 }
 0x296   : > { %v6955_v50 = vpop.permute.xlu2 %1563 }
 0x297   : > { %1739 = vmatmul.f32.gmra.mxu2 %v1511_v22 }
 0x298   : > { %1804 = vmatmul.f32.gmra.mxu3 %v1511_v22  ;;  %1612 = vmatmul.f32.gmra.mxu0 %v1512_v59  ;;  %v6975_v24 = vpop.permute.xlu1 %1555  ;;  %v6981_v22 = vpop.permute.xlu0 %1559 }
 0x299   : > { %1677 = vmatmul.f32.gmra.mxu1 %v1512_v59 }
 0x29e   : > { %v6973_v44 = vpop.permute.xlu2 %1551 }
 0x29f   : > { %1742 = vmatmul.f32.gmra.mxu2 %v1512_v59 }
 0x2a0   : > { %1807 = vmatmul.f32.gmra.mxu3 %v1512_v59  ;;  %1615 = vmatmul.f32.gmra.mxu0 %v1513_v16 }
 0x2a1   : > { %1680 = vmatmul.f32.gmra.mxu1 %v1513_v16 }
 0x2a7   : > { %1745 = vmatmul.f32.gmra.mxu2 %v1513_v16 }
 0x2a8   : > { %1810 = vmatmul.f32.gmra.mxu3 %v1513_v16  ;;  %1618 = vmatmul.f32.gmra.mxu0 %v1514_v19 }
 0x2a9   : > { %1683 = vmatmul.f32.gmra.mxu1 %v1514_v19 }
 0x2af   : > { %1748 = vmatmul.f32.gmra.mxu2 %v1514_v19 }
 0x2b0   : > { %1813 = vmatmul.f32.gmra.mxu3 %v1514_v19  ;;  %1621 = vmatmul.f32.gmra.mxu0 %v1515_v31  ;;  %v6987_v19 = vpop.permute.xlu2 %1539 }
 0x2b1   : > { %1686 = vmatmul.f32.gmra.mxu1 %v1515_v31 }
 0x2b7   : > { %1751 = vmatmul.f32.gmra.mxu2 %v1515_v31 }
 0x2b8   : > { %1816 = vmatmul.f32.gmra.mxu3 %v1515_v31  ;;  %1624 = vmatmul.f32.gmra.mxu0 %v1516_v11 }
 0x2b9   : > { %1689 = vmatmul.f32.gmra.mxu1 %v1516_v11 }
 0x2bf   : > { %1754 = vmatmul.f32.gmra.mxu2 %v1516_v11 }
 0x2c0   : > { %1819 = vmatmul.f32.gmra.mxu3 %v1516_v11  ;;  %1627 = vmatmul.f32.gmra.mxu0 %v1517_v9 }
 0x2c1   : > { %1692 = vmatmul.f32.gmra.mxu1 %v1517_v9 }
 0x2c7   : > { %1757 = vmatmul.f32.gmra.mxu2 %v1517_v9 }
 0x2c8   : > { %1822 = vmatmul.f32.gmra.mxu3 %v1517_v9  ;;  %1630 = vmatmul.f32.gmra.mxu0 %v1518_v17  ;;  %v6993_v9 = vpop.permute.xlu1 %1543 }
 0x2c9   : > { %1695 = vmatmul.f32.gmra.mxu1 %v1518_v17 }
 0x2cf   : > { %1760 = vmatmul.f32.gmra.mxu2 %v1518_v17 }
 0x2d0   : > { %1825 = vmatmul.f32.gmra.mxu3 %v1518_v17  ;;  %1633 = vmatmul.f32.gmra.mxu0 %v1519_v3  ;;  %v6995_v17 = vpop.permute.xlu0 %1547 }
 0x2d1   : > { %1698 = vmatmul.f32.gmra.mxu1 %v1519_v3 }
 0x2d7   : > { %1763 = vmatmul.f32.gmra.mxu2 %v1519_v3 }
 0x2d8   : > { %1828 = vmatmul.f32.gmra.mxu3 %v1519_v3  ;;  %1636 = vmatmul.f32.gmra.mxu0 %v1520_v28 }
 0x2d9   : > { %1701 = vmatmul.f32.gmra.mxu1 %v1520_v28 }
 0x2df   : > { %1766 = vmatmul.f32.gmra.mxu2 %v1520_v28 }
 0x2e0   : > { %1831 = vmatmul.f32.gmra.mxu3 %v1520_v28  ;;  %1639 = vmatmul.f32.gmra.mxu0 %v1521_v38 }
 0x2e1   : > { %1704 = vmatmul.f32.gmra.mxu1 %v1521_v38 }
 0x2e7   : > { %1769 = vmatmul.f32.gmra.mxu2 %v1521_v38 }
 0x2e8   : > { %1834 = vmatmul.f32.gmra.mxu3 %v1521_v38  ;;  %1642 = vmatmul.f32.gmra.mxu0 %v1522_v13 }
 0x2e9   : > { %1707 = vmatmul.f32.gmra.mxu1 %v1522_v13 }
 0x2ef   : > { %1772 = vmatmul.f32.gmra.mxu2 %v1522_v13 }
 0x2f0   : > { %1837 = vmatmul.f32.gmra.mxu3 %v1522_v13  ;;  %1645 = vmatmul.f32.gmra.mxu0 %v1523_v48 }
 0x2f1   : > { %1710 = vmatmul.f32.gmra.mxu1 %v1523_v48 }
 0x2f7   : > { %1775 = vmatmul.f32.gmra.mxu2 %v1523_v48 }
 0x2f8   : > { %1840 = vmatmul.f32.gmra.mxu3 %v1523_v48  ;;  %1648 = vmatmul.f32.gmra.mxu0 %v1524_v8  ;;  %v7005_v48 = vpop.permute.xlu2 %1527 }
 0x2f9   : > { %1713 = vmatmul.f32.gmra.mxu1 %v1524_v8  ;;  %9094 = vst [vmem:[#allocation9_spill] sm:$0xff] %v7005_v48 }
 0x2ff   : > { %1778 = vmatmul.f32.gmra.mxu2 %v1524_v8 }
 0x300   : > { %1843 = vmatmul.f32.gmra.mxu3 %v1524_v8  ;;  %1651 = vmatmul.f32.gmra.mxu0 %v1525_v0 }
 0x301   : > { %1716 = vmatmul.f32.gmra.mxu1 %v1525_v0 }
 0x305   : > { %v6883_v29 = vpop.f32.mrf.mxu0 }
 0x306   : > { %v6885_v42 = vpop.f32.mrf.mxu1  ;;  %v1608_v8 = vadd.f32 %v6883_v29, %v7005_v48 }
 0x307   : > { %1781 = vmatmul.f32.gmra.mxu2 %v1525_v0 }
 0x308   : > { %1846 = vmatmul.f32.gmra.mxu3 %v1525_v0  ;;  %v7009_v0 = vpop.permute.xlu1 %1531  ;;  %4730 = vtanh.f32 %v1608_v8 }
 0x309   : > { %9095 = vst [vmem:[#allocation23_spill] sm:$0xff] %v7009_v0 }
 0x30d   : > { %v6887_v53 = vpop.f32.mrf.mxu0 }
 0x30e   : > { %v6889_v41 = vpop.f32.mrf.mxu1 }
 0x312   : > { %v6891_v55 = vpop.f32.mrf.mxu2 }
 0x313   : > { %9086 = vst [vmem:[#allocation16_spill] sm:$0xff] %v6891_v55  ;;  %v6893_v20 = vpop.f32.mrf.mxu3 }
 0x314   : > { %9087 = vst [vmem:[#allocation10_spill] sm:$0xff] %v6893_v20  ;;  %v1673_v20 = vadd.f32 %v6885_v42, %v7005_v48 }
 0x315   : > { %v6895_v1 = vpop.f32.mrf.mxu0 }
 0x316   : > { %v6897_v36 = vpop.f32.mrf.mxu1  ;;  %4732 = vtanh.f32 %v1673_v20 }
 0x31a   : > { %v6899_v21 = vpop.f32.mrf.mxu2 }
 0x31b   : > { %9088 = vst [vmem:[#allocation27_spill] sm:$0xff] %v6899_v21  ;;  %v6901_v52 = vpop.f32.mrf.mxu3  ;;  %v1611_v21 = vadd.f32 %v6887_v53, %v7009_v0 }
 0x31c   : > { %9089 = vst [vmem:[#allocation15_spill] sm:$0xff] %v6901_v52 }
 0x31d   : > { %v6903_v25 = vpop.f32.mrf.mxu0  ;;  %4734 = vtanh.f32 %v1611_v21  ;;  %v7041_v21 = vpop.eup %4730 }
 0x31e   : > { %v6905_v27 = vpop.f32.mrf.mxu1  ;;  %v1617_v53 = vadd.f32 %v6903_v25, %v6987_v19  ;;  %9097 = vst [vmem:[#allocation8_spill] sm:$0xff] %v7041_v21 }
 0x322   : > { %v6907_v12 = vpop.f32.mrf.mxu2 }
 0x323   : > { %9090 = vst [vmem:[#allocation25_spill] sm:$0xff] %v6907_v12  ;;  %v6909_v18 = vpop.f32.mrf.mxu3  ;;  %v7021_v12 = vpop.permute.xlu0 %1535 }
 0x324   : > { %9091 = vst [vmem:[#allocation11_spill] sm:$0xff] %v6909_v18  ;;  %v1676_v18 = vadd.f32 %v6889_v41, %v7009_v0  ;;  %v1614_v29 = vadd.f32 %v6895_v1, %v7021_v12  ;;  %v1679_v42 = vadd.f32 %v6897_v36, %v7021_v12  ;;  %v1682_v41 = vadd.f32 %v6905_v27, %v6987_v19 }
 0x325   : > { %v6911_v60 = vpop.f32.mrf.mxu0  ;;  %9096 = vst [vmem:[#allocation13_spill] sm:$0xff] %v7021_v12 }
 0x326   : > { %v6913_v32 = vpop.f32.mrf.mxu1  ;;  %4736 = vtanh.f32 %v1676_v18  ;;  %v1620_v8 = vadd.f32 %v6911_v60, %v6993_v9  ;;  %v7045_v18 = vpop.eup %4732 }
 0x327   : > { %4738 = vtanh.f32 %v1614_v29  ;;  %v1685_v20 = vadd.f32 %v6913_v32, %v6993_v9  ;;  %9098 = vst [vmem:[#allocation24_spill] sm:$0xff] %v7045_v18  ;;  %v7049_v60 = vpop.eup %4734 }
 0x328   : > { %4740 = vtanh.f32 %v1679_v42  ;;  %9099 = vst [vmem:[#allocation14_spill] sm:$0xff] %v7049_v60 }
 0x329   : > { %4742 = vtanh.f32 %v1617_v53 }
 0x32a   : > { %v6915_v40 = vpop.f32.mrf.mxu2  ;;  %4744 = vtanh.f32 %v1682_v41 }
 0x32b   : > { %9092 = vst [vmem:[#allocation12_spill] sm:$0xff] %v6915_v40  ;;  %v6917_v33 = vpop.f32.mrf.mxu3  ;;  %4746 = vtanh.f32 %v1620_v8 }
 0x32c   : > { %9093 = vst [vmem:[#allocation26_spill] sm:$0xff] %v6917_v33  ;;  %v7053_v29 = vpop.eup %4736  ;;  %4748 = vtanh.f32 %v1685_v20 }
 0x32d   : > { %v6919_v23 = vpop.f32.mrf.mxu0  ;;  %9100 = vst [vmem:[#allocation21_spill] sm:$0xff] %v7053_v29  ;;  %v7057_v21 = vpop.eup %4738 }
 0x32e   : > { %v6921_v39 = vpop.f32.mrf.mxu1  ;;  %v1623_v25 = vadd.f32 %v6919_v23, %v6995_v17  ;;  %9101 = vst [vmem:[#allocation22_spill] sm:$0xff] %v7057_v21  ;;  %v7061_v41 = vpop.eup %4740 }
 0x32f   : > { %v1688_v27 = vadd.f32 %v6921_v39, %v6995_v17  ;;  %9102 = vst [vmem:[#allocation19_spill] sm:$0xff] %v7061_v41  ;;  %v7065_v8 = vpop.eup %4742  ;;  %v7107_v41 = vld [vmem:[%s8958_s2 + $0x68] sm:$0xff] }
 0x330   : > { %4750 = vtanh.f32 %v1623_v25  ;;  %v7069_v20 = vpop.eup %4744  ;;  %9106 = vst [vmem:[#allocation28_spill] sm:$0xff] %v7107_v41 }
 0x331   : > { %4752 = vtanh.f32 %v1688_v27  ;;  %9103 = vst [vmem:[#allocation20_spill] sm:$0xff] %v7069_v20  ;;  %v7077_v27 = vpop.eup %4746 }
 0x332   : > { %v6923_v45 = vpop.f32.mrf.mxu2  ;;  %v7080_v29 = vpop.eup %4748 }
 0x333   : > { %v6925_v30 = vpop.f32.mrf.mxu3 }
 0x335   : > { %v6929_v34 = vpop.f32.mrf.mxu0 }
 0x336   : > { %v6931_v7 = vpop.f32.mrf.mxu1  ;;  %v1626_v32 = vadd.f32 %v6929_v34, %v6973_v44 }
 0x337   : > { %v1691_v42 = vadd.f32 %v6931_v7, %v6973_v44 }
 0x338   : > { %4754 = vtanh.f32 %v1626_v32  ;;  %v5668_v32 = vmov 3  }
 0x339   : > { %4756 = vtanh.f32 %v1691_v42  ;;  %4450 = vset.pattern.permute.xlu1 %v5668_v32  ;;  %4449 = vset.pattern.permute.xlu0 %v5668_v32  ;;  %v7083_v42 = vpop.eup %4750 }
 0x33a   : > { %v6935_v63 = vpop.f32.mrf.mxu2  ;;  %4451 = vset.pattern.permute.xlu2 %v5668_v32 }
 0x33b   : > { %v6937_v61 = vpop.f32.mrf.mxu3  ;;  %1984 = vperm.xlu2 %4451, %v7107_v41  }
 0x33d   : > { %v6939_v10 = vpop.f32.mrf.mxu0 }
 0x33e   : > { %v6941_v6 = vpop.f32.mrf.mxu1  ;;  %v1629_v39 = vadd.f32 %v6939_v10, %v6975_v24 }
 0x33f   : > { %v1694_v34 = vadd.f32 %v6941_v6, %v6975_v24 }
 0x340   : > { %4758 = vtanh.f32 %v1629_v39 }
 0x341   : > { %4760 = vtanh.f32 %v1694_v34 }
 0x342   : > { %v6947_v5 = vpop.f32.mrf.mxu2 }
 0x343   : > { %v6949_v56 = vpop.f32.mrf.mxu3 }
 0x345   : > { %v6951_v54 = vpop.f32.mrf.mxu0 }
 0x346   : > { %v6953_v49 = vpop.f32.mrf.mxu1  ;;  %v1632_v7 = vadd.f32 %v6951_v54, %v6981_v22 }
 0x347   : > { %v1697_v25 = vadd.f32 %v6953_v49, %v6981_v22  ;;  %v7088_v49 = vld [vmem:[%s8958_s2 + $0x70] sm:$0xff] }
 0x348   : > { %4762 = vtanh.f32 %v1632_v7  ;;  %9104 = vst [vmem:[#allocation17_spill] sm:$0xff] %v7088_v49  ;;  %1988 = vperm.xlu1 %4450, %v7088_v49  }
 0x349   : > { %4764 = vtanh.f32 %v1697_v25 }
 0x34a   : > { %v6957_v43 = vpop.f32.mrf.mxu2 }
 0x34b   : > { %v6959_v2 = vpop.f32.mrf.mxu3 }
 0x34d   : > { %v6965_v15 = vpop.f32.mrf.mxu0 }
 0x34e   : > { %v6967_v37 = vpop.f32.mrf.mxu1 }
 0x352   : > { %v6969_v51 = vpop.f32.mrf.mxu2 }
 0x353   : > { %v6971_v35 = vpop.f32.mrf.mxu3 }
 0x355   : > { %v6977_v57 = vpop.f32.mrf.mxu0 }
 0x356   : > { %v6979_v26 = vpop.f32.mrf.mxu1 }
 0x35a   : > { %v6983_v59 = vpop.f32.mrf.mxu2 }
 0x35b   : > { %v6985_v16 = vpop.f32.mrf.mxu3 }
 0x35d   : > { %v6989_v31 = vpop.f32.mrf.mxu0 }
 0x35e   : > { %v6991_v11 = vpop.f32.mrf.mxu1 }
 0x362   : > { %v6997_v3 = vpop.f32.mrf.mxu2 }
 0x363   : > { %v6999_v28 = vpop.f32.mrf.mxu3 }
 0x365   : > { %v7001_v38 = vpop.f32.mrf.mxu0 }
 0x366   : > { %v7003_v13 = vpop.f32.mrf.mxu1 }
 0x36a   : > { %v7013_v55 = vpop.f32.mrf.mxu2 }
 0x36b   : > { %v7015_v52 = vpop.f32.mrf.mxu3 }
 0x36d   : > { %v1646_v48 = vpop.f32.mrf.mxu0 }
 0x36e   : > { %v7027_v33 = vpop.f32.mrf.mxu1  ;;  %v1647_v0 = vadd.f32 %v1646_v48, %v6963_v47  ;;  %v1635_v48 = vadd.f32 %v6965_v15, %v6955_v50  ;;  %v1709_v15 = vadd.f32 %v7003_v13, %v6945_v14  ;;  %v1706_v13 = vadd.f32 %v6991_v11, %v6943_v4 }
 0x36f   : > { %v1712_v32 = vadd.f32 %v7027_v33, %v6963_v47  ;;  %v1644_v33 = vadd.f32 %v7001_v38, %v6945_v14  ;;  %v5520_v38 = vld [vmem:[%s8958_s2 + $0x50] sm:$0xff] }
 0x372   : > { %v7037_v1 = vpop.f32.mrf.mxu2 }
 0x373   : > { %v7039_v36 = vpop.f32.mrf.mxu3 }
 0x375   : > { %v1649_v53 = vpop.f32.mrf.mxu0 }
 0x376   : > { %v1714_v23 = vpop.f32.mrf.mxu1  ;;  %v1650_v6 = vadd.f32 %v1649_v53, %v6927_v46  ;;  %v7094_v53 = vld [vmem:[%s8958_s2 + $0x78] sm:$0xff] }
 0x377   : > { %v1715_v54 = vadd.f32 %v1714_v23, %v6927_v46  ;;  %9105 = vst [vmem:[#allocation18_spill] sm:$0xff] %v7094_v53  ;;  %1992 = vperm.xlu0 %4449, %v7094_v53   ;;  %v7097_v23 = vpop.eup %4752 }
 0x378   : > { %v7099_v7 = vpop.eup %4754  ;;  %4766 = vtanh.f32 %v1650_v6 }
 0x379   : > { %v7110_v25 = vpop.eup %4756  ;;  %4768 = vtanh.f32 %v1715_v54 }
 0x37a   : > { %v7073_v18 = vpop.f32.mrf.mxu2  ;;  %v7114_v53 = vpop.eup %4758 }
 0x37b   : > { %v7075_v10 = vpop.f32.mrf.mxu3  ;;  %v7118_v6 = vpop.eup %4760 }
 0x37c   : > { %v7122_v12 = vpop.eup %4762 }
 0x37d   : > { %v1652_v39 = vpop.f32.mrf.mxu0  ;;  %v7126_v54 = vpop.eup %4764 }
 0x37e   : > { %v1717_v34 = vpop.f32.mrf.mxu1  ;;  %v1653_v49 = vadd.f32 %v1652_v39, %v6933_v58  ;;  %v1700_v39 = vadd.f32 %v6967_v37, %v6955_v50  ;;  %v1641_v37 = vadd.f32 %v6989_v31, %v6943_v4  ;;  %v1638_v31 = vadd.f32 %v6977_v57, %v6961_v62 }
 0x37f   : > { %v1718_v60 = vadd.f32 %v1717_v34, %v6933_v58  ;;  %1972 = vperm.xlu0 %4449, %v5520_v38   ;;  %v1703_v38 = vadd.f32 %v6979_v26, %v6961_v62 }
 0x380   : > { %4770 = vtanh.f32 %v1653_v49  ;;  %v4767_v49 = vpop.eup %4766 }
 0x381   : > { %4772 = vtanh.f32 %v1718_v60  ;;  %v7135_v60 = vld [vmem:[%s8958_s2 + $0x60] sm:$0xff] }
 0x382   : > { %v1779_v34 = vpop.f32.mrf.mxu2  ;;  %4774 = vtanh.f32 %v1647_v0  ;;  %9107 = vst [vmem:[#allocation29_spill] sm:$0xff] %v7135_v60  ;;  %1980 = vperm.xlu1 %4450, %v7135_v60   ;;  %v4769_v0 = vpop.eup %4768 }
 0x383   : > { %v1844_v41 = vpop.f32.mrf.mxu3  ;;  %4776 = vtanh.f32 %v1712_v32  ;;  %v1780_v20 = vadd.f32 %v1779_v34, %v6927_v46  ;;  %v7162_v34 = vld [vmem:[%s8958_s2 + $0x48] sm:$0xff] }
 0x384   : > { %4778 = vtanh.f32 %v1635_v48  ;;  %v7148_v48 = vld [vmem:[%s8958_s2 + $0x58] sm:$0xff] }
 0x385   : > { %4780 = vtanh.f32 %v1700_v39  ;;  %9108 = vst [vmem:[#allocation30_spill] sm:$0xff] %v7148_v48  ;;  %1976 = vperm.xlu2 %4451, %v7148_v48  }
 0x386   : > { %v4771_v32 = vpop.eup %4770  ;;  %4782 = vtanh.f32 %v1644_v33 }
 0x387   : > { %v4773_v60 = vpop.eup %4772  ;;  %4784 = vtanh.f32 %v1709_v15  ;;  %1995 = vmatpush.msra.mxu0 %v4771_v32  ;;  %v1845_v15 = vadd.f32 %v1844_v41, %v6927_v46  ;;  %v5523_v46 = vld [vmem:[%s8958_s2 + $0x38] sm:$0xff]  ;;  %v1774_v41 = vadd.f32 %v7037_v1, %v6945_v14 }
 0x388   : > { %v4775_v39 = vpop.eup %4774  ;;  %4786 = vtanh.f32 %v1641_v37  ;;  %2060 = vmatpush.msra.mxu1 %v4773_v60  ;;  %v1777_v60 = vadd.f32 %v7073_v18, %v6963_v47  ;;  %1960 = vperm.xlu0 %4449, %v5523_v46  }
 0x389   : > { %v4777_v11 = vpop.eup %4776  ;;  %4788 = vtanh.f32 %v1706_v13  ;;  %1996 = vmatpush.msra.mxu0 %v4767_v49  ;;  %v1842_v49 = vadd.f32 %v7075_v10, %v6963_v47  ;;  %v1771_v10 = vadd.f32 %v7013_v55, %v6943_v4 }
 0x38a   : > { %v1782_v57 = vpop.f32.mrf.mxu2  ;;  %v4779_v21 = vpop.eup %4778  ;;  %4790 = vtanh.f32 %v1638_v31  ;;  %2061 = vmatpush.msra.mxu1 %v4769_v0  ;;  %1968 = vperm.xlu1 %4450, %v7162_v34   ;;  %v5524_v0 = vld [vmem:[%s8958_s2 + $0x40] sm:$0xff]  ;;  %v1768_v31 = vadd.f32 %v6997_v3, %v6961_v62 }
 0x38b   : > { %v1847_v33 = vpop.f32.mrf.mxu3  ;;  %v1783_v48 = vadd.f32 %v1782_v57, %v6933_v58  ;;  %v4781_v26 = vpop.eup %4780  ;;  %4792 = vtanh.f32 %v1703_v38  ;;  %1997 = vmatpush.msra.mxu0 %v4775_v39  ;;  %v9116_v39 = vld [vmem:[#allocation11_spill] sm:$0xff]  ;;  %v9117_v57 = vld [vmem:[#allocation14_spill] sm:$0xff] }
 0x38c   : > { %v1848_v40 = vadd.f32 %v1847_v33, %v6933_v58  ;;  %v4783_v37 = vpop.eup %4782  ;;  %2062 = vmatpush.msra.mxu1 %v4777_v11  ;;  %v9118_v33 = vld [vmem:[#allocation23_spill] sm:$0xff] }
 0x38d   : > { %4794 = vtanh.f32 %v1783_v48  ;;  %v4785_v58 = vpop.eup %4784  ;;  %1998 = vmatpush.msra.mxu0 %v4783_v37  ;;  %1964 = vperm.xlu2 %4451, %v5524_v0   ;;  %v1765_v48 = vadd.f32 %v6983_v59, %v6955_v50  ;;  %v9120_v37 = vld [vmem:[#allocation21_spill] sm:$0xff] }
 0x38e   : > { %4796 = vtanh.f32 %v1848_v40  ;;  %v4787_v18 = vpop.eup %4786  ;;  %2063 = vmatpush.msra.mxu1 %v4785_v58  ;;  %v1839_v40 = vadd.f32 %v7039_v36, %v6945_v14  ;;  %v1833_v36 = vadd.f32 %v6999_v28, %v6961_v62  ;;  %v1762_v62 = vadd.f32 %v6969_v51, %v6981_v22  ;;  %v9123_v0 = vld [vmem:[#allocation9_spill] sm:$0xff] }
 0x38f   : > { %4798 = vtanh.f32 %v1780_v20  ;;  %v4789_v13 = vpop.eup %4788  ;;  %1999 = vmatpush.msra.mxu0 %v4787_v18  ;;  %v1836_v20 = vadd.f32 %v7015_v52, %v6943_v4  ;;  %v1830_v4 = vadd.f32 %v6985_v16, %v6955_v50  ;;  %v1827_v28 = vadd.f32 %v6971_v35, %v6981_v22  ;;  %v9122_v18 = vld [vmem:[#allocation8_spill] sm:$0xff] }
 0x390   : > { %4800 = vtanh.f32 %v1845_v15  ;;  %v4791_v47 = vpop.eup %4790  ;;  %2064 = vmatpush.msra.mxu1 %v4789_v13  ;;  %v1824_v16 = vadd.f32 %v6959_v2, %v6975_v24  ;;  %v1756_v22 = vadd.f32 %v6947_v5, %v6973_v44  ;;  %v9124_v13 = vld [vmem:[#allocation16_spill] sm:$0xff] }
 0x391   : > { %4802 = vtanh.f32 %v1777_v60  ;;  %v4793_v1 = vpop.eup %4792  ;;  %2000 = vmatpush.msra.mxu0 %v4791_v47  ;;  %v1915_v60 = vld [vmem:[#allocation2 + $0x100] sm:$0xff] }
 0x392   : > { %4804 = vtanh.f32 %v1842_v49  ;;  %2065 = vmatpush.msra.mxu1 %v4793_v1  ;;  %v9121_v49 = vld [vmem:[#allocation15_spill] sm:$0xff]  ;;  %v9125_v47 = vld [vmem:[#allocation24_spill] sm:$0xff]  ;;  %v9126_v1 = vld [vmem:[#allocation10_spill] sm:$0xff] }
 0x393   : > { %v4795_v32 = vpop.eup %4794  ;;  %4806 = vtanh.f32 %v1774_v41  ;;  %2001 = vmatpush.msra.mxu0 %v4779_v21  ;;  %v1821_v21 = vadd.f32 %v6949_v56, %v6973_v44  ;;  %v1750_v44 = vadd.f32 %v6923_v45, %v6993_v9  ;;  %v1806_v46 = vadd.f32 %v9121_v49, %v9118_v33 }
 0x394   : > { %v4797_v14 = vpop.eup %4796  ;;  %4808 = vtanh.f32 %v1839_v40  ;;  %2125 = vmatpush.msra.mxu2 %v4795_v32  ;;  %2066 = vmatpush.msra.mxu1 %v4781_v26  ;;  %v9119_v26 = vld [vmem:[#allocation27_spill] sm:$0xff]  ;;  %v1738_v40 = vadd.f32 %v9124_v13, %v9123_v0 }
 0x395   : > { %v4799_v55 = vpop.eup %4798  ;;  %4810 = vtanh.f32 %v1771_v10  ;;  %2190 = vmatpush.msra.mxu3 %v4797_v14  ;;  %2002 = vmatpush.msra.mxu0 %v7122_v12  ;;  %v1759_v12 = vadd.f32 %v6957_v43, %v6975_v24  ;;  %v1753_v24 = vadd.f32 %v6935_v63, %v6995_v17  ;;  %v1741_v15 = vadd.f32 %v9119_v26, %v9118_v33  ;;  %v7246_v14 = vld [vmem:[%s8958_s2 + $0x30] sm:$0xff] }
 0x396   : > { %v4801_v52 = vpop.eup %4800  ;;  %4812 = vtanh.f32 %v1836_v20  ;;  %2126 = vmatpush.msra.mxu2 %v4799_v55  ;;  %2067 = vmatpush.msra.mxu1 %v7126_v54  ;;  %v9115_v54 = vld [vmem:[#allocation19_spill] sm:$0xff]  ;;  %v1803_v20 = vadd.f32 %v9126_v1, %v9123_v0 }
 0x397   : > { %v4803_v3 = vpop.eup %4802  ;;  %4814 = vtanh.f32 %v1768_v31  ;;  %2191 = vmatpush.msra.mxu3 %v4801_v52  ;;  %2003 = vmatpush.msra.mxu0 %v7114_v53  ;;  %v1818_v53 = vadd.f32 %v6937_v61, %v6995_v17  ;;  %v9109_v17 = vld [vmem:[#allocation12_spill] sm:$0xff]  ;;  %v7258_v52 = vld [vmem:[%s8958_s2 + $0x28] sm:$0xff] }
 0x398   : > { %v4805_v59 = vpop.eup %4804  ;;  %4816 = vtanh.f32 %v1833_v36  ;;  %2127 = vmatpush.msra.mxu2 %v4803_v3  ;;  %2068 = vmatpush.msra.mxu1 %v7118_v6  ;;  %9127 = vst [vmem:[#allocation12_spill] sm:$0xff] %v7246_v14  ;;  %v7252_v36 = vld [vmem:[%s8958_s2 + $0x20] sm:$0xff]  ;;  %v1916_v3 = vld [vmem:[#allocation2 + $0x108] sm:$0xff] }
 0x399   : > { %v4807_v50 = vpop.eup %4806  ;;  %4818 = vtanh.f32 %v1765_v48  ;;  %2192 = vmatpush.msra.mxu3 %v4805_v59  ;;  %2004 = vmatpush.msra.mxu0 %v7099_v7 }
 0x39a   : > { %v4809_v51 = vpop.eup %4808  ;;  %4820 = vtanh.f32 %v1830_v4  ;;  %2128 = vmatpush.msra.mxu2 %v4807_v50  ;;  %2069 = vmatpush.msra.mxu1 %v7110_v25  ;;  %v9112_v25 = vld [vmem:[#allocation22_spill] sm:$0xff] }
 0x39b   : > { %v4811_v35 = vpop.eup %4810  ;;  %4822 = vtanh.f32 %v1762_v62  ;;  %2193 = vmatpush.msra.mxu3 %v4809_v51  ;;  %2005 = vmatpush.msra.mxu0 %v7083_v42  ;;  %v1815_v42 = vadd.f32 %v6925_v30, %v6993_v9  ;;  %v9113_v9 = vld [vmem:[#allocation13_spill] sm:$0xff]  ;;  %v7264_v51 = vld [vmem:[%s8958_s2 + $0x18] sm:$0xff] }
 0x39c   : > { %v4813_v43 = vpop.eup %4812  ;;  %4824 = vtanh.f32 %v1827_v28  ;;  %2129 = vmatpush.msra.mxu2 %v4811_v35  ;;  %2070 = vmatpush.msra.mxu1 %v7097_v23  ;;  %v9110_v23 = vld [vmem:[#allocation20_spill] sm:$0xff]  ;;  %v1809_v11 = vadd.f32 %v9116_v39, %v9113_v9  ;;  %9130 = vst [vmem:[#allocation22_spill] sm:$0xff] %v7264_v51  ;;  %v1917_v35 = vld [vmem:[#allocation2 + $0x110] sm:$0xff] }
 0x39d   : > { %v4815_v2 = vpop.eup %4814  ;;  %4826 = vtanh.f32 %v1759_v12  ;;  %2194 = vmatpush.msra.mxu3 %v4813_v43  ;;  %2006 = vmatpush.msra.mxu0 %v7077_v27  ;;  %v1747_v27 = vadd.f32 %v9109_v17, %v6987_v19  ;;  %9128 = vst [vmem:[#allocation20_spill] sm:$0xff] %v7252_v36  ;;  %v7282_v43 = vld [vmem:[%s8958_s2] sm:$0xff]  ;;  %v1928_v17 = vld [vmem:[#allocation2 + $0x168] sm:$0xff] }
 0x39e   : > { %v4817_v5 = vpop.eup %4816  ;;  %4828 = vtanh.f32 %v1824_v16  ;;  %2130 = vmatpush.msra.mxu2 %v4815_v2  ;;  %2071 = vmatpush.msra.mxu1 %v7080_v29  ;;  %v9111_v29 = vld [vmem:[#allocation26_spill] sm:$0xff]  ;;  %v7270_v16 = vld [vmem:[%s8958_s2 + $0x8] sm:$0xff]  ;;  %9133 = vst [vmem:[#allocation19_spill] sm:$0xff] %v7282_v43  ;;  %v1919_v2 = vld [vmem:[#allocation2 + $0x120] sm:$0xff] }
 0x39f   : > { %v4819_v56 = vpop.eup %4818  ;;  %4830 = vtanh.f32 %v1756_v22  ;;  %2195 = vmatpush.msra.mxu3 %v4817_v5  ;;  %2007 = vmatpush.msra.mxu0 %v7065_v8  ;;  %v1812_v7 = vadd.f32 %v9111_v29, %v6987_v19  ;;  %v9114_v8 = vld [vmem:[#allocation25_spill] sm:$0xff]  ;;  %9129 = vst [vmem:[#allocation26_spill] sm:$0xff] %v7258_v52  ;;  %v7276_v22 = vld [vmem:[%s8958_s2 + $0x10] sm:$0xff] }
 0x3a0   : > { %v4821_v63 = vpop.eup %4820  ;;  %4832 = vtanh.f32 %v1821_v21  ;;  %2131 = vmatpush.msra.mxu2 %v4819_v56  ;;  %2072 = vmatpush.msra.mxu1 %v9110_v23  ;;  %v1744_v6 = vadd.f32 %v9114_v8, %v9113_v9  ;;  %9131 = vst [vmem:[#allocation13_spill] sm:$0xff] %v7270_v16  ;;  %v1918_v21 = vld [vmem:[#allocation2 + $0x118] sm:$0xff]  ;;  %v1921_v5 = vld [vmem:[#allocation2 + $0x130] sm:$0xff]  ;;  %v1923_v56 = vld [vmem:[#allocation2 + $0x140] sm:$0xff] }
 0x3a1   : > { %v4823_v61 = vpop.eup %4822  ;;  %4834 = vtanh.f32 %v1753_v24  ;;  %2196 = vmatpush.msra.mxu3 %v4821_v63  ;;  %2008 = vmatpush.msra.mxu0 %v9112_v25  ;;  %9132 = vst [vmem:[#allocation25_spill] sm:$0xff] %v7276_v22  ;;  %v1920_v24 = vld [vmem:[#allocation2 + $0x128] sm:$0xff]  ;;  %v1925_v63 = vld [vmem:[#allocation2 + $0x150] sm:$0xff]  ;;  %v1930_v23 = vld [vmem:[#allocation2 + $0x178] sm:$0xff] }
 0x3a2   : > { %v4825_v45 = vpop.eup %4824  ;;  %4836 = vtanh.f32 %v1818_v53  ;;  %2132 = vmatpush.msra.mxu2 %v4823_v61  ;;  %2073 = vmatpush.msra.mxu1 %v9115_v54  ;;  %v1922_v53 = vld [vmem:[#allocation2 + $0x138] sm:$0xff]  ;;  %v1927_v61 = vld [vmem:[#allocation2 + $0x160] sm:$0xff] }
 0x3a3   : > { %v4827_v30 = vpop.eup %4826  ;;  %4838 = vtanh.f32 %v1750_v44  ;;  %2197 = vmatpush.msra.mxu3 %v4825_v45  ;;  %2009 = vmatpush.msra.mxu0 %v9117_v57  ;;  %v1924_v44 = vld [vmem:[#allocation2 + $0x148] sm:$0xff] }
 0x3a4   : > { %v4829_v38 = vpop.eup %4828  ;;  %4840 = vtanh.f32 %v1815_v42  ;;  %2133 = vmatpush.msra.mxu2 %v4827_v30  ;;  %2074 = vmatpush.msra.mxu1 %v9120_v37  ;;  %v1926_v42 = vld [vmem:[#allocation2 + $0x158] sm:$0xff] }
 0x3a5   : > { %v4831_v19 = vpop.eup %4830  ;;  %4842 = vtanh.f32 %v1747_v27  ;;  %2198 = vmatpush.msra.mxu3 %v4829_v38  ;;  %2010 = vmatpush.msra.mxu0 %v9122_v18  ;;  %v1929_v27 = vld [vmem:[#allocation2 + $0x170] sm:$0xff] }
 0x3a6   : > { %v4833_v58 = vpop.eup %4832  ;;  %4844 = vtanh.f32 %v1812_v7  ;;  %2134 = vmatpush.msra.mxu2 %v4831_v19  ;;  %2075 = vmatpush.msra.mxu1 %v9125_v47 }
 0x3a7   : > { %v4835_v41 = vpop.eup %4834  ;;  %4846 = vtanh.f32 %v1744_v6  ;;  %2199 = vmatpush.msra.mxu3 %v4833_v58  ;;  %2011 = vmatmul.f32.vlgmr.msra.gmra.mxu0 %v1915_v60 }
 0x3a8   : > { %v4837_v10 = vpop.eup %4836  ;;  %4848 = vtanh.f32 %v1809_v11  ;;  %2076 = vmatmul.f32.vlgmr.msra.gmra.mxu1 %v1915_v60  ;;  %2135 = vmatpush.msra.mxu2 %v4835_v41 }
 0x3a9   : > { %v4839_v32 = vpop.eup %4838  ;;  %4850 = vtanh.f32 %v1741_v15  ;;  %2200 = vmatpush.msra.mxu3 %v4837_v10  ;;  %1956 = vperm.xlu1 %4450, %v7246_v14  }
 0x3aa   : > { %v4841_v31 = vpop.eup %4840  ;;  %4852 = vtanh.f32 %v1806_v46  ;;  %1948 = vperm.xlu0 %4449, %v7252_v36   ;;  %2136 = vmatpush.msra.mxu2 %v4839_v32 }
 0x3ab   : > { %v4843_v55 = vpop.eup %4842  ;;  %4854 = vtanh.f32 %v1738_v40  ;;  %2201 = vmatpush.msra.mxu3 %v4841_v31  ;;  %1952 = vperm.xlu2 %4451, %v7258_v52  }
 0x3ac   : > { %v4845_v48 = vpop.eup %4844  ;;  %4856 = vtanh.f32 %v1803_v20  ;;  %2137 = vmatpush.msra.mxu2 %v4843_v55 }
 0x3ad   : > { %v4847_v4 = vpop.eup %4846  ;;  %2202 = vmatpush.msra.mxu3 %v4845_v48 }
 0x3ae   : > { %v4849_v62 = vpop.eup %4848  ;;  %2138 = vmatpush.msra.mxu2 %v4847_v4  ;;  %v7355_v4 = vpop.permute.xlu2 %1984 }
 0x3af   : > { %v4851_v59 = vpop.eup %4850  ;;  %2203 = vmatpush.msra.mxu3 %v4849_v62  ;;  %2014 = vmatmul.f32.gmra.mxu0 %v1916_v3 }
 0x3b0   : > { %v4853_v28 = vpop.eup %4852  ;;  %2079 = vmatmul.f32.gmra.mxu1 %v1916_v3  ;;  %2139 = vmatpush.msra.mxu2 %v4851_v59 }
 0x3b1   : > { %v4855_v50 = vpop.eup %4854  ;;  %2204 = vmatpush.msra.mxu3 %v4853_v28  ;;  %1944 = vperm.xlu1 %4450, %v7264_v51  }
 0x3b2   : > { %v4857_v12 = vpop.eup %4856  ;;  %1936 = vperm.xlu0 %4449, %v7270_v16   ;;  %2140 = vmatpush.msra.mxu2 %v4855_v50 }
 0x3b3   : > { %2205 = vmatpush.msra.mxu3 %v4857_v12  ;;  %2141 = vmatmul.f32.vlgmr.msra.gmra.mxu2 %v1915_v60 }
 0x3b4   : > { %2206 = vmatmul.f32.vlgmr.msra.gmra.mxu3 %v1915_v60  ;;  %1940 = vperm.xlu2 %4451, %v7276_v22  }
 0x3b7   : > { %2017 = vmatmul.f32.gmra.mxu0 %v1917_v35 }
 0x3b8   : > { %2082 = vmatmul.f32.gmra.mxu1 %v1917_v35 }
 0x3b9   : > { %1932 = vperm.xlu1 %4450, %v7282_v43  }
 0x3ba   : > { %v7333_v0 = vpop.permute.xlu1 %1988 }
 0x3bb   : > { %2144 = vmatmul.f32.gmra.mxu2 %v1916_v3 }
 0x3bc   : > { %2209 = vmatmul.f32.gmra.mxu3 %v1916_v3 }
 0x3bf   : > { %2020 = vmatmul.f32.gmra.mxu0 %v1918_v21 }
 0x3c0   : > { %2085 = vmatmul.f32.gmra.mxu1 %v1918_v21 }
 0x3c3   : > { %2147 = vmatmul.f32.gmra.mxu2 %v1917_v35 }
 0x3c4   : > { %2212 = vmatmul.f32.gmra.mxu3 %v1917_v35 }
 0x3c7   : > { %2023 = vmatmul.f32.gmra.mxu0 %v1919_v2 }
 0x3c8   : > { %2088 = vmatmul.f32.gmra.mxu1 %v1919_v2 }
 0x3cb   : > { %2150 = vmatmul.f32.gmra.mxu2 %v1918_v21 }
 0x3cc   : > { %2215 = vmatmul.f32.gmra.mxu3 %v1918_v21 }
 0x3cf   : > { %2026 = vmatmul.f32.gmra.mxu0 %v1920_v24 }
 0x3d0   : > { %2091 = vmatmul.f32.gmra.mxu1 %v1920_v24 }
 0x3d3   : > { %2153 = vmatmul.f32.gmra.mxu2 %v1919_v2 }
 0x3d4   : > { %2218 = vmatmul.f32.gmra.mxu3 %v1919_v2 }
 0x3d7   : > { %2029 = vmatmul.f32.gmra.mxu0 %v1921_v5 }
 0x3d8   : > { %2094 = vmatmul.f32.gmra.mxu1 %v1921_v5 }
 0x3db   : > { %2156 = vmatmul.f32.gmra.mxu2 %v1920_v24 }
 0x3dc   : > { %2221 = vmatmul.f32.gmra.mxu3 %v1920_v24 }
 0x3df   : > { %2032 = vmatmul.f32.gmra.mxu0 %v1922_v53  ;;  %v7369_v35 = vpop.permute.xlu2 %1976 }
 0x3e0   : > { %2097 = vmatmul.f32.gmra.mxu1 %v1922_v53 }
 0x3e3   : > { %2159 = vmatmul.f32.gmra.mxu2 %v1921_v5 }
 0x3e4   : > { %2224 = vmatmul.f32.gmra.mxu3 %v1921_v5 }
 0x3e7   : > { %2035 = vmatmul.f32.gmra.mxu0 %v1923_v56 }
 0x3e8   : > { %2100 = vmatmul.f32.gmra.mxu1 %v1923_v56 }
 0x3e9   : > { %v7349_v31 = vpop.permute.xlu0 %1992 }
 0x3eb   : > { %2162 = vmatmul.f32.gmra.mxu2 %v1922_v53 }
 0x3ec   : > { %2227 = vmatmul.f32.gmra.mxu3 %v1922_v53 }
 0x3ef   : > { %2038 = vmatmul.f32.gmra.mxu0 %v1924_v44 }
 0x3f0   : > { %2103 = vmatmul.f32.gmra.mxu1 %v1924_v44 }
 0x3f1   : > { %v7367_v12 = vpop.permute.xlu0 %1972 }
 0x3f3   : > { %2165 = vmatmul.f32.gmra.mxu2 %v1923_v56 }
 0x3f4   : > { %2230 = vmatmul.f32.gmra.mxu3 %v1923_v56  ;;  %v7343_v1 = vpop.permute.xlu1 %1980 }
 0x3f7   : > { %2041 = vmatmul.f32.gmra.mxu0 %v1925_v63 }
 0x3f8   : > { %2106 = vmatmul.f32.gmra.mxu1 %v1925_v63 }
 0x3fa   : > { %v7381_v56 = vpop.permute.xlu0 %1960 }
 0x3fb   : > { %2168 = vmatmul.f32.gmra.mxu2 %v1924_v44 }
 0x3fc   : > { %2233 = vmatmul.f32.gmra.mxu3 %v1924_v44  ;;  %v7361_v59 = vpop.permute.xlu1 %1968  ;;  %v7383_v44 = vpop.permute.xlu2 %1964 }
 0x3ff   : > { %2044 = vmatmul.f32.gmra.mxu0 %v1926_v42 }
 0x400   : > { %2109 = vmatmul.f32.gmra.mxu1 %v1926_v42 }
 0x403   : > { %2171 = vmatmul.f32.gmra.mxu2 %v1925_v63 }
 0x404   : > { %2236 = vmatmul.f32.gmra.mxu3 %v1925_v63 }
 0x405   : > { %v7399_v22 = vpop.permute.xlu2 %1952 }
 0x407   : > { %2047 = vmatmul.f32.gmra.mxu0 %v1927_v61 }
 0x408   : > { %2112 = vmatmul.f32.gmra.mxu1 %v1927_v61 }
 0x40b   : > { %2174 = vmatmul.f32.gmra.mxu2 %v1926_v42 }
 0x40c   : > { %2239 = vmatmul.f32.gmra.mxu3 %v1926_v42 }
 0x40f   : > { %2050 = vmatmul.f32.gmra.mxu0 %v1928_v17 }
 0x410   : > { %2115 = vmatmul.f32.gmra.mxu1 %v1928_v17 }
 0x413   : > { %2177 = vmatmul.f32.gmra.mxu2 %v1927_v61 }
 0x414   : > { %2242 = vmatmul.f32.gmra.mxu3 %v1927_v61 }
 0x417   : > { %2053 = vmatmul.f32.gmra.mxu0 %v1929_v27 }
 0x418   : > { %2118 = vmatmul.f32.gmra.mxu1 %v1929_v27 }
 0x41b   : > { %2180 = vmatmul.f32.gmra.mxu2 %v1928_v17  ;;  %v7379_v53 = vpop.permute.xlu1 %1956 }
 0x41c   : > { %2245 = vmatmul.f32.gmra.mxu3 %v1928_v17 }
 0x41f   : > { %2056 = vmatmul.f32.gmra.mxu0 %v1930_v23 }
 0x420   : > { %2121 = vmatmul.f32.gmra.mxu1 %v1930_v23 }
 0x423   : > { %2183 = vmatmul.f32.gmra.mxu2 %v1929_v27 }
 0x424   : > { %2248 = vmatmul.f32.gmra.mxu3 %v1929_v27  ;;  %v7285_v45 = vpop.f32.mrf.mxu0  ;;  %v7393_v27 = vpop.permute.xlu1 %1944 }
 0x425   : > { %v7287_v29 = vpop.f32.mrf.mxu1  ;;  %9144 = vst [vmem:[#allocation10_spill] sm:$0xff] %v7393_v27 }
 0x42b   : > { %2186 = vmatmul.f32.gmra.mxu2 %v1930_v23 }
 0x42c   : > { %2251 = vmatmul.f32.gmra.mxu3 %v1930_v23  ;;  %v7289_v7 = vpop.f32.mrf.mxu0  ;;  %v7395_v23 = vpop.permute.xlu0 %1948 }
 0x42d   : > { %v7291_v25 = vpop.f32.mrf.mxu1  ;;  %v7405_v51 = vpop.permute.xlu1 %1932 }
 0x42e   : > { %9145 = vst [vmem:[#allocation31_spill] sm:$0xff] %v7405_v51  ;;  %v2078_v14 = vadd.f32 %v7287_v29, %v7405_v51 }
 0x434   : > { %v7293_v30 = vpop.f32.mrf.mxu0 }
 0x435   : > { %v7295_v9 = vpop.f32.mrf.mxu1 }
 0x436   : > { %v7297_v8 = vpop.f32.mrf.mxu2 }
 0x437   : > { %9134 = vst [vmem:[#allocation11_spill] sm:$0xff] %v7297_v8  ;;  %v7299_v6 = vpop.f32.mrf.mxu3 }
 0x438   : > { %9135 = vst [vmem:[#allocation14_spill] sm:$0xff] %v7299_v6 }
 0x43c   : > { %v7301_v54 = vpop.f32.mrf.mxu0 }
 0x43d   : > { %v7303_v38 = vpop.f32.mrf.mxu1 }
 0x43e   : > { %v7305_v39 = vpop.f32.mrf.mxu2 }
 0x43f   : > { %9136 = vst [vmem:[#allocation23_spill] sm:$0xff] %v7305_v39  ;;  %v7307_v11 = vpop.f32.mrf.mxu3  ;;  %v7409_v39 = vpop.permute.xlu0 %1936 }
 0x440   : > { %9137 = vst [vmem:[#allocation27_spill] sm:$0xff] %v7307_v11  ;;  %v2013_v11 = vadd.f32 %v7285_v45, %v7405_v51  ;;  %v2022_v51 = vadd.f32 %v7301_v54, %v7393_v27 }
 0x441   : > { %9146 = vst [vmem:[#allocation32_spill] sm:$0xff] %v7409_v39 }
 0x442   : > { %4858 = vtanh.f32 %v2013_v11 }
 0x443   : > { %4860 = vtanh.f32 %v2078_v14 }
 0x444   : > { %v7309_v57 = vpop.f32.mrf.mxu0 }
 0x445   : > { %v7311_v19 = vpop.f32.mrf.mxu1  ;;  %v2025_v11 = vadd.f32 %v7309_v57, %v7395_v23 }
 0x446   : > { %v7313_v33 = vpop.f32.mrf.mxu2  ;;  %v2090_v14 = vadd.f32 %v7311_v19, %v7395_v23 }
 0x447   : > { %9138 = vst [vmem:[#allocation21_spill] sm:$0xff] %v7313_v33  ;;  %v7315_v26 = vpop.f32.mrf.mxu3 }
 0x448   : > { %9139 = vst [vmem:[#allocation15_spill] sm:$0xff] %v7315_v26  ;;  %v7439_v54 = vpop.eup %4858 }
 0x449   : > { %9148 = vst [vmem:[#allocation34_spill] sm:$0xff] %v7439_v54 }
 0x44c   : > { %v7317_v15 = vpop.f32.mrf.mxu0 }
 0x44d   : > { %v7319_v37 = vpop.f32.mrf.mxu1 }
 0x44e   : > { %v7321_v60 = vpop.f32.mrf.mxu2  ;;  %v2093_v57 = vadd.f32 %v7319_v37, %v7399_v22 }
 0x44f   : > { %9140 = vst [vmem:[#allocation8_spill] sm:$0xff] %v7321_v60  ;;  %v7323_v58 = vpop.f32.mrf.mxu3  ;;  %v2081_v60 = vadd.f32 %v7291_v25, %v7409_v39 }
 0x450   : > { %9141 = vst [vmem:[#allocation9_spill] sm:$0xff] %v7323_v58  ;;  %v2016_v58 = vadd.f32 %v7289_v7, %v7409_v39  ;;  %v2087_v7 = vadd.f32 %v7303_v38, %v7393_v27  ;;  %v2028_v38 = vadd.f32 %v7317_v15, %v7399_v22 }
 0x452   : > { %4862 = vtanh.f32 %v2016_v58 }
 0x453   : > { %4864 = vtanh.f32 %v2081_v60  ;;  %v7443_v60 = vpop.eup %4860 }
 0x454   : > { %v7325_v49 = vpop.f32.mrf.mxu0  ;;  %9149 = vst [vmem:[#allocation35_spill] sm:$0xff] %v7443_v60 }
 0x455   : > { %v7327_v46 = vpop.f32.mrf.mxu1 }
 0x456   : > { %v7329_v18 = vpop.f32.mrf.mxu2 }
 0x457   : > { %9142 = vst [vmem:[#allocation16_spill] sm:$0xff] %v7329_v18  ;;  %v7331_v41 = vpop.f32.mrf.mxu3 }
 0x458   : > { %9143 = vst [vmem:[#allocation24_spill] sm:$0xff] %v7331_v41  ;;  %v7421_v41 = vpop.permute.xlu2 %1940  ;;  %v7447_v58 = vpop.eup %4862 }
 0x459   : > { %9147 = vst [vmem:[#allocation33_spill] sm:$0xff] %v7421_v41  ;;  %v2019_v45 = vadd.f32 %v7293_v30, %v7421_v41  ;;  %v2084_v29 = vadd.f32 %v7295_v9, %v7421_v41 }
 0x45b   : > { %4866 = vtanh.f32 %v2019_v45  ;;  %v7450_v45 = vpop.eup %4864 }
 0x45c   : > { %v7335_v13 = vpop.f32.mrf.mxu0  ;;  %4868 = vtanh.f32 %v2084_v29  ;;  %9150 = vst [vmem:[#allocation36_spill] sm:$0xff] %v7450_v45 }
 0x45d   : > { %v7337_v40 = vpop.f32.mrf.mxu1  ;;  %4870 = vtanh.f32 %v2022_v51 }
 0x45e   : > { %v7339_v47 = vpop.f32.mrf.mxu2  ;;  %4872 = vtanh.f32 %v2087_v7 }
 0x45f   : > { %v7341_v10 = vpop.f32.mrf.mxu3  ;;  %4874 = vtanh.f32 %v2025_v11 }
 0x460   : > { %4876 = vtanh.f32 %v2090_v14 }
 0x461   : > { %v7453_v51 = vpop.eup %4866  ;;  %4878 = vtanh.f32 %v2028_v38 }
 0x462   : > { %v7455_v15 = vpop.eup %4868  ;;  %4880 = vtanh.f32 %v2093_v57 }
 0x463   : > { %v7457_v41 = vpop.eup %4870 }
 0x464   : > { %v7345_v20 = vpop.f32.mrf.mxu0  ;;  %v7462_v14 = vpop.eup %4872 }
 0x465   : > { %v7347_v32 = vpop.f32.mrf.mxu1  ;;  %v7469_v57 = vpop.eup %4874 }
 0x466   : > { %v7351_v55 = vpop.f32.mrf.mxu2 }
 0x467   : > { %v7353_v48 = vpop.f32.mrf.mxu3 }
 0x46c   : > { %v7357_v3 = vpop.f32.mrf.mxu0 }
 0x46d   : > { %v7359_v62 = vpop.f32.mrf.mxu1 }
 0x46e   : > { %v7363_v28 = vpop.f32.mrf.mxu2 }
 0x46f   : > { %v7365_v50 = vpop.f32.mrf.mxu3 }
 0x474   : > { %v7371_v21 = vpop.f32.mrf.mxu0 }
 0x475   : > { %v7373_v2 = vpop.f32.mrf.mxu1 }
 0x476   : > { %v7375_v24 = vpop.f32.mrf.mxu2 }
 0x477   : > { %v7377_v5 = vpop.f32.mrf.mxu3 }
 0x47c   : > { %v7385_v63 = vpop.f32.mrf.mxu0 }
 0x47d   : > { %v7387_v42 = vpop.f32.mrf.mxu1 }
 0x47e   : > { %v7389_v61 = vpop.f32.mrf.mxu2 }
 0x47f   : > { %v7391_v17 = vpop.f32.mrf.mxu3 }
 0x484   : > { %v2048_v16 = vpop.f32.mrf.mxu0 }
 0x485   : > { %v7397_v36 = vpop.f32.mrf.mxu1  ;;  %v2049_v27 = vadd.f32 %v2048_v16, %v7343_v1 }
 0x486   : > { %v7401_v43 = vpop.f32.mrf.mxu2 }
 0x487   : > { %v7403_v52 = vpop.f32.mrf.mxu3 }
 0x48c   : > { %v2051_v6 = vpop.f32.mrf.mxu0 }
 0x48d   : > { %v2116_v8 = vpop.f32.mrf.mxu1  ;;  %v2052_v37 = vadd.f32 %v2051_v6, %v7355_v4  ;;  %v7472_v6 = vpop.eup %4876 }
 0x48e   : > { %v7413_v26 = vpop.f32.mrf.mxu2 }
 0x48f   : > { %v7415_v33 = vpop.f32.mrf.mxu3 }
 0x494   : > { %v2054_v18 = vpop.f32.mrf.mxu0 }
 0x495   : > { %v2119_v25 = vpop.f32.mrf.mxu1  ;;  %v2055_v19 = vadd.f32 %v2054_v18, %v7333_v0 }
 0x496   : > { %v7435_v30 = vpop.f32.mrf.mxu2  ;;  %v2120_v29 = vadd.f32 %v2119_v25, %v7333_v0  ;;  %v2117_v25 = vadd.f32 %v2116_v8, %v7355_v4  ;;  %v2046_v8 = vadd.f32 %v7385_v63, %v7369_v35  ;;  %v2043_v63 = vadd.f32 %v7371_v21, %v7367_v12 }
 0x497   : > { %v7437_v9 = vpop.f32.mrf.mxu3  ;;  %4882 = vtanh.f32 %v2055_v19  ;;  %v2114_v19 = vadd.f32 %v7397_v36, %v7343_v1  ;;  %v2096_v36 = vadd.f32 %v7327_v46, %v7379_v53  ;;  %v2105_v21 = vadd.f32 %v7359_v62, %v7361_v59 }
 0x498   : > { %4884 = vtanh.f32 %v2120_v29  ;;  %v2034_v62 = vadd.f32 %v7335_v13, %v7381_v56 }
 0x49c   : > { %v2057_v7 = vpop.f32.mrf.mxu0 }
 0x49d   : > { %v2122_v39 = vpop.f32.mrf.mxu1  ;;  %v2058_v18 = vadd.f32 %v2057_v7, %v7349_v31  ;;  %v2111_v7 = vadd.f32 %v7387_v42, %v7369_v35  ;;  %v2108_v42 = vadd.f32 %v7373_v2, %v7367_v12  ;;  %v2037_v2 = vadd.f32 %v7345_v20, %v7383_v44 }
 0x49e   : > { %v2123_v11 = vadd.f32 %v2122_v39, %v7349_v31  ;;  %v7465_v38 = vpop.f32.mrf.mxu2  ;;  %v7476_v39 = vpop.eup %4878 }
 0x49f   : > { %v7467_v60 = vpop.f32.mrf.mxu3  ;;  %4886 = vtanh.f32 %v2058_v18  ;;  %v7480_v29 = vpop.eup %4880  ;;  %v2031_v18 = vadd.f32 %v7325_v49, %v7379_v53 }
 0x4a0   : > { %4888 = vtanh.f32 %v2123_v11  ;;  %v4883_v16 = vpop.eup %4882 }
 0x4a1   : > { %4890 = vtanh.f32 %v2052_v37  ;;  %v4885_v54 = vpop.eup %4884 }
 0x4a2   : > { %4892 = vtanh.f32 %v2117_v25 }
 0x4a3   : > { %4894 = vtanh.f32 %v2049_v27  ;;  %v2040_v27 = vadd.f32 %v7357_v3, %v7361_v59  ;;  %v2102_v3 = vadd.f32 %v7347_v32, %v7383_v44  ;;  %v9153_v32 = vld [vmem:[#allocation18_spill] sm:$0xff] }
 0x4a4   : > { %4896 = vtanh.f32 %v2114_v19  ;;  %v5669_v19 = vmov 4  }
 0x4a5   : > { %v4887_v11 = vpop.eup %4886  ;;  %4898 = vtanh.f32 %v2046_v8  ;;  %4453 = vset.pattern.permute.xlu0 %v5669_v19  ;;  %4454 = vset.pattern.permute.xlu1 %v5669_v19 }
 0x4a6   : > { %v4889_v37 = vpop.eup %4888  ;;  %4900 = vtanh.f32 %v2111_v7  ;;  %v2184_v25 = vpop.f32.mrf.mxu2  ;;  %2400 = vmatpush.msrb.mxu0 %v4887_v11  ;;  %v9151_v7 = vld [vmem:[#allocation17_spill] sm:$0xff]  ;;  %4452 = vset.pattern.permute.xlu2 %v5669_v19 }
 0x4a7   : > { %v2249_v45 = vpop.f32.mrf.mxu3  ;;  %v4891_v49 = vpop.eup %4890  ;;  %4902 = vtanh.f32 %v2031_v18  ;;  %2465 = vmatpush.msrb.mxu1 %v4889_v37  ;;  %2393 = vperm.xlu0 %4453, %v9151_v7   ;;  %v2179_v7 = vadd.f32 %v7435_v30, %v7343_v1  ;;  %v2241_v30 = vadd.f32 %v7415_v33, %v7369_v35 }
 0x4a8   : > { %v4893_v46 = vpop.eup %4892  ;;  %4904 = vtanh.f32 %v2096_v36  ;;  %2401 = vmatpush.msrb.mxu0 %v4883_v16  ;;  %v9152_v16 = vld [vmem:[#allocation28_spill] sm:$0xff]  ;;  %2397 = vperm.xlu2 %4452, %v9153_v32   ;;  %v9163_v32 = vld [vmem:[#allocation9_spill] sm:$0xff] }
 0x4a9   : > { %v4895_v8 = vpop.eup %4894  ;;  %4906 = vtanh.f32 %v2043_v63  ;;  %2466 = vmatpush.msrb.mxu1 %v4885_v54  ;;  %2389 = vperm.xlu1 %4454, %v9152_v16   ;;  %v2099_v54 = vadd.f32 %v7337_v40, %v7381_v56  ;;  %v9161_v16 = vld [vmem:[#allocation8_spill] sm:$0xff] }
 0x4aa   : > { %v4897_v18 = vpop.eup %4896  ;;  %4908 = vtanh.f32 %v2108_v42  ;;  %2402 = vmatpush.msrb.mxu0 %v4891_v49  ;;  %v2185_v49 = vadd.f32 %v2184_v25, %v7333_v0  ;;  %v2247_v25 = vadd.f32 %v7467_v60, %v7355_v4  ;;  %v9155_v60 = vld [vmem:[#allocation29_spill] sm:$0xff] }
 0x4ab   : > { %v4899_v36 = vpop.eup %4898  ;;  %4910 = vtanh.f32 %v2040_v27  ;;  %2467 = vmatpush.msrb.mxu1 %v4893_v46 }
 0x4ac   : > { %v4901_v20 = vpop.eup %4900  ;;  %4912 = vtanh.f32 %v2105_v21  ;;  %2403 = vmatpush.msrb.mxu0 %v4895_v8  ;;  %v2250_v21 = vadd.f32 %v2249_v45, %v7333_v0  ;;  %v2182_v8 = vadd.f32 %v7465_v38, %v7355_v4  ;;  %v9154_v0 = vld [vmem:[#allocation30_spill] sm:$0xff]  ;;  %v2244_v38 = vadd.f32 %v7437_v9, %v7343_v1 }
 0x4ad   : > { %v4903_v11 = vpop.eup %4902  ;;  %4914 = vtanh.f32 %v2037_v2  ;;  %2468 = vmatpush.msrb.mxu1 %v4897_v18  ;;  %v2176_v4 = vadd.f32 %v7413_v26, %v7369_v35  ;;  %v2173_v1 = vadd.f32 %v7401_v43, %v7367_v12  ;;  %v2238_v26 = vadd.f32 %v7403_v52, %v7367_v12 }
 0x4ae   : > { %v4905_v63 = vpop.eup %4904  ;;  %4916 = vtanh.f32 %v2102_v3  ;;  %v2187_v37 = vpop.f32.mrf.mxu2  ;;  %2404 = vmatpush.msrb.mxu0 %v4899_v36  ;;  %v2235_v43 = vadd.f32 %v7391_v17, %v7361_v59  ;;  %v2167_v52 = vadd.f32 %v7375_v24, %v7383_v44  ;;  %v2164_v17 = vadd.f32 %v7363_v28, %v7381_v56 }
 0x4af   : > { %v2252_v13 = vpop.f32.mrf.mxu3  ;;  %v4907_v42 = vpop.eup %4906  ;;  %4918 = vtanh.f32 %v2034_v62  ;;  %v2188_v27 = vadd.f32 %v2187_v37, %v7349_v31  ;;  %2469 = vmatpush.msrb.mxu1 %v4901_v20  ;;  %2373 = vperm.xlu0 %4453, %v7162_v34   ;;  %v2170_v62 = vadd.f32 %v7389_v61, %v7361_v59  ;;  %v2232_v61 = vadd.f32 %v7377_v5, %v7383_v44  ;;  %v9164_v37 = vld [vmem:[#allocation33_spill] sm:$0xff] }
 0x4b0   : > { %v2253_v40 = vadd.f32 %v2252_v13, %v7349_v31  ;;  %v4909_v46 = vpop.eup %4908  ;;  %4920 = vtanh.f32 %v2099_v54  ;;  %2405 = vmatpush.msrb.mxu0 %v4907_v42  ;;  %2385 = vperm.xlu2 %4452, %v9155_v60   ;;  %v2161_v44 = vadd.f32 %v7351_v55, %v7379_v53  ;;  %v9162_v54 = vld [vmem:[#allocation35_spill] sm:$0xff]  ;;  %v9165_v13 = vld [vmem:[#allocation21_spill] sm:$0xff] }
 0x4b1   : > { %v4911_v19 = vpop.eup %4910  ;;  %4922 = vtanh.f32 %v2188_v27  ;;  %2470 = vmatpush.msrb.mxu1 %v4909_v46  ;;  %2381 = vperm.xlu1 %4454, %v9154_v0   ;;  %v2149_v42 = vadd.f32 %v9165_v13, %v9164_v37  ;;  %v9166_v27 = vld [vmem:[#allocation15_spill] sm:$0xff]  ;;  %v9167_v46 = vld [vmem:[#allocation12_spill] sm:$0xff] }
 0x4b2   : > { %v4913_v2 = vpop.eup %4912  ;;  %4924 = vtanh.f32 %v2253_v40  ;;  %2406 = vmatpush.msrb.mxu0 %v4911_v19  ;;  %v2214_v40 = vadd.f32 %v9166_v27, %v9164_v37 }
 0x4b3   : > { %v4915_v31 = vpop.eup %4914  ;;  %4926 = vtanh.f32 %v2185_v49  ;;  %2471 = vmatpush.msrb.mxu1 %v4913_v2  ;;  %v9169_v2 = vld [vmem:[#allocation23_spill] sm:$0xff] }
 0x4b4   : > { %v4917_v45 = vpop.eup %4916  ;;  %4928 = vtanh.f32 %v2250_v21  ;;  %2407 = vmatpush.msrb.mxu0 %v4915_v31  ;;  %v7582_v21 = vld [vmem:[%s8958_s2 + $0x40] sm:$0xff] }
 0x4b5   : > { %v4919_v34 = vpop.eup %4918  ;;  %4930 = vtanh.f32 %v2182_v8  ;;  %2472 = vmatpush.msrb.mxu1 %v4917_v45  ;;  %v9168_v8 = vld [vmem:[#allocation32_spill] sm:$0xff]  ;;  %v7592_v45 = vld [vmem:[%s8958_s2 + $0x50] sm:$0xff] }
 0x4b6   : > { %v4921_v18 = vpop.eup %4920  ;;  %4932 = vtanh.f32 %v2247_v25  ;;  %2408 = vmatpush.msrb.mxu0 %v4919_v34  ;;  %v2146_v25 = vadd.f32 %v9169_v2, %v9168_v8  ;;  %9171 = vst [vmem:[#allocation17_spill] sm:$0xff] %v7592_v45  ;;  %v9172_v34 = vld [vmem:[#allocation31_spill] sm:$0xff] }
 0x4b7   : > { %v4923_v3 = vpop.eup %4922  ;;  %4934 = vtanh.f32 %v2179_v7  ;;  %2473 = vmatpush.msrb.mxu1 %v4921_v18  ;;  %2361 = vperm.xlu0 %4453, %v9167_v46   ;;  %v9170_v7 = vld [vmem:[#allocation27_spill] sm:$0xff]  ;;  %v2321_v18 = vld [vmem:[#allocation2 + $0x188] sm:$0xff] }
 0x4b8   : > { %v4925_v9 = vpop.eup %4924  ;;  %4936 = vtanh.f32 %v2244_v38  ;;  %2409 = vmatpush.msrb.mxu0 %v4903_v11  ;;  %2530 = vmatpush.msrb.mxu2 %v4923_v3  ;;  %v2211_v0 = vadd.f32 %v9170_v7, %v9168_v8  ;;  %v9174_v3 = vld [vmem:[#allocation14_spill] sm:$0xff] }
 0x4b9   : > { %v4927_v36 = vpop.eup %4926  ;;  %4938 = vtanh.f32 %v2176_v4  ;;  %2474 = vmatpush.msrb.mxu1 %v4905_v63  ;;  %2595 = vmatpush.msrb.mxu3 %v4925_v9  ;;  %v9173_v4 = vld [vmem:[#allocation11_spill] sm:$0xff] }
 0x4ba   : > { %v4929_v33 = vpop.eup %4928  ;;  %4940 = vtanh.f32 %v2241_v30  ;;  %2410 = vmatpush.msrb.mxu0 %v7476_v39  ;;  %2531 = vmatpush.msrb.mxu2 %v4927_v36  ;;  %v2229_v39 = vadd.f32 %v7365_v50, %v7381_v56  ;;  %v2223_v56 = vadd.f32 %v7341_v10, %v7399_v22  ;;  %v2143_v60 = vadd.f32 %v9173_v4, %v9172_v34 }
 0x4bb   : > { %v4931_v35 = vpop.eup %4930  ;;  %4942 = vtanh.f32 %v2173_v1  ;;  %2475 = vmatpush.msrb.mxu1 %v7480_v29  ;;  %2596 = vmatpush.msrb.mxu3 %v4929_v33  ;;  %v2208_v1 = vadd.f32 %v9174_v3, %v9172_v34  ;;  %v9175_v33 = vld [vmem:[#allocation22_spill] sm:$0xff] }
 0x4bc   : > { %v4933_v12 = vpop.eup %4932  ;;  %4944 = vtanh.f32 %v2238_v26  ;;  %2411 = vmatpush.msrb.mxu0 %v7469_v57  ;;  %2532 = vmatpush.msrb.mxu2 %v4931_v35  ;;  %v2226_v57 = vadd.f32 %v7353_v48, %v7379_v53  ;;  %v9156_v53 = vld [vmem:[#allocation16_spill] sm:$0xff] }
 0x4bd   : > { %v4935_v59 = vpop.eup %4934  ;;  %4946 = vtanh.f32 %v2170_v62  ;;  %2476 = vmatpush.msrb.mxu1 %v7472_v6  ;;  %2597 = vmatpush.msrb.mxu3 %v4933_v12  ;;  %v9158_v6 = vld [vmem:[#allocation24_spill] sm:$0xff]  ;;  %v7604_v12 = vld [vmem:[%s8958_s2 + $0x38] sm:$0xff] }
 0x4be   : > { %v4937_v24 = vpop.eup %4936  ;;  %4948 = vtanh.f32 %v2235_v43  ;;  %2412 = vmatpush.msrb.mxu0 %v7457_v41  ;;  %2533 = vmatpush.msrb.mxu2 %v4935_v59  ;;  %v2158_v41 = vadd.f32 %v7339_v47, %v7399_v22  ;;  %v7562_v47 = vld [vmem:[#allocation2 + $0x180] sm:$0xff]  ;;  %v2220_v29 = vadd.f32 %v9158_v6, %v7395_v23  ;;  %v9159_v22 = vld [vmem:[#allocation34_spill] sm:$0xff]  ;;  %9177 = vst [vmem:[#allocation28_spill] sm:$0xff] %v7604_v12  ;;  %v2333_v6 = vld [vmem:[#allocation2 + $0x1e8] sm:$0xff] }
 0x4bf   : > { %v4939_v5 = vpop.eup %4938  ;;  %4950 = vtanh.f32 %v2167_v52  ;;  %2477 = vmatpush.msrb.mxu1 %v7462_v14  ;;  %2598 = vmatpush.msrb.mxu3 %v4937_v24  ;;  %v9157_v14 = vld [vmem:[#allocation36_spill] sm:$0xff]  ;;  %v9176_v43 = vld [vmem:[#allocation26_spill] sm:$0xff] }
 0x4c0   : > { %v4941_v28 = vpop.eup %4940  ;;  %4952 = vtanh.f32 %v2232_v61  ;;  %2413 = vmatpush.msrb.mxu0 %v7453_v51  ;;  %2534 = vmatpush.msrb.mxu2 %v4939_v5  ;;  %v2155_v51 = vadd.f32 %v9156_v53, %v7395_v23  ;;  %v2322_v59 = vld [vmem:[#allocation2 + $0x190] sm:$0xff]  ;;  %v9178_v5 = vld [vmem:[#allocation19_spill] sm:$0xff]  ;;  %v2328_v53 = vld [vmem:[#allocation2 + $0x1c0] sm:$0xff] }
 0x4c1   : > { %v4943_v50 = vpop.eup %4942  ;;  %4954 = vtanh.f32 %v2164_v17  ;;  %2478 = vmatpush.msrb.mxu1 %v7455_v15  ;;  %2599 = vmatpush.msrb.mxu3 %v4941_v28  ;;  %v9180_v28 = vld [vmem:[#allocation20_spill] sm:$0xff] }
 0x4c2   : > { %v4945_v55 = vpop.eup %4944  ;;  %4956 = vtanh.f32 %v2229_v39  ;;  %2414 = vmatpush.msrb.mxu0 %v7447_v58  ;;  %2535 = vmatpush.msrb.mxu2 %v4943_v50  ;;  %v9160_v58 = vld [vmem:[#allocation10_spill] sm:$0xff]  ;;  %v9181_v50 = vld [vmem:[#allocation13_spill] sm:$0xff] }
 0x4c3   : > { %v4947_v48 = vpop.eup %4946  ;;  %4958 = vtanh.f32 %v2161_v44  ;;  %2479 = vmatpush.msrb.mxu1 %v9157_v14  ;;  %2600 = vmatpush.msrb.mxu3 %v4945_v55  ;;  %v2152_v20 = vadd.f32 %v9161_v16, %v9160_v58  ;;  %v2217_v63 = vadd.f32 %v9163_v32, %v9160_v58  ;;  %v9179_v44 = vld [vmem:[#allocation25_spill] sm:$0xff]  ;;  %v2330_v14 = vld [vmem:[#allocation2 + $0x1d0] sm:$0xff] }
 0x4c4   : > { %v4949_v15 = vpop.eup %4948  ;;  %4960 = vtanh.f32 %v2226_v57  ;;  %2415 = vmatpush.msrb.mxu0 %v9159_v22  ;;  %2536 = vmatpush.msrb.mxu2 %v4947_v48  ;;  %v2323_v57 = vld [vmem:[#allocation2 + $0x198] sm:$0xff]  ;;  %v2325_v55 = vld [vmem:[#allocation2 + $0x1a8] sm:$0xff] }
 0x4c5   : > { %v4951_v10 = vpop.eup %4950  ;;  %4962 = vtanh.f32 %v2158_v41  ;;  %2480 = vmatpush.msrb.mxu1 %v9162_v54  ;;  %2601 = vmatpush.msrb.mxu3 %v4949_v15  ;;  %v2324_v41 = vld [vmem:[#allocation2 + $0x1a0] sm:$0xff]  ;;  %v2327_v48 = vld [vmem:[#allocation2 + $0x1b8] sm:$0xff] }
 0x4c6   : > { %v4953_v11 = vpop.eup %4952  ;;  %4964 = vtanh.f32 %v2223_v56  ;;  %2416 = vmatmul.f32.vlgmr.msrb.gmra.mxu0 %v7562_v47  ;;  %2481 = vmatmul.f32.vlgmr.msrb.gmra.mxu1 %v7562_v47  ;;  %v2326_v56 = vld [vmem:[#allocation2 + $0x1b0] sm:$0xff]  ;;  %v2332_v15 = vld [vmem:[#allocation2 + $0x1e0] sm:$0xff]  ;;  %v2335_v22 = vld [vmem:[#allocation2 + $0x1f8] sm:$0xff] }
 0x4c7   : > { %v4955_v23 = vpop.eup %4954  ;;  %4966 = vtanh.f32 %v2155_v51  ;;  %2537 = vmatpush.msrb.mxu2 %v4951_v10  ;;  %2602 = vmatpush.msrb.mxu3 %v4953_v11  ;;  %v2329_v51 = vld [vmem:[#allocation2 + $0x1c8] sm:$0xff] }
 0x4c8   : > { %v4957_v49 = vpop.eup %4956  ;;  %4968 = vtanh.f32 %v2220_v29  ;;  %2369 = vperm.xlu1 %4454, %v7582_v21   ;;  %2377 = vperm.xlu2 %4452, %v7592_v45   ;;  %v2334_v29 = vld [vmem:[#allocation2 + $0x1f0] sm:$0xff] }
 0x4c9   : > { %v4959_v19 = vpop.eup %4958  ;;  %4970 = vtanh.f32 %v2152_v20  ;;  %2538 = vmatpush.msrb.mxu2 %v4955_v23  ;;  %2603 = vmatpush.msrb.mxu3 %v4957_v49 }
 0x4ca   : > { %v4961_v31 = vpop.eup %4960  ;;  %4972 = vtanh.f32 %v2217_v63  ;;  %2349 = vperm.xlu0 %4453, %v9175_v33  }
 0x4cb   : > { %v4963_v38 = vpop.eup %4962  ;;  %4974 = vtanh.f32 %v2149_v42  ;;  %2539 = vmatpush.msrb.mxu2 %v4959_v19  ;;  %2604 = vmatpush.msrb.mxu3 %v4961_v31 }
 0x4cc   : > { %v4965_v30 = vpop.eup %4964  ;;  %4976 = vtanh.f32 %v2214_v40 }
 0x4cd   : > { %v4967_v9 = vpop.eup %4966  ;;  %4978 = vtanh.f32 %v2146_v25  ;;  %2540 = vmatpush.msrb.mxu2 %v4963_v38  ;;  %2605 = vmatpush.msrb.mxu3 %v4965_v30 }
 0x4ce   : > { %v4969_v26 = vpop.eup %4968  ;;  %4980 = vtanh.f32 %v2211_v0  ;;  %2419 = vmatmul.f32.gmra.mxu0 %v2321_v18  ;;  %2484 = vmatmul.f32.gmra.mxu1 %v2321_v18 }
 0x4cf   : > { %v4971_v36 = vpop.eup %4970  ;;  %4982 = vtanh.f32 %v2143_v60  ;;  %2541 = vmatpush.msrb.mxu2 %v4967_v9  ;;  %2606 = vmatpush.msrb.mxu3 %v4969_v26 }
 0x4d0   : > { %v4973_v62 = vpop.eup %4972  ;;  %4984 = vtanh.f32 %v2208_v1  ;;  %2357 = vperm.xlu1 %4454, %v9176_v43   ;;  %2365 = vperm.xlu2 %4452, %v7604_v12  }
 0x4d1   : > { %v4975_v35 = vpop.eup %4974  ;;  %2542 = vmatpush.msrb.mxu2 %v4971_v36  ;;  %2607 = vmatpush.msrb.mxu3 %v4973_v62 }
 0x4d2   : > { %v4977_v52 = vpop.eup %4976  ;;  %2337 = vperm.xlu0 %4453, %v9178_v5  }
 0x4d3   : > { %v4979_v61 = vpop.eup %4978  ;;  %2543 = vmatpush.msrb.mxu2 %v4975_v35  ;;  %2608 = vmatpush.msrb.mxu3 %v4977_v52 }
 0x4d4   : > { %v4981_v17 = vpop.eup %4980 }
 0x4d5   : > { %v4983_v24 = vpop.eup %4982  ;;  %2544 = vmatpush.msrb.mxu2 %v4979_v61  ;;  %2609 = vmatpush.msrb.mxu3 %v4981_v17 }
 0x4d6   : > { %v4985_v39 = vpop.eup %4984  ;;  %2422 = vmatmul.f32.gmra.mxu0 %v2322_v59  ;;  %2487 = vmatmul.f32.gmra.mxu1 %v2322_v59 }
 0x4d7   : > { %2545 = vmatpush.msrb.mxu2 %v4983_v24  ;;  %2610 = vmatpush.msrb.mxu3 %v4985_v39 }
 0x4d8   : > { %2546 = vmatmul.f32.vlgmr.msrb.gmra.mxu2 %v7562_v47  ;;  %2611 = vmatmul.f32.vlgmr.msrb.gmra.mxu3 %v7562_v47  ;;  %v2331_v47 = vld [vmem:[#allocation2 + $0x1d8] sm:$0xff] }
 0x4d9   : > { %2345 = vperm.xlu1 %4454, %v9179_v44   ;;  %2353 = vperm.xlu2 %4452, %v9180_v28  }
 0x4de   : > { %2425 = vmatmul.f32.gmra.mxu0 %v2323_v57  ;;  %2490 = vmatmul.f32.gmra.mxu1 %v2323_v57 }
 0x4e0   : > { %2549 = vmatmul.f32.gmra.mxu2 %v2321_v18  ;;  %2614 = vmatmul.f32.gmra.mxu3 %v2321_v18 }
 0x4e1   : > { %2341 = vperm.xlu2 %4452, %v9181_v50  }
 0x4e6   : > { %2428 = vmatmul.f32.gmra.mxu0 %v2324_v41  ;;  %2493 = vmatmul.f32.gmra.mxu1 %v2324_v41 }
 0x4e8   : > { %2552 = vmatmul.f32.gmra.mxu2 %v2322_v59  ;;  %2617 = vmatmul.f32.gmra.mxu3 %v2322_v59 }
 0x4ee   : > { %2431 = vmatmul.f32.gmra.mxu0 %v2325_v55  ;;  %2496 = vmatmul.f32.gmra.mxu1 %v2325_v55 }
 0x4f0   : > { %2555 = vmatmul.f32.gmra.mxu2 %v2323_v57  ;;  %2620 = vmatmul.f32.gmra.mxu3 %v2323_v57 }
 0x4f6   : > { %2434 = vmatmul.f32.gmra.mxu0 %v2326_v56  ;;  %2499 = vmatmul.f32.gmra.mxu1 %v2326_v56 }
 0x4f8   : > { %2558 = vmatmul.f32.gmra.mxu2 %v2324_v41  ;;  %2623 = vmatmul.f32.gmra.mxu3 %v2324_v41 }
 0x4fe   : > { %2437 = vmatmul.f32.gmra.mxu0 %v2327_v48  ;;  %2502 = vmatmul.f32.gmra.mxu1 %v2327_v48 }
 0x500   : > { %2561 = vmatmul.f32.gmra.mxu2 %v2325_v55  ;;  %2626 = vmatmul.f32.gmra.mxu3 %v2325_v55 }
 0x502   : > { %v7665_v60 = vpop.permute.xlu2 %2397 }
 0x506   : > { %2440 = vmatmul.f32.gmra.mxu0 %v2328_v53  ;;  %2505 = vmatmul.f32.gmra.mxu1 %v2328_v53 }
 0x508   : > { %2564 = vmatmul.f32.gmra.mxu2 %v2326_v56  ;;  %2629 = vmatmul.f32.gmra.mxu3 %v2326_v56 }
 0x50a   : > { %v7677_v26 = vpop.permute.xlu2 %2385 }
 0x50e   : > { %2443 = vmatmul.f32.gmra.mxu0 %v2329_v51  ;;  %2508 = vmatmul.f32.gmra.mxu1 %v2329_v51 }
 0x510   : > { %2567 = vmatmul.f32.gmra.mxu2 %v2327_v48  ;;  %2632 = vmatmul.f32.gmra.mxu3 %v2327_v48 }
 0x516   : > { %2446 = vmatmul.f32.gmra.mxu0 %v2330_v14  ;;  %2511 = vmatmul.f32.gmra.mxu1 %v2330_v14 }
 0x518   : > { %2570 = vmatmul.f32.gmra.mxu2 %v2328_v53  ;;  %2635 = vmatmul.f32.gmra.mxu3 %v2328_v53 }
 0x519   : > { %v7675_v9 = vpop.permute.xlu0 %2393 }
 0x51b   : > { %v7679_v36 = vpop.permute.xlu1 %2389 }
 0x51e   : > { %2449 = vmatmul.f32.gmra.mxu0 %v2331_v47  ;;  %2514 = vmatmul.f32.gmra.mxu1 %v2331_v47 }
 0x520   : > { %2573 = vmatmul.f32.gmra.mxu2 %v2329_v51  ;;  %2638 = vmatmul.f32.gmra.mxu3 %v2329_v51 }
 0x521   : > { %v7689_v52 = vpop.permute.xlu0 %2373 }
 0x522   : > { %v7691_v61 = vpop.permute.xlu2 %2377 }
 0x523   : > { %v7701_v5 = vpop.permute.xlu1 %2381 }
 0x526   : > { %2452 = vmatmul.f32.gmra.mxu0 %v2332_v15  ;;  %2517 = vmatmul.f32.gmra.mxu1 %v2332_v15 }
 0x528   : > { %2576 = vmatmul.f32.gmra.mxu2 %v2330_v14  ;;  %2641 = vmatmul.f32.gmra.mxu3 %v2330_v14 }
 0x529   : > { %v7707_v41 = vpop.permute.xlu0 %2361 }
 0x52a   : > { %v7709_v55 = vpop.permute.xlu2 %2365 }
 0x52e   : > { %2455 = vmatmul.f32.gmra.mxu0 %v2333_v6  ;;  %2520 = vmatmul.f32.gmra.mxu1 %v2333_v6 }
 0x530   : > { %2579 = vmatmul.f32.gmra.mxu2 %v2331_v47  ;;  %2644 = vmatmul.f32.gmra.mxu3 %v2331_v47 }
 0x536   : > { %2458 = vmatmul.f32.gmra.mxu0 %v2334_v29  ;;  %2523 = vmatmul.f32.gmra.mxu1 %v2334_v29 }
 0x538   : > { %2582 = vmatmul.f32.gmra.mxu2 %v2332_v15  ;;  %2647 = vmatmul.f32.gmra.mxu3 %v2332_v15  ;;  %v7719_v15 = vpop.permute.xlu2 %2353 }
 0x53a   : > { %v7711_v56 = vpop.permute.xlu1 %2369 }
 0x53c   : > { %v7717_v47 = vpop.permute.xlu0 %2349 }
 0x53e   : > { %2461 = vmatmul.f32.gmra.mxu0 %v2335_v22  ;;  %2526 = vmatmul.f32.gmra.mxu1 %v2335_v22 }
 0x540   : > { %2585 = vmatmul.f32.gmra.mxu2 %v2333_v6  ;;  %2650 = vmatmul.f32.gmra.mxu3 %v2333_v6  ;;  %v7729_v12 = vpop.permute.xlu2 %2341 }
 0x542   : > { %v7721_v6 = vpop.permute.xlu1 %2357 }
 0x543   : > { %v7613_v10 = vpop.f32.mrf.mxu0  ;;  %v7615_v58 = vpop.f32.mrf.mxu1 }
 0x548   : > { %2588 = vmatmul.f32.gmra.mxu2 %v2334_v29  ;;  %2653 = vmatmul.f32.gmra.mxu3 %v2334_v29 }
 0x54b   : > { %v7617_v16 = vpop.f32.mrf.mxu0  ;;  %v7619_v20 = vpop.f32.mrf.mxu1 }
 0x54c   : > { %v7743_v45 = vpop.permute.xlu1 %2345 }
 0x550   : > { %2591 = vmatmul.f32.gmra.mxu2 %v2335_v22  ;;  %2656 = vmatmul.f32.gmra.mxu3 %v2335_v22 }
 0x553   : > { %v7621_v54 = vpop.f32.mrf.mxu0  ;;  %v7623_v11 = vpop.f32.mrf.mxu1 }
 0x55b   : > { %v7625_v32 = vpop.f32.mrf.mxu0  ;;  %v7627_v63 = vpop.f32.mrf.mxu1 }
 0x55c   : > { %v7629_v23 = vpop.f32.mrf.mxu2  ;;  %v7631_v37 = vpop.f32.mrf.mxu3 }
 0x55d   : > { %9182 = vst [vmem:[#allocation18_spill] sm:$0xff] %v7629_v23 }
 0x55e   : > { %9183 = vst [vmem:[#allocation30_spill] sm:$0xff] %v7631_v37 }
 0x563   : > { %v7633_v13 = vpop.f32.mrf.mxu0  ;;  %v7635_v42 = vpop.f32.mrf.mxu1 }
 0x564   : > { %v7637_v49 = vpop.f32.mrf.mxu2  ;;  %v7639_v27 = vpop.f32.mrf.mxu3 }
 0x565   : > { %9184 = vst [vmem:[#allocation29_spill] sm:$0xff] %v7637_v49  ;;  %v2421_v49 = vadd.f32 %v7617_v16, %v7729_v12  ;;  %v2424_v16 = vadd.f32 %v7621_v54, %v7743_v45 }
 0x566   : > { %9185 = vst [vmem:[#allocation16_spill] sm:$0xff] %v7639_v27  ;;  %v7727_v27 = vpop.permute.xlu0 %2337 }
 0x567   : > { %9196 = vst [vmem:[#allocation12_spill] sm:$0xff] %v7727_v27  ;;  %4986 = vtanh.f32 %v2421_v49 }
 0x56b   : > { %v7641_v40 = vpop.f32.mrf.mxu0  ;;  %v7643_v46 = vpop.f32.mrf.mxu1 }
 0x56c   : > { %v7645_v19 = vpop.f32.mrf.mxu2  ;;  %v7647_v8 = vpop.f32.mrf.mxu3 }
 0x56d   : > { %9186 = vst [vmem:[#allocation36_spill] sm:$0xff] %v7645_v19 }
 0x56e   : > { %9187 = vst [vmem:[#allocation24_spill] sm:$0xff] %v7647_v8 }
 0x573   : > { %v7649_v2 = vpop.f32.mrf.mxu0  ;;  %v7651_v25 = vpop.f32.mrf.mxu1 }
 0x574   : > { %v7653_v31 = vpop.f32.mrf.mxu2  ;;  %v7655_v7 = vpop.f32.mrf.mxu3 }
 0x575   : > { %9188 = vst [vmem:[#allocation34_spill] sm:$0xff] %v7653_v31 }
 0x576   : > { %9189 = vst [vmem:[#allocation10_spill] sm:$0xff] %v7655_v7  ;;  %v2418_v7 = vadd.f32 %v7613_v10, %v7727_v27 }
 0x578   : > { %4988 = vtanh.f32 %v2418_v7  ;;  %v7756_v7 = vpop.eup %4986 }
 0x57b   : > { %v7657_v0 = vpop.f32.mrf.mxu0  ;;  %v7659_v38 = vpop.f32.mrf.mxu1 }
 0x57c   : > { %v7661_v34 = vpop.f32.mrf.mxu2  ;;  %v7663_v4 = vpop.f32.mrf.mxu3 }
 0x57d   : > { %9190 = vst [vmem:[#allocation8_spill] sm:$0xff] %v7661_v34  ;;  %v2483_v34 = vadd.f32 %v7615_v58, %v7727_v27 }
 0x57e   : > { %9191 = vst [vmem:[#allocation35_spill] sm:$0xff] %v7663_v4 }
 0x57f   : > { %4990 = vtanh.f32 %v2483_v34 }
 0x583   : > { %v7667_v18 = vpop.f32.mrf.mxu0  ;;  %v7669_v30 = vpop.f32.mrf.mxu1 }
 0x584   : > { %v7671_v3 = vpop.f32.mrf.mxu2  ;;  %v7673_v1 = vpop.f32.mrf.mxu3 }
 0x585   : > { %9192 = vst [vmem:[#allocation9_spill] sm:$0xff] %v7671_v3 }
 0x586   : > { %9193 = vst [vmem:[#allocation33_spill] sm:$0xff] %v7673_v1  ;;  %v2486_v1 = vadd.f32 %v7619_v20, %v7729_v12 }
 0x588   : > { %4992 = vtanh.f32 %v2486_v1 }
 0x589   : > { %4994 = vtanh.f32 %v2424_v16 }
 0x58b   : > { %v7681_v62 = vpop.f32.mrf.mxu0  ;;  %v7683_v33 = vpop.f32.mrf.mxu1 }
 0x58c   : > { %v7685_v43 = vpop.f32.mrf.mxu2  ;;  %v7687_v35 = vpop.f32.mrf.mxu3 }
 0x58d   : > { %9194 = vst [vmem:[#allocation21_spill] sm:$0xff] %v7685_v43 }
 0x58e   : > { %9195 = vst [vmem:[#allocation15_spill] sm:$0xff] %v7687_v35 }
 0x593   : > { %v7693_v59 = vpop.f32.mrf.mxu0  ;;  %v7695_v17 = vpop.f32.mrf.mxu1 }
 0x594   : > { %v7697_v24 = vpop.f32.mrf.mxu2  ;;  %v7699_v39 = vpop.f32.mrf.mxu3 }
 0x59b   : > { %v2450_v44 = vpop.f32.mrf.mxu0  ;;  %v2515_v28 = vpop.f32.mrf.mxu1 }
 0x59c   : > { %v7703_v57 = vpop.f32.mrf.mxu2  ;;  %v7705_v50 = vpop.f32.mrf.mxu3 }
 0x5a3   : > { %v2453_v48 = vpop.f32.mrf.mxu0  ;;  %v2518_v53 = vpop.f32.mrf.mxu1 }
 0x5a4   : > { %v7713_v51 = vpop.f32.mrf.mxu2  ;;  %v7715_v14 = vpop.f32.mrf.mxu3  ;;  %v2454_v34 = vadd.f32 %v2453_v48, %v7677_v26  ;;  %v2489_v48 = vadd.f32 %v7623_v11, %v7743_v45 }
 0x5ab   : > { %v2456_v29 = vpop.f32.mrf.mxu0  ;;  %v2521_v22 = vpop.f32.mrf.mxu1 }
 0x5ac   : > { %v7723_v37 = vpop.f32.mrf.mxu2  ;;  %v7725_v23 = vpop.f32.mrf.mxu3  ;;  %v2457_v58 = vadd.f32 %v2456_v29, %v7679_v36 }
 0x5b3   : > { %v2459_v8 = vpop.f32.mrf.mxu0  ;;  %v2524_v19 = vpop.f32.mrf.mxu1 }
 0x5b4   : > { %v7735_v31 = vpop.f32.mrf.mxu2  ;;  %v7737_v4 = vpop.f32.mrf.mxu3  ;;  %v2460_v3 = vadd.f32 %v2459_v8, %v7675_v9  ;;  %v2525_v10 = vadd.f32 %v2524_v19, %v7675_v9  ;;  %v2522_v8 = vadd.f32 %v2521_v22, %v7679_v36  ;;  %v2516_v22 = vadd.f32 %v2515_v28, %v7701_v5 }
 0x5b5   : > { %v7759_v19 = vpop.eup %4988 }
 0x5b6   : > { %4996 = vtanh.f32 %v2460_v3  ;;  %v7762_v1 = vpop.eup %4990  ;;  %v2519_v3 = vadd.f32 %v2518_v53, %v7677_v26  ;;  %v2427_v53 = vadd.f32 %v7625_v32, %v7717_v47  ;;  %v2445_v32 = vadd.f32 %v7681_v62, %v7689_v52 }
 0x5b7   : > { %4998 = vtanh.f32 %v2525_v10 }
 0x5bb   : > { %v2462_v35 = vpop.f32.mrf.mxu0  ;;  %v2527_v43 = vpop.f32.mrf.mxu1 }
 0x5bc   : > { %v2463_v20 = vadd.f32 %v2462_v35, %v7665_v60  ;;  %v2528_v49 = vadd.f32 %v2527_v43, %v7665_v60  ;;  %v7752_v27 = vpop.f32.mrf.mxu2  ;;  %v7754_v54 = vpop.f32.mrf.mxu3  ;;  %v2451_v35 = vadd.f32 %v2450_v44, %v7701_v5  ;;  %v2448_v44 = vadd.f32 %v7693_v59, %v7691_v61 }
 0x5bd   : > { %v7765_v43 = vpop.eup %4992  ;;  %v2510_v59 = vadd.f32 %v7683_v33, %v7689_v52 }
 0x5be   : > { %5000 = vtanh.f32 %v2463_v20  ;;  %v7768_v29 = vpop.eup %4994 }
 0x5bf   : > { %5002 = vtanh.f32 %v2528_v49  ;;  %v4997_v16 = vpop.eup %4996 }
 0x5c0   : > { %5004 = vtanh.f32 %v2457_v58  ;;  %v4999_v10 = vpop.eup %4998 }
 0x5c1   : > { %5006 = vtanh.f32 %v2522_v8  ;;  %v2513_v8 = vadd.f32 %v7695_v17, %v7691_v61 }
 0x5c2   : > { %5008 = vtanh.f32 %v2454_v34 }
 0x5c3   : > { %5010 = vtanh.f32 %v2519_v3 }
 0x5c4   : > { %v5001_v20 = vpop.eup %5000  ;;  %5012 = vtanh.f32 %v2451_v35  ;;  %v7777_v58 = vpop.f32.mrf.mxu2  ;;  %v2442_v35 = vadd.f32 %v7667_v18, %v7711_v56 }
 0x5c5   : > { %v7779_v49 = vpop.f32.mrf.mxu3  ;;  %v5003_v28 = vpop.eup %5002  ;;  %5014 = vtanh.f32 %v2516_v22  ;;  %2805 = vmatpush.msra.mxu0 %v5001_v20  ;;  %v2507_v22 = vadd.f32 %v7669_v30, %v7711_v56 }
 0x5c6   : > { %v5005_v11 = vpop.eup %5004  ;;  %5016 = vtanh.f32 %v2489_v48  ;;  %2870 = vmatpush.msra.mxu1 %v5003_v28  ;;  %v2439_v48 = vadd.f32 %v7657_v0, %v7709_v55  ;;  %v2501_v0 = vadd.f32 %v7651_v25, %v7707_v41  ;;  %v5670_v28 = vmov 5   ;;  %v7810_v25 = vld [vmem:[%s8958_s2 + $0x78] sm:$0xff] }
 0x5c7   : > { %v5007_v34 = vpop.eup %5006  ;;  %5018 = vtanh.f32 %v2427_v53  ;;  %2806 = vmatpush.msra.mxu0 %v4997_v16  ;;  %v2504_v16 = vadd.f32 %v7659_v38, %v7709_v55  ;;  %v2433_v38 = vadd.f32 %v7641_v40, %v7721_v6  ;;  %4455 = vset.pattern.permute.xlu1 %v5670_v28  ;;  %v2430_v40 = vadd.f32 %v7633_v13, %v7719_v15 }
 0x5c8   : > { %v5009_v3 = vpop.eup %5008  ;;  %5020 = vtanh.f32 %v2448_v44  ;;  %2871 = vmatpush.msra.mxu1 %v4999_v10  ;;  %v2436_v10 = vadd.f32 %v7649_v2, %v7707_v41  ;;  %2802 = vperm.xlu1 %4455, %v7810_v25   ;;  %v2492_v13 = vadd.f32 %v7627_v63, %v7717_v47 }
 0x5c9   : > { %v5011_v17 = vpop.eup %5010  ;;  %5022 = vtanh.f32 %v2513_v8  ;;  %2807 = vmatpush.msra.mxu0 %v5005_v11  ;;  %v2498_v8 = vadd.f32 %v7643_v46, %v7721_v6  ;;  %4456 = vset.pattern.permute.xlu2 %v5670_v28  ;;  %v2495_v46 = vadd.f32 %v7635_v42, %v7719_v15  ;;  %v7828_v42 = vld [vmem:[%s8958_s2 + $0x68] sm:$0xff] }
 0x5ca   : > { %v5013_v62 = vpop.eup %5012  ;;  %5024 = vtanh.f32 %v2445_v32  ;;  %2872 = vmatpush.msra.mxu1 %v5007_v34  ;;  %v7820_v34 = vld [vmem:[%s8958_s2 + $0x70] sm:$0xff]  ;;  %4457 = vset.pattern.permute.xlu0 %v5670_v28 }
 0x5cb   : > { %v5015_v33 = vpop.eup %5014  ;;  %5026 = vtanh.f32 %v2510_v59  ;;  %2808 = vmatpush.msra.mxu0 %v5009_v3  ;;  %2798 = vperm.xlu2 %4456, %v7820_v34  }
 0x5cc   : > { %v7795_v18 = vpop.eup %5016  ;;  %5028 = vtanh.f32 %v2442_v35  ;;  %v2589_v30 = vpop.f32.mrf.mxu2  ;;  %2873 = vmatpush.msra.mxu1 %v5011_v17  ;;  %2794 = vperm.xlu0 %4457, %v7828_v42  }
 0x5cd   : > { %v2654_v53 = vpop.f32.mrf.mxu3  ;;  %v7799_v20 = vpop.eup %5018  ;;  %5030 = vtanh.f32 %v2507_v22  ;;  %2809 = vmatpush.msra.mxu0 %v5013_v62  ;;  %v2590_v63 = vadd.f32 %v2589_v30, %v7675_v9  ;;  %v7840_v30 = vld [vmem:[%s8958_s2 + $0x60] sm:$0xff] }
 0x5ce   : > { %v5021_v44 = vpop.eup %5020  ;;  %5032 = vtanh.f32 %v2439_v48  ;;  %2874 = vmatpush.msra.mxu1 %v5015_v33 }
 0x5cf   : > { %v5023_v2 = vpop.eup %5022  ;;  %5034 = vtanh.f32 %v2504_v16  ;;  %2810 = vmatpush.msra.mxu0 %v5021_v44  ;;  %v2587_v44 = vadd.f32 %v7777_v58, %v7679_v36  ;;  %v7850_v58 = vld [vmem:[%s8958_s2 + $0x58] sm:$0xff] }
 0x5d0   : > { %v5025_v11 = vpop.eup %5024  ;;  %5036 = vtanh.f32 %v2436_v10  ;;  %2875 = vmatpush.msra.mxu1 %v5023_v2  ;;  %v2655_v10 = vadd.f32 %v2654_v53, %v7675_v9  ;;  %2790 = vperm.xlu1 %4455, %v7840_v30   ;;  %v2584_v53 = vadd.f32 %v7752_v27, %v7677_v26  ;;  %v2649_v2 = vadd.f32 %v7754_v54, %v7677_v26 }
 0x5d1   : > { %v5027_v32 = vpop.eup %5026  ;;  %5038 = vtanh.f32 %v2501_v0  ;;  %2811 = vmatpush.msra.mxu0 %v5025_v11  ;;  %v2578_v26 = vadd.f32 %v7723_v37, %v7691_v61  ;;  %v2640_v37 = vadd.f32 %v7715_v14, %v7689_v52 }
 0x5d2   : > { %v5029_v59 = vpop.eup %5028  ;;  %5040 = vtanh.f32 %v2433_v38  ;;  %2876 = vmatpush.msra.mxu1 %v5027_v32  ;;  %v2652_v38 = vadd.f32 %v7779_v49, %v7679_v36  ;;  %v2581_v49 = vadd.f32 %v7735_v31, %v7701_v5  ;;  %v2643_v31 = vadd.f32 %v7725_v23, %v7691_v61 }
 0x5d3   : > { %v5031_v3 = vpop.eup %5030  ;;  %5042 = vtanh.f32 %v2498_v8  ;;  %2812 = vmatpush.msra.mxu0 %v5029_v59  ;;  %2786 = vperm.xlu2 %4456, %v7850_v58   ;;  %v2646_v8 = vadd.f32 %v7737_v4, %v7701_v5  ;;  %v2575_v4 = vadd.f32 %v7713_v51, %v7689_v52  ;;  %v2572_v61 = vadd.f32 %v7703_v57, %v7711_v56  ;;  %v7877_v52 = vld [vmem:[#allocation2 + $0x200] sm:$0xff] }
 0x5d4   : > { %v5033_v35 = vpop.eup %5032  ;;  %5044 = vtanh.f32 %v2430_v40  ;;  %v2592_v17 = vpop.f32.mrf.mxu2  ;;  %2877 = vmatpush.msra.mxu1 %v5031_v3  ;;  %2774 = vperm.xlu0 %4457, %v7582_v21   ;;  %v9200_v40 = vld [vmem:[#allocation17_spill] sm:$0xff]  ;;  %v9202_v3 = vld [vmem:[#allocation8_spill] sm:$0xff] }
 0x5d5   : > { %v2657_v22 = vpop.f32.mrf.mxu3  ;;  %v5035_v62 = vpop.eup %5034  ;;  %5046 = vtanh.f32 %v2495_v46  ;;  %v2593_v48 = vadd.f32 %v2592_v17, %v7665_v60  ;;  %2813 = vmatpush.msra.mxu0 %v5033_v35  ;;  %v9201_v46 = vld [vmem:[#allocation33_spill] sm:$0xff]  ;;  %v2560_v35 = vadd.f32 %v9202_v3, %v7719_v15  ;;  %v2736_v3 = vld [vmem:[#allocation2 + $0x258] sm:$0xff] }
 0x5d6   : > { %v2658_v33 = vadd.f32 %v2657_v22, %v7665_v60  ;;  %v5037_v16 = vpop.eup %5036  ;;  %5048 = vtanh.f32 %v2492_v13  ;;  %2878 = vmatpush.msra.mxu1 %v5035_v62  ;;  %v2628_v59 = vadd.f32 %v9201_v46, %v7721_v6  ;;  %v7907_v17 = vld [vmem:[%s8958_s2 + $0x28] sm:$0xff]  ;;  %v9204_v22 = vld [vmem:[#allocation35_spill] sm:$0xff]  ;;  %v2733_v46 = vld [vmem:[#allocation2 + $0x240] sm:$0xff] }
 0x5d7   : > { %v5039_v0 = vpop.eup %5038  ;;  %5050 = vtanh.f32 %v2593_v48  ;;  %2814 = vmatpush.msra.mxu0 %v5037_v16  ;;  %9203 = vst [vmem:[#allocation32_spill] sm:$0xff] %v7907_v17  ;;  %v2625_v62 = vadd.f32 %v9204_v22, %v7719_v15  ;;  %v2739_v22 = vld [vmem:[#allocation2 + $0x270] sm:$0xff] }
 0x5d8   : > { %v5041_v60 = vpop.eup %5040  ;;  %5052 = vtanh.f32 %v2658_v33  ;;  %2879 = vmatpush.msra.mxu1 %v5039_v0  ;;  %2782 = vperm.xlu1 %4455, %v9200_v40   ;;  %v9205_v33 = vld [vmem:[#allocation34_spill] sm:$0xff] }
 0x5d9   : > { %v5043_v9 = vpop.eup %5042  ;;  %5054 = vtanh.f32 %v2590_v63  ;;  %2815 = vmatpush.msra.mxu0 %v5041_v60  ;;  %v7912_v63 = vld [vmem:[#allocation2 + $0x208] sm:$0xff]  ;;  %v2557_v16 = vadd.f32 %v9205_v33, %v7717_v47  ;;  %v9206_v0 = vld [vmem:[#allocation10_spill] sm:$0xff] }
 0x5da   : > { %v5045_v28 = vpop.eup %5044  ;;  %5056 = vtanh.f32 %v2655_v10  ;;  %2880 = vmatpush.msra.mxu1 %v5043_v9  ;;  %v2731_v40 = vld [vmem:[#allocation2 + $0x230] sm:$0xff] }
 0x5db   : > { %v5047_v36 = vpop.eup %5046  ;;  %5058 = vtanh.f32 %v2587_v44  ;;  %2816 = vmatpush.msra.mxu0 %v5045_v28  ;;  %v2622_v44 = vadd.f32 %v9206_v0, %v7717_v47  ;;  %v9209_v47 = vld [vmem:[#allocation29_spill] sm:$0xff] }
 0x5dc   : > { %v5049_v27 = vpop.eup %5048  ;;  %5060 = vtanh.f32 %v2652_v38  ;;  %2881 = vmatpush.msra.mxu1 %v5047_v36  ;;  %2762 = vperm.xlu0 %4457, %v7907_v17   ;;  %v9207_v38 = vld [vmem:[#allocation36_spill] sm:$0xff]  ;;  %v2551_v36 = vadd.f32 %v9209_v47, %v7729_v12 }
 0x5dd   : > { %v5051_v11 = vpop.eup %5050  ;;  %5062 = vtanh.f32 %v2584_v53  ;;  %2817 = vmatpush.msra.mxu0 %v7799_v20  ;;  %v9198_v20 = vld [vmem:[#allocation15_spill] sm:$0xff]  ;;  %v2554_v15 = vadd.f32 %v9207_v38, %v7743_v45  ;;  %v9208_v53 = vld [vmem:[#allocation24_spill] sm:$0xff] }
 0x5de   : > { %v5053_v54 = vpop.eup %5052  ;;  %5064 = vtanh.f32 %v2649_v2  ;;  %2882 = vmatpush.msra.mxu1 %v5049_v27  ;;  %2935 = vmatpush.msra.mxu2 %v5051_v11  ;;  %v2619_v28 = vadd.f32 %v9208_v53, %v7743_v45  ;;  %v7932_v45 = vld [vmem:[%s8958_s2 + $0x30] sm:$0xff] }
 0x5df   : > { %v5055_v21 = vpop.eup %5054  ;;  %5066 = vtanh.f32 %v2581_v49  ;;  %3000 = vmatpush.msra.mxu3 %v5053_v54  ;;  %2818 = vmatpush.msra.mxu0 %v7768_v29  ;;  %v2637_v29 = vadd.f32 %v7705_v50, %v7711_v56  ;;  %v9197_v56 = vld [vmem:[#allocation21_spill] sm:$0xff]  ;;  %v9210_v49 = vld [vmem:[#allocation28_spill] sm:$0xff] }
 0x5e0   : > { %v5057_v5 = vpop.eup %5056  ;;  %5068 = vtanh.f32 %v2646_v8  ;;  %2883 = vmatpush.msra.mxu1 %v7795_v18  ;;  %2936 = vmatpush.msra.mxu2 %v5055_v21  ;;  %v2569_v18 = vadd.f32 %v7697_v24, %v7709_v55  ;;  %v9211_v8 = vld [vmem:[#allocation16_spill] sm:$0xff] }
 0x5e1   : > { %v5059_v23 = vpop.eup %5058  ;;  %5070 = vtanh.f32 %v2578_v26  ;;  %3001 = vmatpush.msra.mxu3 %v5057_v5  ;;  %2819 = vmatpush.msra.mxu0 %v7756_v7  ;;  %v2634_v7 = vadd.f32 %v7699_v39, %v7709_v55  ;;  %v9199_v55 = vld [vmem:[#allocation9_spill] sm:$0xff]  ;;  %v2616_v11 = vadd.f32 %v9211_v8, %v7729_v12  ;;  %v9212_v54 = vld [vmem:[#allocation12_spill] sm:$0xff]  ;;  %v9215_v5 = vld [vmem:[#allocation30_spill] sm:$0xff] }
 0x5e2   : > { %v5061_v51 = vpop.eup %5060  ;;  %5072 = vtanh.f32 %v2643_v31  ;;  %2884 = vmatpush.msra.mxu1 %v7765_v43  ;;  %2937 = vmatpush.msra.mxu2 %v5059_v23  ;;  %v2566_v43 = vadd.f32 %v9197_v56, %v7707_v41  ;;  %v9213_v31 = vld [vmem:[#allocation18_spill] sm:$0xff] }
 0x5e3   : > { %v5063_v14 = vpop.eup %5062  ;;  %5074 = vtanh.f32 %v2575_v4  ;;  %3002 = vmatpush.msra.mxu3 %v5061_v51  ;;  %2820 = vmatpush.msra.mxu0 %v7759_v19  ;;  %v2631_v19 = vadd.f32 %v9198_v20, %v7707_v41  ;;  %v7899_v41 = vld [vmem:[%s8958_s2 + $0x48] sm:$0xff]  ;;  %v2548_v21 = vadd.f32 %v9213_v31, %v9212_v54  ;;  %v7940_v4 = vld [vmem:[%s8958_s2 + $0x10] sm:$0xff] }
 0x5e4   : > { %v5065_v57 = vpop.eup %5064  ;;  %5076 = vtanh.f32 %v2640_v37  ;;  %2885 = vmatpush.msra.mxu1 %v7762_v1  ;;  %2938 = vmatpush.msra.mxu2 %v5063_v14  ;;  %v2563_v1 = vadd.f32 %v9199_v55, %v7721_v6  ;;  %9214 = vst [vmem:[#allocation23_spill] sm:$0xff] %v7940_v4  ;;  %v2613_v37 = vadd.f32 %v9215_v5, %v9212_v54  ;;  %v2727_v23 = vld [vmem:[#allocation2 + $0x210] sm:$0xff]  ;;  %v7968_v55 = vld [vmem:[%s8958_s2] sm:$0xff] }
 0x5e5   : > { %v5067_v50 = vpop.eup %5066  ;;  %5078 = vtanh.f32 %v2572_v61  ;;  %3003 = vmatpush.msra.mxu3 %v5065_v57  ;;  %2821 = vmatmul.f32.vlgmr.msra.gmra.mxu0 %v7877_v52  ;;  %v7948_v57 = vld [vmem:[%s8958_s2 + $0x20] sm:$0xff]  ;;  %9219 = vst [vmem:[#allocation14_spill] sm:$0xff] %v7968_v55 }
 0x5e6   : > { %v5069_v24 = vpop.eup %5068  ;;  %5080 = vtanh.f32 %v2637_v29  ;;  %2886 = vmatmul.f32.vlgmr.msra.gmra.mxu1 %v7877_v52  ;;  %2939 = vmatpush.msra.mxu2 %v5067_v50  ;;  %9216 = vst [vmem:[#allocation27_spill] sm:$0xff] %v7948_v57  ;;  %v7954_v50 = vld [vmem:[%s8958_s2 + $0x18] sm:$0xff] }
 0x5e7   : > { %v5071_v39 = vpop.eup %5070  ;;  %5082 = vtanh.f32 %v2569_v18  ;;  %3004 = vmatpush.msra.mxu3 %v5069_v24  ;;  %2778 = vperm.xlu2 %4456, %v7899_v41   ;;  %9217 = vst [vmem:[#allocation31_spill] sm:$0xff] %v7954_v50  ;;  %v2728_v24 = vld [vmem:[#allocation2 + $0x218] sm:$0xff] }
 0x5e8   : > { %v5073_v32 = vpop.eup %5072  ;;  %5084 = vtanh.f32 %v2634_v7  ;;  %2940 = vmatpush.msra.mxu2 %v5071_v39  ;;  %2770 = vperm.xlu1 %4455, %v9210_v49   ;;  %v7962_v39 = vld [vmem:[%s8958_s2 + $0x8] sm:$0xff] }
 0x5e9   : > { %v5075_v13 = vpop.eup %5074  ;;  %5086 = vtanh.f32 %v2566_v43  ;;  %3005 = vmatpush.msra.mxu3 %v5073_v32  ;;  %2750 = vperm.xlu0 %4457, %v7940_v4   ;;  %9218 = vst [vmem:[#allocation11_spill] sm:$0xff] %v7962_v39  ;;  %v2732_v32 = vld [vmem:[#allocation2 + $0x238] sm:$0xff] }
 0x5ea   : > { %v5077_v6 = vpop.eup %5076  ;;  %5088 = vtanh.f32 %v2631_v19  ;;  %2941 = vmatpush.msra.mxu2 %v5075_v13  ;;  %v2735_v13 = vld [vmem:[#allocation2 + $0x250] sm:$0xff] }
 0x5eb   : > { %v5079_v48 = vpop.eup %5078  ;;  %5090 = vtanh.f32 %v2563_v1  ;;  %3006 = vmatpush.msra.mxu3 %v5077_v6  ;;  %v2729_v1 = vld [vmem:[#allocation2 + $0x220] sm:$0xff]  ;;  %v2738_v6 = vld [vmem:[#allocation2 + $0x268] sm:$0xff] }
 0x5ec   : > { %v5081_v10 = vpop.eup %5080  ;;  %5092 = vtanh.f32 %v2628_v59  ;;  %2942 = vmatpush.msra.mxu2 %v5079_v48  ;;  %v2734_v59 = vld [vmem:[#allocation2 + $0x248] sm:$0xff] }
 0x5ed   : > { %v5083_v60 = vpop.eup %5082  ;;  %5094 = vtanh.f32 %v2560_v35  ;;  %3007 = vmatpush.msra.mxu3 %v5081_v10  ;;  %2824 = vmatmul.f32.gmra.mxu0 %v7912_v63  ;;  %v2737_v35 = vld [vmem:[#allocation2 + $0x260] sm:$0xff] }
 0x5ee   : > { %v5085_v9 = vpop.eup %5084  ;;  %5096 = vtanh.f32 %v2625_v62  ;;  %2889 = vmatmul.f32.gmra.mxu1 %v7912_v63  ;;  %2943 = vmatpush.msra.mxu2 %v5083_v60  ;;  %v2740_v62 = vld [vmem:[#allocation2 + $0x278] sm:$0xff] }
 0x5ef   : > { %v5087_v2 = vpop.eup %5086  ;;  %5098 = vtanh.f32 %v2557_v16  ;;  %3008 = vmatpush.msra.mxu3 %v5085_v9  ;;  %2766 = vperm.xlu2 %4456, %v7932_v45  }
 0x5f0   : > { %v5089_v27 = vpop.eup %5088  ;;  %5100 = vtanh.f32 %v2622_v44  ;;  %2944 = vmatpush.msra.mxu2 %v5087_v2  ;;  %2758 = vperm.xlu1 %4455, %v7948_v57  }
 0x5f1   : > { %v5091_v26 = vpop.eup %5090  ;;  %5102 = vtanh.f32 %v2554_v15  ;;  %3009 = vmatpush.msra.mxu3 %v5089_v27 }
 0x5f2   : > { %v5093_v12 = vpop.eup %5092  ;;  %5104 = vtanh.f32 %v2619_v28  ;;  %2945 = vmatpush.msra.mxu2 %v5091_v26 }
 0x5f3   : > { %v5095_v61 = vpop.eup %5094  ;;  %5106 = vtanh.f32 %v2551_v36  ;;  %3010 = vmatpush.msra.mxu3 %v5093_v12 }
 0x5f4   : > { %v5097_v51 = vpop.eup %5096  ;;  %5108 = vtanh.f32 %v2616_v11  ;;  %2946 = vmatpush.msra.mxu2 %v5095_v61 }
 0x5f5   : > { %v5099_v29 = vpop.eup %5098  ;;  %5110 = vtanh.f32 %v2548_v21  ;;  %3011 = vmatpush.msra.mxu3 %v5097_v51  ;;  %2827 = vmatmul.f32.gmra.mxu0 %v2727_v23 }
 0x5f6   : > { %v5101_v14 = vpop.eup %5100  ;;  %5112 = vtanh.f32 %v2613_v37  ;;  %2892 = vmatmul.f32.gmra.mxu1 %v2727_v23  ;;  %2947 = vmatpush.msra.mxu2 %v5099_v29 }
 0x5f7   : > { %v5103_v18 = vpop.eup %5102  ;;  %3012 = vmatpush.msra.mxu3 %v5101_v14  ;;  %2754 = vperm.xlu2 %4456, %v7954_v50  }
 0x5f8   : > { %v5105_v7 = vpop.eup %5104  ;;  %2948 = vmatpush.msra.mxu2 %v5103_v18  ;;  %2746 = vperm.xlu1 %4455, %v7962_v39  }
 0x5f9   : > { %v5107_v56 = vpop.eup %5106  ;;  %3013 = vmatpush.msra.mxu3 %v5105_v7 }
 0x5fa   : > { %v5109_v43 = vpop.eup %5108  ;;  %2949 = vmatpush.msra.mxu2 %v5107_v56 }
 0x5fb   : > { %v5111_v20 = vpop.eup %5110  ;;  %3014 = vmatpush.msra.mxu3 %v5109_v43 }
 0x5fc   : > { %v5113_v19 = vpop.eup %5112  ;;  %2950 = vmatpush.msra.mxu2 %v5111_v20 }
 0x5fd   : > { %3015 = vmatpush.msra.mxu3 %v5113_v19  ;;  %2830 = vmatmul.f32.gmra.mxu0 %v2728_v24 }
 0x5fe   : > { %2895 = vmatmul.f32.gmra.mxu1 %v2728_v24  ;;  %2951 = vmatmul.f32.vlgmr.msra.gmra.mxu2 %v7877_v52 }
 0x5ff   : > { %3016 = vmatmul.f32.vlgmr.msra.gmra.mxu3 %v7877_v52  ;;  %2742 = vperm.xlu2 %4456, %v7968_v55   ;;  %v2730_v52 = vld [vmem:[#allocation2 + $0x228] sm:$0xff] }
 0x605   : > { %2833 = vmatmul.f32.gmra.mxu0 %v2729_v1 }
 0x606   : > { %2898 = vmatmul.f32.gmra.mxu1 %v2729_v1  ;;  %2954 = vmatmul.f32.gmra.mxu2 %v7912_v63 }
 0x607   : > { %3019 = vmatmul.f32.gmra.mxu3 %v7912_v63 }
 0x60d   : > { %2836 = vmatmul.f32.gmra.mxu0 %v2730_v52 }
 0x60e   : > { %2901 = vmatmul.f32.gmra.mxu1 %v2730_v52  ;;  %2957 = vmatmul.f32.gmra.mxu2 %v2727_v23 }
 0x60f   : > { %3022 = vmatmul.f32.gmra.mxu3 %v2727_v23 }
 0x615   : > { %2839 = vmatmul.f32.gmra.mxu0 %v2731_v40 }
 0x616   : > { %2904 = vmatmul.f32.gmra.mxu1 %v2731_v40  ;;  %2960 = vmatmul.f32.gmra.mxu2 %v2728_v24 }
 0x617   : > { %3025 = vmatmul.f32.gmra.mxu3 %v2728_v24 }
 0x61d   : > { %2842 = vmatmul.f32.gmra.mxu0 %v2732_v32 }
 0x61e   : > { %2907 = vmatmul.f32.gmra.mxu1 %v2732_v32  ;;  %2963 = vmatmul.f32.gmra.mxu2 %v2729_v1 }
 0x61f   : > { %3028 = vmatmul.f32.gmra.mxu3 %v2729_v1 }
 0x625   : > { %2845 = vmatmul.f32.gmra.mxu0 %v2733_v46  ;;  %v8037_v18 = vpop.permute.xlu2 %2798 }
 0x626   : > { %2910 = vmatmul.f32.gmra.mxu1 %v2733_v46  ;;  %2966 = vmatmul.f32.gmra.mxu2 %v2730_v52 }
 0x627   : > { %3031 = vmatmul.f32.gmra.mxu3 %v2730_v52 }
 0x62d   : > { %2848 = vmatmul.f32.gmra.mxu0 %v2734_v59  ;;  %v8043_v20 = vpop.permute.xlu2 %2786 }
 0x62e   : > { %2913 = vmatmul.f32.gmra.mxu1 %v2734_v59  ;;  %2969 = vmatmul.f32.gmra.mxu2 %v2731_v40 }
 0x62f   : > { %3034 = vmatmul.f32.gmra.mxu3 %v2731_v40 }
 0x635   : > { %2851 = vmatmul.f32.gmra.mxu0 %v2735_v13 }
 0x636   : > { %2916 = vmatmul.f32.gmra.mxu1 %v2735_v13  ;;  %2972 = vmatmul.f32.gmra.mxu2 %v2732_v32 }
 0x637   : > { %3037 = vmatmul.f32.gmra.mxu3 %v2732_v32 }
 0x63d   : > { %2854 = vmatmul.f32.gmra.mxu0 %v2736_v3 }
 0x63e   : > { %2919 = vmatmul.f32.gmra.mxu1 %v2736_v3  ;;  %2975 = vmatmul.f32.gmra.mxu2 %v2733_v46  ;;  %v8069_v4 = vpop.permute.xlu0 %2794 }
 0x63f   : > { %3040 = vmatmul.f32.gmra.mxu3 %v2733_v46 }
 0x641   : > { %v8049_v32 = vpop.permute.xlu2 %2778 }
 0x645   : > { %2857 = vmatmul.f32.gmra.mxu0 %v2737_v35 }
 0x646   : > { %2922 = vmatmul.f32.gmra.mxu1 %v2737_v35  ;;  %2978 = vmatmul.f32.gmra.mxu2 %v2734_v59 }
 0x647   : > { %3043 = vmatmul.f32.gmra.mxu3 %v2734_v59 }
 0x64d   : > { %2860 = vmatmul.f32.gmra.mxu0 %v2738_v6 }
 0x64e   : > { %2925 = vmatmul.f32.gmra.mxu1 %v2738_v6  ;;  %2981 = vmatmul.f32.gmra.mxu2 %v2735_v13 }
 0x64f   : > { %3046 = vmatmul.f32.gmra.mxu3 %v2735_v13 }
 0x655   : > { %2863 = vmatmul.f32.gmra.mxu0 %v2739_v22 }
 0x656   : > { %2928 = vmatmul.f32.gmra.mxu1 %v2739_v22  ;;  %2984 = vmatmul.f32.gmra.mxu2 %v2736_v3 }
 0x657   : > { %3049 = vmatmul.f32.gmra.mxu3 %v2736_v3  ;;  %v8055_v3 = vpop.permute.xlu1 %2802 }
 0x65d   : > { %2866 = vmatmul.f32.gmra.mxu0 %v2740_v62 }
 0x65e   : > { %2931 = vmatmul.f32.gmra.mxu1 %v2740_v62  ;;  %2987 = vmatmul.f32.gmra.mxu2 %v2737_v35 }
 0x65f   : > { %3052 = vmatmul.f32.gmra.mxu3 %v2737_v35 }
 0x662   : > { %v7973_v63 = vpop.f32.mrf.mxu0 }
 0x663   : > { %v7975_v48 = vpop.f32.mrf.mxu1 }
 0x666   : > { %2990 = vmatmul.f32.gmra.mxu2 %v2738_v6 }
 0x667   : > { %3055 = vmatmul.f32.gmra.mxu3 %v2738_v6 }
 0x66a   : > { %v7977_v33 = vpop.f32.mrf.mxu0 }
 0x66b   : > { %v7979_v16 = vpop.f32.mrf.mxu1 }
 0x66e   : > { %2993 = vmatmul.f32.gmra.mxu2 %v2739_v22 }
 0x66f   : > { %3058 = vmatmul.f32.gmra.mxu3 %v2739_v22 }
 0x672   : > { %v7981_v10 = vpop.f32.mrf.mxu0 }
 0x673   : > { %v7983_v0 = vpop.f32.mrf.mxu1 }
 0x676   : > { %2996 = vmatmul.f32.gmra.mxu2 %v2740_v62 }
 0x677   : > { %3061 = vmatmul.f32.gmra.mxu3 %v2740_v62 }
 0x67a   : > { %v7985_v44 = vpop.f32.mrf.mxu0 }
 0x67b   : > { %v7987_v60 = vpop.f32.mrf.mxu1 }
 0x681   : > { %v7989_v38 = vpop.f32.mrf.mxu2 }
 0x682   : > { %9220 = vst [vmem:[#allocation22_spill] sm:$0xff] %v7989_v38  ;;  %v7991_v15 = vpop.f32.mrf.mxu3  ;;  %v7993_v9 = vpop.f32.mrf.mxu0 }
 0x683   : > { %9221 = vst [vmem:[#allocation26_spill] sm:$0xff] %v7991_v15  ;;  %v7995_v53 = vpop.f32.mrf.mxu1  ;;  %v8061_v15 = vpop.permute.xlu2 %2766 }
 0x684   : > { %v8063_v38 = vpop.permute.xlu1 %2790 }
 0x689   : > { %v7997_v28 = vpop.f32.mrf.mxu2 }
 0x68a   : > { %9222 = vst [vmem:[#allocation19_spill] sm:$0xff] %v7997_v28  ;;  %v7999_v2 = vpop.f32.mrf.mxu3  ;;  %v8001_v47 = vpop.f32.mrf.mxu0 }
 0x68b   : > { %9223 = vst [vmem:[#allocation25_spill] sm:$0xff] %v7999_v2  ;;  %v8003_v36 = vpop.f32.mrf.mxu1 }
 0x691   : > { %v8005_v49 = vpop.f32.mrf.mxu2 }
 0x692   : > { %9224 = vst [vmem:[#allocation20_spill] sm:$0xff] %v8005_v49  ;;  %v8007_v27 = vpop.f32.mrf.mxu3  ;;  %v8009_v8 = vpop.f32.mrf.mxu0 }
 0x693   : > { %9225 = vst [vmem:[#allocation13_spill] sm:$0xff] %v8007_v27  ;;  %v8011_v11 = vpop.f32.mrf.mxu1 }
 0x699   : > { %v8013_v26 = vpop.f32.mrf.mxu2 }
 0x69a   : > { %9226 = vst [vmem:[#allocation21_spill] sm:$0xff] %v8013_v26  ;;  %v8015_v54 = vpop.f32.mrf.mxu3  ;;  %v8017_v31 = vpop.f32.mrf.mxu0 }
 0x69b   : > { %9227 = vst [vmem:[#allocation15_spill] sm:$0xff] %v8015_v54  ;;  %v8019_v21 = vpop.f32.mrf.mxu1  ;;  %v8071_v54 = vpop.permute.xlu2 %2754 }
 0x69c   : > { %v8073_v26 = vpop.permute.xlu1 %2782 }
 0x6a1   : > { %v8021_v12 = vpop.f32.mrf.mxu2 }
 0x6a2   : > { %9228 = vst [vmem:[#allocation9_spill] sm:$0xff] %v8021_v12  ;;  %v8023_v5 = vpop.f32.mrf.mxu3  ;;  %v8025_v37 = vpop.f32.mrf.mxu0 }
 0x6a3   : > { %9229 = vst [vmem:[#allocation17_spill] sm:$0xff] %v8023_v5  ;;  %v8027_v23 = vpop.f32.mrf.mxu1  ;;  %v8089_v57 = vpop.permute.xlu2 %2742 }
 0x6a9   : > { %v8029_v61 = vpop.f32.mrf.mxu2 }
 0x6aa   : > { %9230 = vst [vmem:[#allocation33_spill] sm:$0xff] %v8029_v61  ;;  %v8031_v51 = vpop.f32.mrf.mxu3  ;;  %v8033_v29 = vpop.f32.mrf.mxu0 }
 0x6ab   : > { %9231 = vst [vmem:[#allocation8_spill] sm:$0xff] %v8031_v51  ;;  %v8035_v14 = vpop.f32.mrf.mxu1 }
 0x6b1   : > { %v8039_v7 = vpop.f32.mrf.mxu2 }
 0x6b2   : > { %9232 = vst [vmem:[#allocation35_spill] sm:$0xff] %v8039_v7  ;;  %v8041_v56 = vpop.f32.mrf.mxu3  ;;  %v2852_v43 = vpop.f32.mrf.mxu0 }
 0x6b3   : > { %9233 = vst [vmem:[#allocation34_spill] sm:$0xff] %v8041_v56  ;;  %v2917_v24 = vpop.f32.mrf.mxu1 }
 0x6b9   : > { %v8045_v19 = vpop.f32.mrf.mxu2 }
 0x6ba   : > { %9234 = vst [vmem:[#allocation10_spill] sm:$0xff] %v8045_v19  ;;  %v8047_v1 = vpop.f32.mrf.mxu3  ;;  %v2855_v52 = vpop.f32.mrf.mxu0 }
 0x6bb   : > { %9235 = vst [vmem:[#allocation36_spill] sm:$0xff] %v8047_v1  ;;  %v2920_v40 = vpop.f32.mrf.mxu1 }
 0x6c1   : > { %v8051_v46 = vpop.f32.mrf.mxu2 }
 0x6c2   : > { %v8053_v59 = vpop.f32.mrf.mxu3  ;;  %v2858_v13 = vpop.f32.mrf.mxu0 }
 0x6c3   : > { %v2923_v35 = vpop.f32.mrf.mxu1 }
 0x6c4   : > { %v2924_v19 = vadd.f32 %v2923_v35, %v8063_v38 }
 0x6c9   : > { %v8057_v6 = vpop.f32.mrf.mxu2 }
 0x6ca   : > { %v8059_v22 = vpop.f32.mrf.mxu3  ;;  %v2861_v62 = vpop.f32.mrf.mxu0 }
 0x6cb   : > { %v2926_v55 = vpop.f32.mrf.mxu1  ;;  %v2862_v7 = vadd.f32 %v2861_v62, %v8069_v4  ;;  %v8092_v62 = vpop.permute.xlu1 %2770 }
 0x6cc   : > { %v2927_v1 = vadd.f32 %v2926_v55, %v8069_v4 }
 0x6d1   : > { %v8065_v2 = vpop.f32.mrf.mxu2 }
 0x6d2   : > { %v8067_v28 = vpop.f32.mrf.mxu3  ;;  %v2864_v27 = vpop.f32.mrf.mxu0 }
 0x6d3   : > { %v2929_v49 = vpop.f32.mrf.mxu1  ;;  %v2865_v39 = vadd.f32 %v2864_v27, %v8037_v18  ;;  %v2859_v27 = vadd.f32 %v2858_v13, %v8063_v38  ;;  %v2888_v13 = vadd.f32 %v7975_v48, %v8089_v57  ;;  %v2915_v48 = vadd.f32 %v8035_v14, %v8049_v32 }
 0x6d4   : > { %v2930_v50 = vadd.f32 %v2929_v49, %v8037_v18  ;;  %v8086_v49 = vpop.permute.xlu0 %2774  ;;  %v2844_v14 = vadd.f32 %v8017_v31, %v8092_v62 }
 0x6d5   : > { %5114 = vtanh.f32 %v2865_v39  ;;  %v2921_v39 = vadd.f32 %v2920_v40, %v8043_v20 }
 0x6d6   : > { %5116 = vtanh.f32 %v2930_v50 }
 0x6d9   : > { %v8077_v5 = vpop.f32.mrf.mxu2 }
 0x6da   : > { %v8079_v12 = vpop.f32.mrf.mxu3  ;;  %v2867_v51 = vpop.f32.mrf.mxu0 }
 0x6db   : > { %v2868_v61 = vadd.f32 %v2867_v51, %v8055_v3  ;;  %v2932_v56 = vpop.f32.mrf.mxu1  ;;  %v2856_v51 = vadd.f32 %v2855_v52, %v8043_v20  ;;  %v5115_v50 = vpop.eup %5114  ;;  %v2853_v52 = vadd.f32 %v2852_v43, %v8073_v26  ;;  %v2847_v43 = vadd.f32 %v8025_v37, %v8086_v49 }
 0x6dc   : > { %v2933_v17 = vadd.f32 %v2932_v56, %v8055_v3 }
 0x6dd   : > { %5118 = vtanh.f32 %v2868_v61  ;;  %v2823_v61 = vadd.f32 %v7973_v63, %v8089_v57  ;;  %v2850_v63 = vadd.f32 %v8033_v29, %v8049_v32 }
 0x6de   : > { %5120 = vtanh.f32 %v2933_v17  ;;  %v5117_v17 = vpop.eup %5116 }
 0x6df   : > { %5122 = vtanh.f32 %v2862_v7 }
 0x6e0   : > { %5124 = vtanh.f32 %v2927_v1  ;;  %v2918_v1 = vadd.f32 %v2917_v24, %v8073_v26 }
 0x6e1   : > { %v8095_v55 = vpop.f32.mrf.mxu2  ;;  %5126 = vtanh.f32 %v2859_v27 }
 0x6e2   : > { %v8099_v56 = vpop.f32.mrf.mxu3  ;;  %5128 = vtanh.f32 %v2924_v19 }
 0x6e3   : > { %v5119_v7 = vpop.eup %5118  ;;  %5130 = vtanh.f32 %v2856_v51  ;;  %v8111_v51 = vpop.permute.xlu0 %2762 }
 0x6e4   : > { %v5121_v40 = vpop.eup %5120  ;;  %5132 = vtanh.f32 %v2921_v39  ;;  %3210 = vmatpush.msrb.mxu0 %v5119_v7  ;;  %v2912_v39 = vadd.f32 %v8027_v23, %v8086_v49  ;;  %v5671_v23 = vmov 6  }
 0x6e5   : > { %v5123_v35 = vpop.eup %5122  ;;  %5134 = vtanh.f32 %v2823_v61  ;;  %3275 = vmatpush.msrb.mxu1 %v5121_v40  ;;  %4459 = vset.pattern.permute.xlu1 %v5671_v23  ;;  %v2906_v40 = vadd.f32 %v8011_v11, %v8061_v15 }
 0x6e6   : > { %v5125_v27 = vpop.eup %5124  ;;  %5136 = vtanh.f32 %v2888_v13  ;;  %3211 = vmatpush.msrb.mxu0 %v5115_v50  ;;  %v2909_v13 = vadd.f32 %v8019_v21, %v8092_v62  ;;  %3203 = vperm.xlu1 %4459, %v7820_v34   ;;  %v2903_v34 = vadd.f32 %v8003_v36, %v8111_v51  ;;  %v2832_v36 = vadd.f32 %v7985_v44, %v8071_v54 }
 0x6e7   : > { %v5127_v19 = vpop.eup %5126  ;;  %5138 = vtanh.f32 %v2853_v52  ;;  %3276 = vmatpush.msrb.mxu1 %v5117_v17  ;;  %v8121_v17 = vpop.permute.xlu1 %2758  ;;  %v2841_v52 = vadd.f32 %v8009_v8, %v8061_v15  ;;  %4458 = vset.pattern.permute.xlu0 %v5671_v23 }
 0x6e8   : > { %v5129_v24 = vpop.eup %5128  ;;  %5140 = vtanh.f32 %v2918_v1  ;;  %3212 = vmatpush.msrb.mxu0 %v5123_v35  ;;  %v2838_v1 = vadd.f32 %v8001_v47, %v8111_v51  ;;  %3207 = vperm.xlu0 %4458, %v7810_v25   ;;  %v2835_v11 = vadd.f32 %v7993_v9, %v8121_v17  ;;  %v2897_v9 = vadd.f32 %v7987_v60, %v8071_v54 }
 0x6e9   : > { %v8115_v29 = vpop.f32.mrf.mxu2  ;;  %v5131_v61 = vpop.eup %5130  ;;  %5142 = vtanh.f32 %v2850_v63  ;;  %3277 = vmatpush.msrb.mxu1 %v5125_v27  ;;  %4460 = vset.pattern.permute.xlu2 %v5671_v23  ;;  %v2900_v63 = vadd.f32 %v7995_v53, %v8121_v17 }
 0x6ea   : > { %v8119_v50 = vpop.f32.mrf.mxu3  ;;  %v5133_v37 = vpop.eup %5132  ;;  %5144 = vtanh.f32 %v2915_v48  ;;  %3213 = vmatpush.msrb.mxu0 %v5127_v19  ;;  %3199 = vperm.xlu2 %4460, %v7828_v42  }
 0x6eb   : > { %v8125_v7 = vpop.eup %5134  ;;  %5146 = vtanh.f32 %v2847_v43  ;;  %3278 = vmatpush.msrb.mxu1 %v5129_v24  ;;  %v8148_v42 = vpop.permute.xlu0 %2750 }
 0x6ec   : > { %v8130_v31 = vpop.eup %5136  ;;  %5148 = vtanh.f32 %v2912_v39  ;;  %3214 = vmatpush.msrb.mxu0 %v5131_v61  ;;  %v2829_v53 = vadd.f32 %v7981_v10, %v8148_v42  ;;  %v2894_v39 = vadd.f32 %v7983_v0, %v8148_v42  ;;  %v8162_v10 = vld [vmem:[%s8958_s2 + $0x50] sm:$0xff] }
 0x6ed   : > { %v5139_v21 = vpop.eup %5138  ;;  %5150 = vtanh.f32 %v2844_v14  ;;  %3279 = vmatpush.msrb.mxu1 %v5133_v37 }
 0x6ee   : > { %v5141_v8 = vpop.eup %5140  ;;  %5152 = vtanh.f32 %v2909_v13  ;;  %3215 = vmatpush.msrb.mxu0 %v5139_v21  ;;  %3195 = vperm.xlu1 %4459, %v7840_v30  }
 0x6ef   : > { %v5143_v35 = vpop.eup %5142  ;;  %5154 = vtanh.f32 %v2841_v52  ;;  %3280 = vmatpush.msrb.mxu1 %v5141_v8  ;;  %v8153_v24 = vpop.permute.xlu1 %2746  ;;  %v2992_v8 = vadd.f32 %v8115_v29, %v8069_v4  ;;  %v3054_v29 = vadd.f32 %v8099_v56, %v8063_v38  ;;  %v2983_v56 = vadd.f32 %v8065_v2, %v8073_v26 }
 0x6f0   : > { %v5145_v47 = vpop.eup %5144  ;;  %5156 = vtanh.f32 %v2906_v40  ;;  %3216 = vmatpush.msrb.mxu0 %v5143_v35  ;;  %v2826_v61 = vadd.f32 %v7977_v33, %v8153_v24  ;;  %3187 = vperm.xlu0 %4458, %v8162_v10   ;;  %v2891_v14 = vadd.f32 %v7979_v16, %v8153_v24  ;;  %v3057_v35 = vadd.f32 %v8119_v50, %v8069_v4 }
 0x6f1   : > { %v2994_v25 = vpop.f32.mrf.mxu2  ;;  %v5147_v27 = vpop.eup %5146  ;;  %5158 = vtanh.f32 %v2838_v1  ;;  %3281 = vmatpush.msrb.mxu1 %v5145_v47  ;;  %v2986_v50 = vadd.f32 %v8077_v5, %v8043_v20  ;;  %v8199_v5 = vld [vmem:[#allocation2 + $0x280] sm:$0xff] }
 0x6f2   : > { %v3059_v48 = vpop.f32.mrf.mxu3  ;;  %v5149_v19 = vpop.eup %5148  ;;  %5160 = vtanh.f32 %v2903_v34  ;;  %3217 = vmatpush.msrb.mxu0 %v5147_v27  ;;  %3191 = vperm.xlu2 %4460, %v7850_v58   ;;  %v2995_v23 = vadd.f32 %v2994_v25, %v8037_v18  ;;  %v3048_v27 = vadd.f32 %v8067_v28, %v8073_v26  ;;  %v2977_v26 = vadd.f32 %v8051_v46, %v8086_v49 }
 0x6f3   : > { %v5151_v43 = vpop.eup %5150  ;;  %5162 = vtanh.f32 %v2835_v11  ;;  %3282 = vmatpush.msrb.mxu1 %v5149_v19  ;;  %v3060_v16 = vadd.f32 %v3059_v48, %v8037_v18  ;;  %v2989_v18 = vadd.f32 %v8095_v55, %v8063_v38  ;;  %v8192_v55 = vld [vmem:[%s8958_s2 + $0x40] sm:$0xff] }
 0x6f4   : > { %v5153_v44 = vpop.eup %5152  ;;  %5164 = vtanh.f32 %v2900_v63  ;;  %3218 = vmatpush.msrb.mxu0 %v5151_v43  ;;  %v3051_v63 = vadd.f32 %v8079_v12, %v8043_v20  ;;  %v2980_v12 = vadd.f32 %v8057_v6, %v8049_v32  ;;  %v3045_v20 = vadd.f32 %v8059_v22, %v8049_v32  ;;  %v9236_v32 = vld [vmem:[#allocation27_spill] sm:$0xff]  ;;  %v9238_v19 = vld [vmem:[#allocation36_spill] sm:$0xff] }
 0x6f5   : > { %v5155_v60 = vpop.eup %5154  ;;  %5166 = vtanh.f32 %v2832_v36  ;;  %3283 = vmatpush.msrb.mxu1 %v5153_v44  ;;  %v9239_v43 = vld [vmem:[#allocation32_spill] sm:$0xff] }
 0x6f6   : > { %v5157_v30 = vpop.eup %5156  ;;  %5168 = vtanh.f32 %v2897_v9  ;;  %3219 = vmatpush.msrb.mxu0 %v5155_v60  ;;  %3183 = vperm.xlu1 %4459, %v7899_v41   ;;  %v3039_v9 = vadd.f32 %v9238_v19, %v8092_v62 }
 0x6f7   : > { %v5159_v0 = vpop.eup %5158  ;;  %5170 = vtanh.f32 %v2829_v53  ;;  %3284 = vmatpush.msrb.mxu1 %v5157_v30  ;;  %v8224_v53 = vld [vmem:[#allocation2 + $0x288] sm:$0xff] }
 0x6f8   : > { %v5161_v33 = vpop.eup %5160  ;;  %5172 = vtanh.f32 %v2894_v39  ;;  %3220 = vmatpush.msrb.mxu0 %v5159_v0  ;;  %v9241_v39 = vld [vmem:[#allocation34_spill] sm:$0xff]  ;;  %v9243_v0 = vld [vmem:[#allocation8_spill] sm:$0xff] }
 0x6f9   : > { %v2997_v37 = vpop.f32.mrf.mxu2  ;;  %v5163_v13 = vpop.eup %5162  ;;  %5174 = vtanh.f32 %v2826_v61  ;;  %3285 = vmatpush.msrb.mxu1 %v5161_v33  ;;  %v3036_v60 = vadd.f32 %v9241_v39, %v8061_v15  ;;  %v3033_v33 = vadd.f32 %v9243_v0, %v8111_v51  ;;  %v3141_v39 = vld [vmem:[#allocation2 + $0x2d8] sm:$0xff] }
 0x6fa   : > { %v2998_v52 = vadd.f32 %v2997_v37, %v8055_v3  ;;  %v3062_v40 = vpop.f32.mrf.mxu3  ;;  %v5165_v21 = vpop.eup %5164  ;;  %5176 = vtanh.f32 %v2891_v14  ;;  %3221 = vmatpush.msrb.mxu0 %v5163_v13  ;;  %3179 = vperm.xlu2 %4460, %v8192_v55  }
 0x6fb   : > { %v3063_v1 = vadd.f32 %v3062_v40, %v8055_v3  ;;  %v5167_v58 = vpop.eup %5166  ;;  %3286 = vmatpush.msrb.mxu1 %v5165_v21  ;;  %v8182_v3 = vld [vmem:[%s8958_s2 + $0x38] sm:$0xff] }
 0x6fc   : > { %5178 = vtanh.f32 %v2998_v52  ;;  %v5169_v34 = vpop.eup %5168  ;;  %3222 = vmatpush.msrb.mxu0 %v5167_v58  ;;  %3175 = vperm.xlu0 %4458, %v8182_v3   ;;  %v9245_v52 = vld [vmem:[#allocation17_spill] sm:$0xff]  ;;  %v9246_v21 = vld [vmem:[#allocation31_spill] sm:$0xff] }
 0x6fd   : > { %5180 = vtanh.f32 %v3063_v1  ;;  %v5171_v11 = vpop.eup %5170  ;;  %3287 = vmatpush.msrb.mxu1 %v5169_v34  ;;  %v3030_v40 = vadd.f32 %v9245_v52, %v8121_v17  ;;  %v9248_v1 = vld [vmem:[#allocation21_spill] sm:$0xff]  ;;  %v9249_v34 = vld [vmem:[#allocation15_spill] sm:$0xff] }
 0x6fe   : > { %5182 = vtanh.f32 %v2995_v23  ;;  %v5173_v41 = vpop.eup %5172  ;;  %3223 = vmatpush.msrb.mxu0 %v5171_v11  ;;  %3171 = vperm.xlu1 %4459, %v7932_v45   ;;  %v2962_v58 = vadd.f32 %v9248_v1, %v8071_v54  ;;  %v9250_v11 = vld [vmem:[#allocation23_spill] sm:$0xff] }
 0x6ff   : > { %5184 = vtanh.f32 %v3060_v16  ;;  %v5175_v4 = vpop.eup %5174  ;;  %3288 = vmatpush.msrb.mxu1 %v5173_v41 }
 0x700   : > { %5186 = vtanh.f32 %v2992_v8  ;;  %v5177_v47 = vpop.eup %5176  ;;  %3224 = vmatpush.msrb.mxu0 %v5175_v4 }
 0x701   : > { %5188 = vtanh.f32 %v3057_v35  ;;  %3289 = vmatpush.msrb.mxu1 %v5177_v47  ;;  %v3027_v35 = vadd.f32 %v9249_v34, %v8071_v54  ;;  %v9253_v54 = vld [vmem:[#allocation19_spill] sm:$0xff] }
 0x702   : > { %v5179_v38 = vpop.eup %5178  ;;  %5190 = vtanh.f32 %v2989_v18  ;;  %3225 = vmatpush.msrb.mxu0 %v8125_v7  ;;  %v3042_v7 = vadd.f32 %v8053_v59, %v8086_v49  ;;  %3167 = vperm.xlu2 %4460, %v9239_v43   ;;  %v9240_v49 = vld [vmem:[#allocation35_spill] sm:$0xff]  ;;  %v9251_v18 = vld [vmem:[#allocation20_spill] sm:$0xff] }
 0x703   : > { %v5181_v25 = vpop.eup %5180  ;;  %5192 = vtanh.f32 %v3054_v29  ;;  %3340 = vmatpush.msrb.mxu2 %v5179_v38  ;;  %3290 = vmatpush.msrb.mxu1 %v8130_v31  ;;  %v9237_v31 = vld [vmem:[#allocation10_spill] sm:$0xff]  ;;  %v2971_v45 = vadd.f32 %v9240_v49, %v8061_v15  ;;  %v9244_v15 = vld [vmem:[#allocation9_spill] sm:$0xff]  ;;  %v2959_v41 = vadd.f32 %v9251_v18, %v8148_v42  ;;  %v2956_v38 = vadd.f32 %v9253_v54, %v8153_v24  ;;  %v3134_v43 = vld [vmem:[#allocation2 + $0x2a0] sm:$0xff] }
 0x704   : > { %v5183_v36 = vpop.eup %5182  ;;  %5194 = vtanh.f32 %v2986_v50  ;;  %3405 = vmatpush.msrb.mxu3 %v5181_v25  ;;  %3226 = vmatmul.f32.vlgmr.msrb.gmra.mxu0 %v8199_v5  ;;  %v2974_v48 = vadd.f32 %v9237_v31, %v8092_v62  ;;  %v9242_v62 = vld [vmem:[#allocation33_spill] sm:$0xff]  ;;  %v2965_v13 = vadd.f32 %v9244_v15, %v8121_v17  ;;  %v8247_v29 = vld [vmem:[#allocation2 + $0x290] sm:$0xff] }
 0x705   : > { %v5185_v2 = vpop.eup %5184  ;;  %5196 = vtanh.f32 %v3051_v63  ;;  %3291 = vmatmul.f32.vlgmr.msrb.gmra.mxu1 %v8199_v5  ;;  %3341 = vmatpush.msrb.mxu2 %v5183_v36  ;;  %v2968_v30 = vadd.f32 %v9242_v62, %v8111_v51  ;;  %v9247_v51 = vld [vmem:[#allocation11_spill] sm:$0xff]  ;;  %v9252_v50 = vld [vmem:[#allocation13_spill] sm:$0xff]  ;;  %v3136_v49 = vld [vmem:[#allocation2 + $0x2b0] sm:$0xff] }
 0x706   : > { %v5187_v28 = vpop.eup %5186  ;;  %5198 = vtanh.f32 %v2983_v56  ;;  %3406 = vmatpush.msrb.mxu3 %v5185_v2  ;;  %3163 = vperm.xlu0 %4458, %v9236_v32   ;;  %v3024_v47 = vadd.f32 %v9252_v50, %v8148_v42  ;;  %v9254_v25 = vld [vmem:[#allocation25_spill] sm:$0xff]  ;;  %v9255_v42 = vld [vmem:[#allocation22_spill] sm:$0xff]  ;;  %v3133_v32 = vld [vmem:[#allocation2 + $0x298] sm:$0xff] }
 0x707   : > { %v5189_v6 = vpop.eup %5188  ;;  %5200 = vtanh.f32 %v3048_v27  ;;  %3342 = vmatpush.msrb.mxu2 %v5187_v28  ;;  %3159 = vperm.xlu1 %4459, %v9246_v21   ;;  %v3021_v27 = vadd.f32 %v9254_v25, %v8153_v24  ;;  %v3144_v62 = vld [vmem:[#allocation2 + $0x2f0] sm:$0xff] }
 0x708   : > { %v5191_v22 = vpop.eup %5190  ;;  %5202 = vtanh.f32 %v2980_v12  ;;  %3407 = vmatpush.msrb.mxu3 %v5189_v6  ;;  %v2953_v12 = vadd.f32 %v9255_v42, %v8089_v57 }
 0x709   : > { %v5193_v46 = vpop.eup %5192  ;;  %5204 = vtanh.f32 %v3045_v20  ;;  %3343 = vmatpush.msrb.mxu2 %v5191_v22  ;;  %v9256_v20 = vld [vmem:[#allocation26_spill] sm:$0xff] }
 0x70a   : > { %v5195_v59 = vpop.eup %5194  ;;  %5206 = vtanh.f32 %v2977_v26  ;;  %3408 = vmatpush.msrb.mxu3 %v5193_v46  ;;  %3155 = vperm.xlu2 %4460, %v9250_v11   ;;  %v3018_v28 = vadd.f32 %v9256_v20, %v8089_v57  ;;  %v9257_v26 = vld [vmem:[#allocation14_spill] sm:$0xff] }
 0x70b   : > { %v5197_v44 = vpop.eup %5196  ;;  %5208 = vtanh.f32 %v3042_v7  ;;  %3344 = vmatpush.msrb.mxu2 %v5195_v59  ;;  %v3135_v59 = vld [vmem:[#allocation2 + $0x2a8] sm:$0xff] }
 0x70c   : > { %v5199_v61 = vpop.eup %5198  ;;  %5210 = vtanh.f32 %v2974_v48  ;;  %3409 = vmatpush.msrb.mxu3 %v5197_v44  ;;  %3229 = vmatmul.f32.gmra.mxu0 %v8224_v53  ;;  %v3140_v44 = vld [vmem:[#allocation2 + $0x2d0] sm:$0xff] }
 0x70d   : > { %v5201_v14 = vpop.eup %5200  ;;  %5212 = vtanh.f32 %v3039_v9  ;;  %3294 = vmatmul.f32.gmra.mxu1 %v8224_v53  ;;  %3345 = vmatpush.msrb.mxu2 %v5199_v61  ;;  %v3143_v61 = vld [vmem:[#allocation2 + $0x2e8] sm:$0xff] }
 0x70e   : > { %v5203_v37 = vpop.eup %5202  ;;  %5214 = vtanh.f32 %v2971_v45  ;;  %3410 = vmatpush.msrb.mxu3 %v5201_v14  ;;  %3151 = vperm.xlu0 %4458, %v9247_v51   ;;  %v3137_v45 = vld [vmem:[#allocation2 + $0x2b8] sm:$0xff] }
 0x70f   : > { %v5205_v23 = vpop.eup %5204  ;;  %5216 = vtanh.f32 %v3036_v60  ;;  %3346 = vmatpush.msrb.mxu2 %v5203_v37  ;;  %3147 = vperm.xlu1 %4459, %v9257_v26   ;;  %v3142_v60 = vld [vmem:[#allocation2 + $0x2e0] sm:$0xff] }
 0x710   : > { %v5207_v16 = vpop.eup %5206  ;;  %5218 = vtanh.f32 %v2968_v30  ;;  %3411 = vmatpush.msrb.mxu3 %v5205_v23  ;;  %v3145_v30 = vld [vmem:[#allocation2 + $0x2f8] sm:$0xff] }
 0x711   : > { %v5209_v8 = vpop.eup %5208  ;;  %5220 = vtanh.f32 %v3033_v33  ;;  %3347 = vmatpush.msrb.mxu2 %v5207_v16 }
 0x712   : > { %v5211_v17 = vpop.eup %5210  ;;  %5222 = vtanh.f32 %v2965_v13  ;;  %3412 = vmatpush.msrb.mxu3 %v5209_v8 }
 0x713   : > { %v5213_v4 = vpop.eup %5212  ;;  %5224 = vtanh.f32 %v3030_v40  ;;  %3348 = vmatpush.msrb.mxu2 %v5211_v17 }
 0x714   : > { %v5215_v63 = vpop.eup %5214  ;;  %5226 = vtanh.f32 %v2962_v58  ;;  %3413 = vmatpush.msrb.mxu3 %v5213_v4  ;;  %3232 = vmatmul.f32.gmra.mxu0 %v8247_v29 }
 0x715   : > { %v5217_v56 = vpop.eup %5216  ;;  %5228 = vtanh.f32 %v3027_v35  ;;  %3297 = vmatmul.f32.gmra.mxu1 %v8247_v29  ;;  %3349 = vmatpush.msrb.mxu2 %v5215_v63 }
 0x716   : > { %v5219_v36 = vpop.eup %5218  ;;  %5230 = vtanh.f32 %v2959_v41  ;;  %3414 = vmatpush.msrb.mxu3 %v5217_v56 }
 0x717   : > { %v5221_v2 = vpop.eup %5220  ;;  %5232 = vtanh.f32 %v3024_v47  ;;  %3350 = vmatpush.msrb.mxu2 %v5219_v36 }
 0x718   : > { %v5223_v24 = vpop.eup %5222  ;;  %5234 = vtanh.f32 %v2956_v38  ;;  %3415 = vmatpush.msrb.mxu3 %v5221_v2 }
 0x719   : > { %v5225_v6 = vpop.eup %5224  ;;  %5236 = vtanh.f32 %v3021_v27  ;;  %3351 = vmatpush.msrb.mxu2 %v5223_v24 }
 0x71a   : > { %v5227_v7 = vpop.eup %5226  ;;  %5238 = vtanh.f32 %v2953_v12  ;;  %3416 = vmatpush.msrb.mxu3 %v5225_v6 }
 0x71b   : > { %v5229_v22 = vpop.eup %5228  ;;  %5240 = vtanh.f32 %v3018_v28  ;;  %3352 = vmatpush.msrb.mxu2 %v5227_v7 }
 0x71c   : > { %v5231_v31 = vpop.eup %5230  ;;  %3417 = vmatpush.msrb.mxu3 %v5229_v22  ;;  %3235 = vmatmul.f32.gmra.mxu0 %v3133_v32 }
 0x71d   : > { %v5233_v57 = vpop.eup %5232  ;;  %3300 = vmatmul.f32.gmra.mxu1 %v3133_v32  ;;  %3353 = vmatpush.msrb.mxu2 %v5231_v31 }
 0x71e   : > { %v5235_v48 = vpop.eup %5234  ;;  %3418 = vmatpush.msrb.mxu3 %v5233_v57 }
 0x71f   : > { %v5237_v46 = vpop.eup %5236  ;;  %3354 = vmatpush.msrb.mxu2 %v5235_v48 }
 0x720   : > { %v5239_v19 = vpop.eup %5238  ;;  %3419 = vmatpush.msrb.mxu3 %v5237_v46 }
 0x721   : > { %v5241_v9 = vpop.eup %5240  ;;  %3355 = vmatpush.msrb.mxu2 %v5239_v19 }
 0x722   : > { %3420 = vmatpush.msrb.mxu3 %v5241_v9  ;;  %3356 = vmatmul.f32.vlgmr.msrb.gmra.mxu2 %v8199_v5 }
 0x723   : > { %3421 = vmatmul.f32.vlgmr.msrb.gmra.mxu3 %v8199_v5  ;;  %v3138_v5 = vld [vmem:[#allocation2 + $0x2c0] sm:$0xff] }
 0x724   : > { %3238 = vmatmul.f32.gmra.mxu0 %v3134_v43 }
 0x725   : > { %3303 = vmatmul.f32.gmra.mxu1 %v3134_v43 }
 0x72a   : > { %3359 = vmatmul.f32.gmra.mxu2 %v8224_v53 }
 0x72b   : > { %3424 = vmatmul.f32.gmra.mxu3 %v8224_v53  ;;  %v3139_v53 = vld [vmem:[#allocation2 + $0x2c8] sm:$0xff] }
 0x72c   : > { %3241 = vmatmul.f32.gmra.mxu0 %v3135_v59 }
 0x72d   : > { %3306 = vmatmul.f32.gmra.mxu1 %v3135_v59 }
 0x732   : > { %3362 = vmatmul.f32.gmra.mxu2 %v8247_v29 }
 0x733   : > { %3427 = vmatmul.f32.gmra.mxu3 %v8247_v29 }
 0x734   : > { %3244 = vmatmul.f32.gmra.mxu0 %v3136_v49 }
 0x735   : > { %3309 = vmatmul.f32.gmra.mxu1 %v3136_v49 }
 0x73a   : > { %3365 = vmatmul.f32.gmra.mxu2 %v3133_v32 }
 0x73b   : > { %3430 = vmatmul.f32.gmra.mxu3 %v3133_v32 }
 0x73c   : > { %3247 = vmatmul.f32.gmra.mxu0 %v3137_v45 }
 0x73d   : > { %3312 = vmatmul.f32.gmra.mxu1 %v3137_v45 }
 0x742   : > { %3368 = vmatmul.f32.gmra.mxu2 %v3134_v43 }
 0x743   : > { %3433 = vmatmul.f32.gmra.mxu3 %v3134_v43 }
 0x744   : > { %3250 = vmatmul.f32.gmra.mxu0 %v3138_v5  ;;  %v8350_v48 = vpop.permute.xlu2 %3199 }
 0x745   : > { %3315 = vmatmul.f32.gmra.mxu1 %v3138_v5 }
 0x74a   : > { %3371 = vmatmul.f32.gmra.mxu2 %v3135_v59 }
 0x74b   : > { %3436 = vmatmul.f32.gmra.mxu3 %v3135_v59 }
 0x74c   : > { %3253 = vmatmul.f32.gmra.mxu0 %v3139_v53 }
 0x74d   : > { %3318 = vmatmul.f32.gmra.mxu1 %v3139_v53 }
 0x752   : > { %3374 = vmatmul.f32.gmra.mxu2 %v3136_v49 }
 0x753   : > { %3439 = vmatmul.f32.gmra.mxu3 %v3136_v49 }
 0x754   : > { %3256 = vmatmul.f32.gmra.mxu0 %v3140_v44 }
 0x755   : > { %3321 = vmatmul.f32.gmra.mxu1 %v3140_v44 }
 0x758   : > { %v8344_v22 = vpop.permute.xlu1 %3203 }
 0x75a   : > { %3377 = vmatmul.f32.gmra.mxu2 %v3137_v45  ;;  %v8352_v9 = vpop.permute.xlu0 %3207 }
 0x75b   : > { %3442 = vmatmul.f32.gmra.mxu3 %v3137_v45 }
 0x75c   : > { %3259 = vmatmul.f32.gmra.mxu0 %v3141_v39 }
 0x75d   : > { %3324 = vmatmul.f32.gmra.mxu1 %v3141_v39 }
 0x760   : > { %v8354_v43 = vpop.permute.xlu1 %3195 }
 0x762   : > { %3380 = vmatmul.f32.gmra.mxu2 %v3138_v5 }
 0x763   : > { %3445 = vmatmul.f32.gmra.mxu3 %v3138_v5 }
 0x764   : > { %3262 = vmatmul.f32.gmra.mxu0 %v3142_v60 }
 0x765   : > { %3327 = vmatmul.f32.gmra.mxu1 %v3142_v60 }
 0x76a   : > { %3383 = vmatmul.f32.gmra.mxu2 %v3139_v53 }
 0x76b   : > { %3448 = vmatmul.f32.gmra.mxu3 %v3139_v53  ;;  %v8360_v53 = vpop.permute.xlu2 %3191 }
 0x76c   : > { %3265 = vmatmul.f32.gmra.mxu0 %v3143_v61 }
 0x76d   : > { %3330 = vmatmul.f32.gmra.mxu1 %v3143_v61 }
 0x772   : > { %3386 = vmatmul.f32.gmra.mxu2 %v3140_v44 }
 0x773   : > { %3451 = vmatmul.f32.gmra.mxu3 %v3140_v44  ;;  %v8362_v44 = vpop.permute.xlu0 %3187 }
 0x774   : > { %3268 = vmatmul.f32.gmra.mxu0 %v3144_v62 }
 0x775   : > { %3333 = vmatmul.f32.gmra.mxu1 %v3144_v62 }
 0x77a   : > { %3389 = vmatmul.f32.gmra.mxu2 %v3141_v39 }
 0x77b   : > { %3454 = vmatmul.f32.gmra.mxu3 %v3141_v39 }
 0x77c   : > { %3271 = vmatmul.f32.gmra.mxu0 %v3145_v30 }
 0x77d   : > { %3336 = vmatmul.f32.gmra.mxu1 %v3145_v30 }
 0x781   : > { %v8268_v14 = vpop.f32.mrf.mxu0 }
 0x782   : > { %v8270_v0 = vpop.f32.mrf.mxu1  ;;  %3392 = vmatmul.f32.gmra.mxu2 %v3142_v60 }
 0x783   : > { %3457 = vmatmul.f32.gmra.mxu3 %v3142_v60 }
 0x789   : > { %v8272_v33 = vpop.f32.mrf.mxu0 }
 0x78a   : > { %v8274_v37 = vpop.f32.mrf.mxu1  ;;  %3395 = vmatmul.f32.gmra.mxu2 %v3143_v61 }
 0x78b   : > { %3460 = vmatmul.f32.gmra.mxu3 %v3143_v61  ;;  %v8368_v61 = vpop.permute.xlu1 %3183 }
 0x791   : > { %v8276_v15 = vpop.f32.mrf.mxu0 }
 0x792   : > { %v8278_v13 = vpop.f32.mrf.mxu1  ;;  %3398 = vmatmul.f32.gmra.mxu2 %v3144_v62 }
 0x793   : > { %3463 = vmatmul.f32.gmra.mxu3 %v3144_v62 }
 0x799   : > { %v8280_v23 = vpop.f32.mrf.mxu0 }
 0x79a   : > { %v8282_v52 = vpop.f32.mrf.mxu1  ;;  %3401 = vmatmul.f32.gmra.mxu2 %v3145_v30 }
 0x79b   : > { %3466 = vmatmul.f32.gmra.mxu3 %v3145_v30 }
 0x7a1   : > { %v8284_v40 = vpop.f32.mrf.mxu0 }
 0x7a2   : > { %v8286_v21 = vpop.f32.mrf.mxu1 }
 0x7a5   : > { %v8288_v51 = vpop.f32.mrf.mxu2 }
 0x7a6   : > { %9258 = vst [vmem:[#allocation24_spill] sm:$0xff] %v8288_v51  ;;  %v8290_v16 = vpop.f32.mrf.mxu3 }
 0x7a7   : > { %9259 = vst [vmem:[#allocation29_spill] sm:$0xff] %v8290_v16 }
 0x7a9   : > { %v8292_v1 = vpop.f32.mrf.mxu0 }
 0x7aa   : > { %v8294_v58 = vpop.f32.mrf.mxu1 }
 0x7ad   : > { %v8296_v8 = vpop.f32.mrf.mxu2 }
 0x7ae   : > { %9260 = vst [vmem:[#allocation28_spill] sm:$0xff] %v8296_v8  ;;  %v8298_v34 = vpop.f32.mrf.mxu3 }
 0x7af   : > { %9261 = vst [vmem:[#allocation16_spill] sm:$0xff] %v8298_v34 }
 0x7b1   : > { %v8300_v35 = vpop.f32.mrf.mxu0 }
 0x7b2   : > { %v8302_v11 = vpop.f32.mrf.mxu1 }
 0x7b5   : > { %v8304_v17 = vpop.f32.mrf.mxu2 }
 0x7b6   : > { %9262 = vst [vmem:[#allocation12_spill] sm:$0xff] %v8304_v17  ;;  %v8306_v18 = vpop.f32.mrf.mxu3 }
 0x7b7   : > { %9263 = vst [vmem:[#allocation18_spill] sm:$0xff] %v8306_v18 }
 0x7b9   : > { %v8308_v41 = vpop.f32.mrf.mxu0 }
 0x7ba   : > { %v8310_v29 = vpop.f32.mrf.mxu1 }
 0x7bd   : > { %v8312_v4 = vpop.f32.mrf.mxu2 }
 0x7be   : > { %9264 = vst [vmem:[#allocation30_spill] sm:$0xff] %v8312_v4  ;;  %v8314_v50 = vpop.f32.mrf.mxu3 }
 0x7bf   : > { %9265 = vst [vmem:[#allocation27_spill] sm:$0xff] %v8314_v50  ;;  %v8376_v50 = vpop.permute.xlu2 %3179 }
 0x7c1   : > { %v8316_v47 = vpop.f32.mrf.mxu0 }
 0x7c2   : > { %v8318_v63 = vpop.f32.mrf.mxu1 }
 0x7c5   : > { %v8320_v54 = vpop.f32.mrf.mxu2 }
 0x7c6   : > { %v8322_v38 = vpop.f32.mrf.mxu3 }
 0x7c7   : > { %9266 = vst [vmem:[#allocation10_spill] sm:$0xff] %v8322_v38 }
 0x7c9   : > { %v8324_v56 = vpop.f32.mrf.mxu0 }
 0x7ca   : > { %v8326_v25 = vpop.f32.mrf.mxu1 }
 0x7cd   : > { %v8328_v27 = vpop.f32.mrf.mxu2 }
 0x7ce   : > { %v8330_v36 = vpop.f32.mrf.mxu3 }
 0x7d1   : > { %v8332_v42 = vpop.f32.mrf.mxu0 }
 0x7d2   : > { %v8334_v12 = vpop.f32.mrf.mxu1 }
 0x7d5   : > { %v8336_v2 = vpop.f32.mrf.mxu2 }
 0x7d6   : > { %v8338_v20 = vpop.f32.mrf.mxu3 }
 0x7d9   : > { %v3260_v28 = vpop.f32.mrf.mxu0 }
 0x7da   : > { %v3325_v26 = vpop.f32.mrf.mxu1 }
 0x7dd   : > { %v8340_v24 = vpop.f32.mrf.mxu2 }
 0x7de   : > { %v8342_v6 = vpop.f32.mrf.mxu3 }
 0x7e1   : > { %v3263_v7 = vpop.f32.mrf.mxu0 }
 0x7e2   : > { %v3328_v32 = vpop.f32.mrf.mxu1  ;;  %v3264_v4 = vadd.f32 %v3263_v7, %v8354_v43  ;;  %v8391_v7 = vpop.permute.xlu0 %3175 }
 0x7e5   : > { %v8346_v31 = vpop.f32.mrf.mxu2 }
 0x7e6   : > { %v8348_v57 = vpop.f32.mrf.mxu3 }
 0x7e9   : > { %v3266_v46 = vpop.f32.mrf.mxu0 }
 0x7ea   : > { %v3331_v19 = vpop.f32.mrf.mxu1  ;;  %v3267_v34 = vadd.f32 %v3266_v46, %v8350_v48 }
 0x7eb   : > { %v3332_v17 = vadd.f32 %v3331_v19, %v8350_v48 }
 0x7ed   : > { %v8356_v59 = vpop.f32.mrf.mxu2 }
 0x7ee   : > { %v8358_v49 = vpop.f32.mrf.mxu3 }
 0x7f1   : > { %v3269_v45 = vpop.f32.mrf.mxu0 }
 0x7f2   : > { %v3334_v5 = vpop.f32.mrf.mxu1  ;;  %v3270_v62 = vadd.f32 %v3269_v45, %v8344_v22  ;;  %v5672_v45 = vmov 7  }
 0x7f3   : > { %v3335_v30 = vadd.f32 %v3334_v5, %v8344_v22  ;;  %4463 = vset.pattern.permute.xlu1 %v5672_v45  ;;  %4461 = vset.pattern.permute.xlu2 %v5672_v45  ;;  %v3329_v5 = vadd.f32 %v3328_v32, %v8354_v43  ;;  %v5553_v32 = vld [vmem:[%s8958_s2 + $0x8] sm:$0xff] }
 0x7f4   : > { %5242 = vtanh.f32 %v3270_v62  ;;  %4462 = vset.pattern.permute.xlu0 %v5672_v45  ;;  %v3255_v45 = vadd.f32 %v8324_v56, %v8368_v61  ;;  %v5555_v56 = vld [vmem:[%s8958_s2 + $0x18] sm:$0xff] }
 0x7f5   : > { %v8364_v39 = vpop.f32.mrf.mxu2  ;;  %5244 = vtanh.f32 %v3335_v30  ;;  %3555 = vperm.xlu0 %4462, %v5553_v32   ;;  %v8397_v30 = vpop.permute.xlu1 %3171 }
 0x7f6   : > { %v8366_v60 = vpop.f32.mrf.mxu3 }
 0x7f9   : > { %v3272_v16 = vpop.f32.mrf.mxu0 }
 0x7fa   : > { %v3337_v51 = vpop.f32.mrf.mxu1  ;;  %v3273_v8 = vadd.f32 %v3272_v16, %v8352_v9  ;;  %v5552_v16 = vld [vmem:[%s8958_s2] sm:$0xff]  ;;  %v5243_v19 = vpop.eup %5242 }
 0x7fb   : > { %v3338_v18 = vadd.f32 %v3337_v51, %v8352_v9  ;;  %v5551_v51 = vld [vmem:[%s8958_s2 + $0x10] sm:$0xff]  ;;  %3551 = vperm.xlu2 %4461, %v5552_v16  }
 0x7fc   : > { %5246 = vtanh.f32 %v3273_v8  ;;  %3559 = vperm.xlu1 %4463, %v5551_v51   ;;  %v3261_v8 = vadd.f32 %v3260_v28, %v8360_v53  ;;  %v5245_v51 = vpop.eup %5244 }
 0x7fd   : > { %5248 = vtanh.f32 %v3338_v18  ;;  %v8380_v46 = vpop.f32.mrf.mxu2  ;;  %v3326_v18 = vadd.f32 %v3325_v26, %v8360_v53 }
 0x7fe   : > { %v8382_v62 = vpop.f32.mrf.mxu3  ;;  %5250 = vtanh.f32 %v3267_v34  ;;  %v3258_v34 = vadd.f32 %v8332_v42, %v8362_v44  ;;  %v5554_v42 = vld [vmem:[%s8958_s2 + $0x20] sm:$0xff] }
 0x7ff   : > { %5252 = vtanh.f32 %v3332_v17  ;;  %v3323_v17 = vadd.f32 %v8334_v12, %v8362_v44 }
 0x800   : > { %5254 = vtanh.f32 %v3264_v4  ;;  %v3320_v4 = vadd.f32 %v8326_v25, %v8368_v61 }
 0x801   : > { %5256 = vtanh.f32 %v3329_v5 }
 0x802   : > { %v5247_v16 = vpop.eup %5246  ;;  %5258 = vtanh.f32 %v3261_v8  ;;  %v3252_v8 = vadd.f32 %v8316_v47, %v8376_v50 }
 0x803   : > { %v5249_v28 = vpop.eup %5248  ;;  %5260 = vtanh.f32 %v3326_v18  ;;  %3614 = vmatpush.msra.mxu0 %v5247_v16  ;;  %3563 = vperm.xlu2 %4461, %v5555_v56   ;;  %v8419_v18 = vpop.permute.xlu2 %3167  ;;  %v5556_v16 = vld [vmem:[%s8958_s2 + $0x30] sm:$0xff] }
 0x804   : > { %v5251_v26 = vpop.eup %5250  ;;  %3679 = vmatpush.msra.mxu1 %v5249_v28  ;;  %3567 = vperm.xlu1 %4463, %v5554_v42   ;;  %5262 = vtanh.f32 %v3258_v34  ;;  %v8428_v28 = vpop.permute.xlu0 %3163  ;;  %v3314_v42 = vadd.f32 %v8310_v29, %v8391_v7 }
 0x805   : > { %v5253_v32 = vpop.eup %5252  ;;  %v8407_v5 = vpop.f32.mrf.mxu2  ;;  %3615 = vmatpush.msra.mxu0 %v5243_v19  ;;  %v3317_v19 = vadd.f32 %v8318_v63, %v8376_v50  ;;  %5264 = vtanh.f32 %v3323_v17  ;;  %3575 = vperm.xlu0 %4462, %v5556_v16   ;;  %v3246_v17 = vadd.f32 %v8300_v35, %v8397_v30 }
 0x806   : > { %v8409_v38 = vpop.f32.mrf.mxu3  ;;  %v5255_v12 = vpop.eup %5254  ;;  %3680 = vmatpush.msra.mxu1 %v5245_v51  ;;  %v3249_v51 = vadd.f32 %v8308_v41, %v8391_v7  ;;  %5266 = vtanh.f32 %v3255_v45  ;;  %v3311_v41 = vadd.f32 %v8302_v11, %v8397_v30  ;;  %v3243_v45 = vadd.f32 %v8292_v1, %v8419_v18  ;;  %v5557_v1 = vld [vmem:[%s8958_s2 + $0x28] sm:$0xff] }
 0x807   : > { %v5257_v25 = vpop.eup %5256  ;;  %3616 = vmatpush.msra.mxu0 %v5251_v26  ;;  %5268 = vtanh.f32 %v3320_v4  ;;  %v8432_v63 = vpop.permute.xlu1 %3159 }
 0x808   : > { %v5259_v47 = vpop.eup %5258  ;;  %3681 = vmatpush.msra.mxu1 %v5253_v32  ;;  %5270 = vtanh.f32 %v3252_v8  ;;  %v3308_v32 = vadd.f32 %v8294_v58, %v8419_v18  ;;  %v3305_v8 = vadd.f32 %v8286_v21, %v8428_v28 }
 0x809   : > { %v5261_v34 = vpop.eup %5260  ;;  %3617 = vmatpush.msra.mxu0 %v5255_v12  ;;  %5272 = vtanh.f32 %v3317_v19  ;;  %v3240_v12 = vadd.f32 %v8284_v40, %v8428_v28  ;;  %v3237_v40 = vadd.f32 %v8280_v23, %v8432_v63  ;;  %v3302_v19 = vadd.f32 %v8282_v52, %v8432_v63 }
 0x80a   : > { %3682 = vmatpush.msra.mxu1 %v5257_v25  ;;  %v5263_v26 = vpop.eup %5262  ;;  %5274 = vtanh.f32 %v3249_v51 }
 0x80b   : > { %3618 = vmatpush.msra.mxu0 %v5259_v47  ;;  %v5265_v29 = vpop.eup %5264  ;;  %5276 = vtanh.f32 %v3314_v42  ;;  %3571 = vperm.xlu2 %4461, %v5557_v1   ;;  %v8461_v16 = vpop.permute.xlu2 %3155 }
 0x80c   : > { %3683 = vmatpush.msra.mxu1 %v5261_v34  ;;  %3579 = vperm.xlu1 %4463, %v8182_v3   ;;  %v5267_v11 = vpop.eup %5266  ;;  %5278 = vtanh.f32 %v3246_v17  ;;  %v5558_v3 = vld [vmem:[%s8958_s2 + $0x48] sm:$0xff]  ;;  %v3234_v47 = vadd.f32 %v8276_v15, %v8461_v16  ;;  %v8465_v34 = vpop.permute.xlu0 %3151  ;;  %v3299_v23 = vadd.f32 %v8278_v13, %v8461_v16 }
 0x80d   : > { %v8442_v4 = vpop.f32.mrf.mxu2  ;;  %3619 = vmatpush.msra.mxu0 %v5263_v26  ;;  %v5269_v58 = vpop.eup %5268  ;;  %5280 = vtanh.f32 %v3311_v41  ;;  %3587 = vperm.xlu0 %4462, %v5558_v3   ;;  %v3231_v17 = vadd.f32 %v8272_v33, %v8465_v34  ;;  %v3296_v15 = vadd.f32 %v8274_v37, %v8465_v34  ;;  %v5559_v37 = vld [vmem:[%s8958_s2 + $0x60] sm:$0xff] }
 0x80e   : > { %v8444_v35 = vpop.f32.mrf.mxu3  ;;  %3684 = vmatpush.msra.mxu1 %v5265_v29  ;;  %v5271_v56 = vpop.eup %5270  ;;  %5282 = vtanh.f32 %v3243_v45 }
 0x80f   : > { %3620 = vmatpush.msra.mxu0 %v5267_v11  ;;  %v5273_v25 = vpop.eup %5272  ;;  %5284 = vtanh.f32 %v3308_v32  ;;  %v8469_v52 = vpop.permute.xlu1 %3147 }
 0x810   : > { %3685 = vmatpush.msra.mxu1 %v5269_v58  ;;  %v5275_v21 = vpop.eup %5274  ;;  %5286 = vtanh.f32 %v3240_v12  ;;  %v3228_v29 = vadd.f32 %v8268_v14, %v8469_v52  ;;  %v3293_v32 = vadd.f32 %v8270_v0, %v8469_v52 }
 0x811   : > { %3621 = vmatpush.msra.mxu0 %v5271_v56  ;;  %v5277_v51 = vpop.eup %5276  ;;  %5288 = vtanh.f32 %v3305_v8  ;;  %v5560_v8 = vld [vmem:[%s8958_s2 + $0x68] sm:$0xff] }
 0x812   : > { %3686 = vmatpush.msra.mxu1 %v5273_v25  ;;  %v5279_v42 = vpop.eup %5278  ;;  %5290 = vtanh.f32 %v3237_v40 }
 0x813   : > { %3622 = vmatpush.msra.mxu0 %v5275_v21  ;;  %v5281_v41 = vpop.eup %5280  ;;  %5292 = vtanh.f32 %v3302_v19  ;;  %3583 = vperm.xlu2 %4461, %v8192_v55   ;;  %v5561_v19 = vld [vmem:[%s8958_s2 + $0x58] sm:$0xff] }
 0x814   : > { %3687 = vmatpush.msra.mxu1 %v5277_v51  ;;  %3591 = vperm.xlu1 %4463, %v8162_v10   ;;  %v5283_v13 = vpop.eup %5282  ;;  %5294 = vtanh.f32 %v3234_v47  ;;  %v8497_v51 = vld [vmem:[%s8960_s4] sm:$0xff] }
 0x815   : > { %v3399_v26 = vpop.f32.mrf.mxu2  ;;  %3623 = vmatpush.msra.mxu0 %v5279_v42  ;;  %v5285_v33 = vpop.eup %5284  ;;  %5296 = vtanh.f32 %v3299_v23  ;;  %3599 = vperm.xlu0 %4462, %v5559_v37   ;;  %v5562_v23 = vld [vmem:[%s8958_s2 + $0x78] sm:$0xff]  ;;  %v3397_v42 = vadd.f32 %v8442_v4, %v8350_v48  ;;  %v3391_v4 = vadd.f32 %v8380_v46, %v8360_v53  ;;  %v3453_v46 = vadd.f32 %v8366_v60, %v8362_v44 }
 0x816   : > { %v3464_v45 = vpop.f32.mrf.mxu3  ;;  %3688 = vmatpush.msra.mxu1 %v5281_v41  ;;  %v5287_v10 = vpop.eup %5286  ;;  %5298 = vtanh.f32 %v3231_v17  ;;  %v3400_v56 = vadd.f32 %v3399_v26, %v8344_v22  ;;  %v3394_v41 = vadd.f32 %v8407_v5, %v8354_v43  ;;  %v8520_v5 = vld [vmem:[%s8961_s5] sm:$0xff]  ;;  %v3382_v60 = vadd.f32 %v8346_v31, %v8376_v50 }
 0x817   : > { %3624 = vmatpush.msra.mxu0 %v5283_v13  ;;  %v5289_v11 = vpop.eup %5288  ;;  %5300 = vtanh.f32 %v3296_v15  ;;  %v3465_v47 = vadd.f32 %v3464_v45, %v8344_v22  ;;  %v3462_v22 = vadd.f32 %v8444_v35, %v8350_v48  ;;  %v3459_v15 = vadd.f32 %v8409_v38, %v8354_v43  ;;  %v5563_v43 = vld [vmem:[%s8958_s2 + $0x70] sm:$0xff] }
 0x818   : > { %3689 = vmatpush.msra.mxu1 %v5285_v33  ;;  %v5291_v14 = vpop.eup %5290  ;;  %5302 = vtanh.f32 %v3228_v29  ;;  %v3456_v48 = vadd.f32 %v8382_v62, %v8360_v53  ;;  %v9267_v35 = vmov 0   ;;  %v3388_v38 = vadd.f32 %v8364_v39, %v8362_v44  ;;  %v8533_v62 = vld [vmem:[%s8960_s4 + $0x8] sm:$0xff] }
 0x819   : > { %3625 = vmatpush.msra.mxu0 %v5287_v10  ;;  %v5293_v55 = vpop.eup %5292  ;;  %5304 = vtanh.f32 %v3293_v32  ;;  %v9268_v39 = vmov 1   ;;  %v3385_v13 = vadd.f32 %v8356_v59, %v8368_v61  ;;  %v3450_v33 = vadd.f32 %v8358_v49, %v8368_v61 }
 0x81a   : > { %3690 = vmatpush.msra.mxu1 %v5289_v11  ;;  %v5295_v0 = vpop.eup %5294  ;;  %v3447_v59 = vadd.f32 %v8348_v57, %v8376_v50  ;;  %v3379_v49 = vadd.f32 %v8340_v24, %v8391_v7  ;;  %v3444_v31 = vadd.f32 %v8342_v6, %v8391_v7  ;;  %v3941_v50 = vld [vmem:[%s8961_s5 + $0x18] sm:$0xff]  ;;  %v3376_v10 = vadd.f32 %v8336_v2, %v8397_v30  ;;  %v8560_v6 = vld [vmem:[%s8960_s4 + $0x10] sm:$0xff] }
 0x81b   : > { %3626 = vmatpush.msra.mxu0 %v5291_v14  ;;  %v5297_v12 = vpop.eup %5296  ;;  %3595 = vperm.xlu2 %4461, %v5561_v19   ;;  %v3441_v11 = vadd.f32 %v8338_v20, %v8397_v30  ;;  %v3373_v14 = vadd.f32 %v8328_v27, %v8419_v18  ;;  %v3438_v20 = vadd.f32 %v8330_v36, %v8419_v18  ;;  %v9269_v27 = vld [vmem:[#allocation10_spill] sm:$0xff] }
 0x81c   : > { %3691 = vmatpush.msra.mxu1 %v5293_v55  ;;  %3603 = vperm.xlu1 %4463, %v5560_v8   ;;  %v5299_v3 = vpop.eup %5298  ;;  %v3370_v55 = vadd.f32 %v8320_v54, %v8428_v28  ;;  %v9270_v36 = vld [vmem:[#allocation30_spill] sm:$0xff]  ;;  %v9271_v54 = vld [vmem:[#allocation27_spill] sm:$0xff] }
 0x81d   : > { %v3402_v1 = vpop.f32.mrf.mxu2  ;;  %3627 = vmatpush.msra.mxu0 %v5295_v0  ;;  %v5301_v21 = vpop.eup %5300  ;;  %3611 = vperm.xlu0 %4462, %v5562_v23   ;;  %v3367_v18 = vadd.f32 %v9270_v36, %v8432_v63  ;;  %v3432_v8 = vadd.f32 %v9271_v54, %v8432_v63  ;;  %v9273_v19 = vld [vmem:[#allocation18_spill] sm:$0xff]  ;;  %v8588_v63 = vld [vmem:[%s8960_s4 + $0x18] sm:$0xff]  ;;  %v9274_v23 = vld [vmem:[#allocation28_spill] sm:$0xff] }
 0x81e   : > { %v3467_v58 = vpop.f32.mrf.mxu3  ;;  %v3403_v40 = vadd.f32 %v3402_v1, %v8352_v9  ;;  %3692 = vmatpush.msra.mxu1 %v5297_v12  ;;  %v3435_v12 = vadd.f32 %v9269_v27, %v8428_v28  ;;  %v3549_v36 = vld [vmem:[%s8960_s4 + $0x78] sm:$0xff] }
 0x81f   : > { %v3468_v25 = vadd.f32 %v3467_v58, %v8352_v9  ;;  %3628 = vmatpush.msra.mxu0 %v5299_v3  ;;  %v5303_v9 = vpop.eup %5302 }
 0x820   : > { %5306 = vtanh.f32 %v3403_v40  ;;  %3693 = vmatpush.msra.mxu1 %v5301_v21  ;;  %v5305_v17 = vpop.eup %5304  ;;  %v3939_v40 = vld [vmem:[%s8961_s5 + $0x8] sm:$0xff]  ;;  %v3429_v21 = vadd.f32 %v9273_v19, %v8461_v16 }
 0x821   : > { %5308 = vtanh.f32 %v3468_v25  ;;  %3629 = vmatpush.msra.mxu0 %v5303_v9  ;;  %v3361_v9 = vadd.f32 %v9274_v23, %v8465_v34 }
 0x822   : > { %5310 = vtanh.f32 %v3400_v56  ;;  %3694 = vmatpush.msra.mxu1 %v5305_v17  ;;  %3630 = vmatmul.f32.vlgmr.msra.gmra.mxu0 %v8497_v51  ;;  %v9272_v56 = vld [vmem:[#allocation12_spill] sm:$0xff] }
 0x823   : > { %5312 = vtanh.f32 %v3465_v47  ;;  %3695 = vmatmul.f32.vlgmr.msra.gmra.mxu1 %v8497_v51  ;;  %3607 = vperm.xlu2 %4461, %v5563_v43   ;;  %v3364_v28 = vadd.f32 %v9272_v56, %v8461_v16  ;;  %v9275_v17 = vld [vmem:[#allocation16_spill] sm:$0xff] }
 0x824   : > { %5314 = vtanh.f32 %v3397_v42  ;;  %4464 = vset.pattern.permute.xlu1 %v9267_v35 }
 0x825   : > { %5316 = vtanh.f32 %v3462_v22  ;;  %3948 = vperm.xlu1 %4464, %v8520_v5   ;;  %4468 = vset.pattern.permute.xlu0 %v9268_v39  ;;  %v3426_v22 = vadd.f32 %v9275_v17, %v8465_v34 }
 0x826   : > { %v5307_v26 = vpop.eup %5306  ;;  %5318 = vtanh.f32 %v3394_v41  ;;  %4094 = vperm.xlu0 %4468, %v3941_v50   ;;  %v9276_v41 = vld [vmem:[#allocation24_spill] sm:$0xff] }
 0x827   : > { %v5309_v53 = vpop.eup %5308  ;;  %5320 = vtanh.f32 %v3459_v15  ;;  %3744 = vmatpush.msra.mxu2 %v5307_v26  ;;  %v3358_v15 = vadd.f32 %v9276_v41, %v8469_v52 }
 0x828   : > { %v5311_v45 = vpop.eup %5310  ;;  %5322 = vtanh.f32 %v3391_v4  ;;  %3809 = vmatpush.msra.mxu3 %v5309_v53  ;;  %v3942_v53 = vld [vmem:[%s8961_s5 + $0x20] sm:$0xff] }
 0x829   : > { %v5313_v29 = vpop.eup %5312  ;;  %5324 = vtanh.f32 %v3456_v48  ;;  %3745 = vmatpush.msra.mxu2 %v5311_v45  ;;  %v9277_v48 = vld [vmem:[#allocation29_spill] sm:$0xff] }
 0x82a   : > { %v5315_v44 = vpop.eup %5314  ;;  %5326 = vtanh.f32 %v3388_v38  ;;  %3810 = vmatpush.msra.mxu3 %v5313_v29  ;;  %3633 = vmatmul.f32.gmra.mxu0 %v8533_v62  ;;  %v3423_v26 = vadd.f32 %v9277_v48, %v8469_v52  ;;  %v3538_v52 = vld [vmem:[%s8960_s4 + $0x20] sm:$0xff] }
 0x82b   : > { %v5317_v32 = vpop.eup %5316  ;;  %5328 = vtanh.f32 %v3453_v46  ;;  %3746 = vmatpush.msra.mxu2 %v5315_v44  ;;  %3698 = vmatmul.f32.gmra.mxu1 %v8533_v62 }
 0x82c   : > { %v5319_v37 = vpop.eup %5318  ;;  %5330 = vtanh.f32 %v3385_v13  ;;  %3811 = vmatpush.msra.mxu3 %v5317_v32  ;;  %4465 = vset.pattern.permute.xlu2 %v9267_v35  ;;  %v3944_v32 = vld [vmem:[%s8961_s5 + $0x30] sm:$0xff] }
 0x82d   : > { %v5321_v61 = vpop.eup %5320  ;;  %5332 = vtanh.f32 %v3450_v33  ;;  %3747 = vmatpush.msra.mxu2 %v5319_v37  ;;  %3963 = vperm.xlu1 %4464, %v3941_v50   ;;  %v3943_v37 = vld [vmem:[%s8961_s5 + $0x28] sm:$0xff] }
 0x82e   : > { %v5323_v57 = vpop.eup %5322  ;;  %5334 = vtanh.f32 %v3382_v60  ;;  %3812 = vmatpush.msra.mxu3 %v5321_v61  ;;  %3953 = vperm.xlu2 %4465, %v3939_v40   ;;  %v3542_v61 = vld [vmem:[%s8960_s4 + $0x40] sm:$0xff]  ;;  %v3543_v50 = vld [vmem:[%s8960_s4 + $0x48] sm:$0xff] }
 0x82f   : > { %v5325_v24 = vpop.eup %5324  ;;  %5336 = vtanh.f32 %v3447_v59  ;;  %3748 = vmatpush.msra.mxu2 %v5323_v57  ;;  %4469 = vset.pattern.permute.xlu0 %v9267_v35  ;;  %v3940_v59 = vld [vmem:[%s8961_s5 + $0x10] sm:$0xff] }
 0x830   : > { %v5327_v7 = vpop.eup %5326  ;;  %5338 = vtanh.f32 %v3379_v49  ;;  %3813 = vmatpush.msra.mxu3 %v5325_v24  ;;  %3958 = vperm.xlu0 %4469, %v3940_v59   ;;  %v3945_v49 = vld [vmem:[%s8961_s5 + $0x38] sm:$0xff]  ;;  %v3544_v57 = vld [vmem:[%s8960_s4 + $0x50] sm:$0xff] }
 0x831   : > { %v5329_v2 = vpop.eup %5328  ;;  %5340 = vtanh.f32 %v3444_v31  ;;  %3749 = vmatpush.msra.mxu2 %v5327_v7  ;;  %v4070_v31 = vld [vmem:[%s8962_s6] sm:$0x1] }
 0x832   : > { %v5331_v30 = vpop.eup %5330  ;;  %5342 = vtanh.f32 %v3376_v10  ;;  %3814 = vmatpush.msra.mxu3 %v5329_v2  ;;  %3636 = vmatmul.f32.gmra.mxu0 %v8560_v6  ;;  %v3546_v7 = vld [vmem:[%s8960_s4 + $0x60] sm:$0xff]  ;;  %v3547_v2 = vld [vmem:[%s8960_s4 + $0x68] sm:$0xff] }
 0x833   : > { %v5333_v0 = vpop.eup %5332  ;;  %5344 = vtanh.f32 %v3441_v11  ;;  %3750 = vmatpush.msra.mxu2 %v5331_v30  ;;  %3701 = vmatmul.f32.gmra.mxu1 %v8560_v6  ;;  %v3545_v11 = vld [vmem:[%s8960_s4 + $0x58] sm:$0xff] }
 0x834   : > { %v5335_v1 = vpop.eup %5334  ;;  %5346 = vtanh.f32 %v3373_v14  ;;  %3815 = vmatpush.msra.mxu3 %v5333_v0  ;;  %v3548_v0 = vld [vmem:[%s8960_s4 + $0x70] sm:$0xff] }
 0x835   : > { %v5337_v58 = vpop.eup %5336  ;;  %5348 = vtanh.f32 %v3438_v20  ;;  %3751 = vmatpush.msra.mxu2 %v5335_v1  ;;  %4467 = vset.pattern.permute.xlu1 %v9268_v39 }
 0x836   : > { %v5339_v3 = vpop.eup %5338  ;;  %5350 = vtanh.f32 %v3370_v55  ;;  %3816 = vmatpush.msra.mxu3 %v5337_v58  ;;  %4086 = vperm.xlu1 %4467, %v3939_v40  }
 0x837   : > { %v5341_v25 = vpop.eup %5340  ;;  %5352 = vtanh.f32 %v3435_v12  ;;  %3752 = vmatpush.msra.mxu2 %v5339_v3  ;;  %4466 = vset.pattern.permute.xlu2 %v9268_v39 }
 0x838   : > { %v5343_v47 = vpop.eup %5342  ;;  %5354 = vtanh.f32 %v3367_v18  ;;  %3817 = vmatpush.msra.mxu3 %v5341_v25  ;;  %4082 = vperm.xlu2 %4466, %v8520_v5   ;;  %v3539_v5 = vld [vmem:[%s8960_s4 + $0x28] sm:$0xff] }
 0x839   : > { %v5345_v42 = vpop.eup %5344  ;;  %5356 = vtanh.f32 %v3432_v8  ;;  %3753 = vmatpush.msra.mxu2 %v5343_v47  ;;  %3968 = vperm.xlu0 %4469, %v3942_v53  }
 0x83a   : > { %v5347_v16 = vpop.eup %5346  ;;  %5358 = vtanh.f32 %v3364_v28  ;;  %3818 = vmatpush.msra.mxu3 %v5345_v42  ;;  %3639 = vmatmul.f32.gmra.mxu0 %v8588_v63 }
 0x83b   : > { %v5349_v4 = vpop.eup %5348  ;;  %5360 = vtanh.f32 %v3429_v21  ;;  %3754 = vmatpush.msra.mxu2 %v5347_v16  ;;  %3704 = vmatmul.f32.gmra.mxu1 %v8588_v63 }
 0x83c   : > { %v5351_v34 = vpop.eup %5350  ;;  %5362 = vtanh.f32 %v3361_v9  ;;  %3819 = vmatpush.msra.mxu3 %v5349_v4 }
 0x83d   : > { %v5353_v38 = vpop.eup %5352  ;;  %5364 = vtanh.f32 %v3426_v22  ;;  %3755 = vmatpush.msra.mxu2 %v5351_v34 }
 0x83e   : > { %v5355_v43 = vpop.eup %5354  ;;  %5366 = vtanh.f32 %v3358_v15  ;;  %3820 = vmatpush.msra.mxu3 %v5353_v38  ;;  %4098 = vperm.xlu1 %4467, %v3942_v53  }
 0x83f   : > { %v5357_v46 = vpop.eup %5356  ;;  %5368 = vtanh.f32 %v3423_v26  ;;  %3756 = vmatpush.msra.mxu2 %v5355_v43 }
 0x840   : > { %v5359_v45 = vpop.eup %5358  ;;  %3821 = vmatpush.msra.mxu3 %v5357_v46  ;;  %4090 = vperm.xlu2 %4466, %v3940_v59  }
 0x841   : > { %v5361_v13 = vpop.eup %5360  ;;  %3757 = vmatpush.msra.mxu2 %v5359_v45  ;;  %4073 = vperm.xlu0 %4469, %v4070_v31  }
 0x842   : > { %v5363_v29 = vpop.eup %5362  ;;  %3822 = vmatpush.msra.mxu3 %v5361_v13  ;;  %3642 = vmatmul.f32.gmra.mxu0 %v3538_v52 }
 0x843   : > { %v5365_v33 = vpop.eup %5364  ;;  %3758 = vmatpush.msra.mxu2 %v5363_v29  ;;  %3707 = vmatmul.f32.gmra.mxu1 %v3538_v52 }
 0x844   : > { %v5367_v44 = vpop.eup %5366  ;;  %3823 = vmatpush.msra.mxu3 %v5365_v33 }
 0x845   : > { %v5369_v60 = vpop.eup %5368  ;;  %3759 = vmatpush.msra.mxu2 %v5367_v44 }
 0x846   : > { %3824 = vmatpush.msra.mxu3 %v5369_v60  ;;  %3760 = vmatmul.f32.vlgmr.msra.gmra.mxu2 %v8497_v51 }
 0x847   : > { %3825 = vmatmul.f32.vlgmr.msra.gmra.mxu3 %v8497_v51  ;;  %4106 = vperm.xlu1 %4467, %v3944_v32   ;;  %v3540_v51 = vld [vmem:[%s8960_s4 + $0x30] sm:$0xff] }
 0x848   : > { %4102 = vperm.xlu2 %4466, %v3943_v37  }
 0x849   : > { %4473 = vset.pattern.permute.xlu0 %v9268_v39 }
 0x84a   : > { %3645 = vmatmul.f32.gmra.mxu0 %v3539_v5 }
 0x84b   : > { %3710 = vmatmul.f32.gmra.mxu1 %v3539_v5 }
 0x84e   : > { %3763 = vmatmul.f32.gmra.mxu2 %v8533_v62 }
 0x84f   : > { %3828 = vmatmul.f32.gmra.mxu3 %v8533_v62  ;;  %4470 = vset.pattern.permute.xlu1 %v9267_v35  ;;  %v3541_v62 = vld [vmem:[%s8960_s4 + $0x38] sm:$0xff] }
 0x850   : > { %3973 = vperm.xlu1 %4470, %v3943_v37   ;;  %4110 = vperm.xlu2 %4466, %v3945_v49  }
 0x852   : > { %3648 = vmatmul.f32.gmra.mxu0 %v3540_v51 }
 0x853   : > { %3713 = vmatmul.f32.gmra.mxu1 %v3540_v51 }
 0x856   : > { %3766 = vmatmul.f32.gmra.mxu2 %v8560_v6 }
 0x857   : > { %3831 = vmatmul.f32.gmra.mxu3 %v8560_v6 }
 0x858   : > { %3983 = vperm.xlu1 %4470, %v3945_v49   ;;  %4471 = vset.pattern.permute.xlu2 %v9267_v35  ;;  %v8650_v35 = vpop.permute.xlu2 %3551 }
 0x859   : > { %3978 = vperm.xlu2 %4471, %v3944_v32  }
 0x85a   : > { %3651 = vmatmul.f32.gmra.mxu0 %v3541_v62 }
 0x85b   : > { %3716 = vmatmul.f32.gmra.mxu1 %v3541_v62 }
 0x85e   : > { %3769 = vmatmul.f32.gmra.mxu2 %v8588_v63 }
 0x85f   : > { %3834 = vmatmul.f32.gmra.mxu3 %v8588_v63 }
 0x860   : > { %v8658_v24 = vpop.permute.xlu2 %3563 }
 0x861   : > { %4472 = vset.pattern.permute.xlu2 %v9268_v39 }
 0x862   : > { %3654 = vmatmul.f32.gmra.mxu0 %v3542_v61  ;;  %4198 = vperm.xlu2 %4472, %v4070_v31  }
 0x863   : > { %3719 = vmatmul.f32.gmra.mxu1 %v3542_v61 }
 0x866   : > { %3772 = vmatmul.f32.gmra.mxu2 %v3538_v52 }
 0x867   : > { %3837 = vmatmul.f32.gmra.mxu3 %v3538_v52  ;;  %v8679_v55 = vpop.permute.xlu0 %3555 }
 0x868   : > { %v8665_v39 = vpop.permute.xlu2 %3571 }
 0x86a   : > { %3657 = vmatmul.f32.gmra.mxu0 %v3543_v50 }
 0x86b   : > { %3722 = vmatmul.f32.gmra.mxu1 %v3543_v50 }
 0x86e   : > { %3775 = vmatmul.f32.gmra.mxu2 %v3539_v5  ;;  %v8656_v10 = vpop.permute.xlu1 %3559 }
 0x86f   : > { %3840 = vmatmul.f32.gmra.mxu3 %v3539_v5 }
 0x870   : > { %v8675_v20 = vpop.permute.xlu2 %3583 }
 0x872   : > { %3660 = vmatmul.f32.gmra.mxu0 %v3544_v57 }
 0x873   : > { %3725 = vmatmul.f32.gmra.mxu1 %v3544_v57 }
 0x876   : > { %3778 = vmatmul.f32.gmra.mxu2 %v3540_v51  ;;  %v8663_v6 = vpop.permute.xlu1 %3567 }
 0x877   : > { %3843 = vmatmul.f32.gmra.mxu3 %v3540_v51  ;;  %v8686_v12 = vpop.permute.xlu0 %3575 }
 0x878   : > { %v8684_v27 = vpop.permute.xlu2 %3595 }
 0x87a   : > { %3663 = vmatmul.f32.gmra.mxu0 %v3545_v11 }
 0x87b   : > { %3728 = vmatmul.f32.gmra.mxu1 %v3545_v11 }
 0x87e   : > { %3781 = vmatmul.f32.gmra.mxu2 %v3541_v62  ;;  %v8670_v14 = vpop.permute.xlu1 %3579 }
 0x87f   : > { %3846 = vmatmul.f32.gmra.mxu3 %v3541_v62  ;;  %v8693_v18 = vpop.permute.xlu0 %3587 }
 0x880   : > { %v8695_v58 = vpop.permute.xlu2 %3607 }
 0x882   : > { %3666 = vmatmul.f32.gmra.mxu0 %v3546_v7 }
 0x883   : > { %3731 = vmatmul.f32.gmra.mxu1 %v3546_v7 }
 0x886   : > { %3784 = vmatmul.f32.gmra.mxu2 %v3542_v61  ;;  %v8677_v30 = vpop.permute.xlu1 %3591 }
 0x887   : > { %3849 = vmatmul.f32.gmra.mxu3 %v3542_v61  ;;  %v8699_v56 = vpop.permute.xlu0 %3599 }
 0x888   : > { %v8701_v28 = vpop.permute.xlu2 %3953 }
 0x88a   : > { %3669 = vmatmul.f32.gmra.mxu0 %v3547_v2 }
 0x88b   : > { %3734 = vmatmul.f32.gmra.mxu1 %v3547_v2 }
 0x88e   : > { %3787 = vmatmul.f32.gmra.mxu2 %v3543_v50  ;;  %v8688_v1 = vpop.permute.xlu1 %3603 }
 0x88f   : > { %3852 = vmatmul.f32.gmra.mxu3 %v3543_v50  ;;  %v8705_v21 = vpop.permute.xlu0 %3611 }
 0x892   : > { %3672 = vmatmul.f32.gmra.mxu0 %v3548_v0  ;;  %v8707_v47 = vpop.permute.xlu2 %4082 }
 0x893   : > { %3737 = vmatmul.f32.gmra.mxu1 %v3548_v0 }
 0x896   : > { %3790 = vmatmul.f32.gmra.mxu2 %v3544_v57 }
 0x897   : > { %3855 = vmatmul.f32.gmra.mxu3 %v3544_v57  ;;  %v8697_v54 = vpop.permute.xlu1 %3948 }
 0x898   : > { %v8711_v42 = vpop.permute.xlu0 %4094 }
 0x89a   : > { %3675 = vmatmul.f32.gmra.mxu0 %v3549_v36  ;;  %v8720_v38 = vpop.permute.xlu2 %4090 }
 0x89b   : > { %3740 = vmatmul.f32.gmra.mxu1 %v3549_v36 }
 0x89e   : > { %3793 = vmatmul.f32.gmra.mxu2 %v3545_v11 }
 0x89f   : > { %3858 = vmatmul.f32.gmra.mxu3 %v3545_v11  ;;  %v3631_v8 = vpop.f32.mrf.mxu0  ;;  %v8703_v19 = vpop.permute.xlu1 %3963 }
 0x8a0   : > { %v3696_v3 = vpop.f32.mrf.mxu1  ;;  %v3632_v16 = vadd.f32 %v3631_v8, %v8650_v35 }
 0x8a1   : > { %v3697_v17 = vadd.f32 %v3696_v3, %v8650_v35 }
 0x8a2   : > { %v8726_v13 = vpop.permute.xlu0 %3958 }
 0x8a3   : > { %5370 = vtanh.f32 %v3697_v17 }
 0x8a6   : > { %3796 = vmatmul.f32.gmra.mxu2 %v3546_v7 }
 0x8a7   : > { %3861 = vmatmul.f32.gmra.mxu3 %v3546_v7  ;;  %v3634_v40 = vpop.f32.mrf.mxu0  ;;  %v8734_v7 = vpop.permute.xlu2 %4102 }
 0x8a8   : > { %v3699_v25 = vpop.f32.mrf.mxu1  ;;  %v8709_v9 = vpop.permute.xlu1 %4086  ;;  %v3635_v34 = vadd.f32 %v3634_v40, %v8679_v55 }
 0x8a9   : > { %v3700_v22 = vadd.f32 %v3699_v25, %v8679_v55  ;;  %v5371_v53 = vpop.eup %5370 }
 0x8aa   : > { %v3987_v45 = vmul.f32 %v5371_v53, %v8697_v54 }
 0x8ab   : > { %5372 = vtanh.f32 %v3700_v22 }
 0x8ac   : > { %5374 = vtanh.f32 %v3632_v16 }
 0x8ae   : > { %3799 = vmatmul.f32.gmra.mxu2 %v3547_v2 }
 0x8af   : > { %3864 = vmatmul.f32.gmra.mxu3 %v3547_v2  ;;  %v3637_v63 = vpop.f32.mrf.mxu0 }
 0x8b0   : > { %v3702_v23 = vpop.f32.mrf.mxu1  ;;  %v3638_v48 = vadd.f32 %v3637_v63, %v8656_v10  ;;  %v8723_v46 = vpop.permute.xlu1 %4098 }
 0x8b1   : > { %v3703_v41 = vadd.f32 %v3702_v23, %v8656_v10  ;;  %v5373_v52 = vpop.eup %5372  ;;  %v8741_v63 = vpop.permute.xlu0 %3968 }
 0x8b2   : > { %v5375_v29 = vpop.eup %5374  ;;  %v3991_v33 = vmul.f32 %v5373_v52, %v8701_v28 }
 0x8b3   : > { %5376 = vtanh.f32 %v3703_v41  ;;  %v3986_v31 = vmul.f32 %v5375_v29, %v8697_v54 }
 0x8b4   : > { %5378 = vtanh.f32 %v3638_v48  ;;  %v4031_v51 = vadd.f32 %v3991_v33, %v3987_v45  ;;  %v8749_v33 = vpop.permute.xlu2 %4110 }
 0x8b6   : > { %3802 = vmatmul.f32.gmra.mxu2 %v3548_v0 }
 0x8b7   : > { %3867 = vmatmul.f32.gmra.mxu3 %v3548_v0  ;;  %v3640_v15 = vpop.f32.mrf.mxu0 }
 0x8b8   : > { %v3705_v4 = vpop.f32.mrf.mxu1  ;;  %v3641_v43 = vadd.f32 %v3640_v15, %v8658_v24 }
 0x8b9   : > { %v3706_v26 = vadd.f32 %v3705_v4, %v8658_v24  ;;  %v5377_v44 = vpop.eup %5376  ;;  %v8739_v40 = vpop.permute.xlu1 %4106 }
 0x8ba   : > { %v5379_v32 = vpop.eup %5378  ;;  %v3995_v37 = vmul.f32 %v5377_v44, %v8726_v13 }
 0x8bb   : > { %5380 = vtanh.f32 %v3706_v26  ;;  %v3994_v0 = vmul.f32 %v5379_v32, %v8726_v13 }
 0x8bc   : > { %5382 = vtanh.f32 %v3641_v43  ;;  %v4032_v57 = vadd.f32 %v4031_v51, %v3995_v37 }
 0x8bd   : > { %5384 = vtanh.f32 %v3635_v34 }
 0x8be   : > { %3805 = vmatmul.f32.gmra.mxu2 %v3549_v36 }
 0x8bf   : > { %3870 = vmatmul.f32.gmra.mxu3 %v3549_v36  ;;  %v3643_v60 = vpop.f32.mrf.mxu0 }
 0x8c0   : > { %v3708_v5 = vpop.f32.mrf.mxu1  ;;  %v3644_v59 = vadd.f32 %v3643_v60, %v8663_v6 }
 0x8c1   : > { %v5381_v62 = vpop.eup %5380  ;;  %v3709_v49 = vadd.f32 %v3708_v5, %v8663_v6 }
 0x8c2   : > { %v5383_v61 = vpop.eup %5382  ;;  %5386 = vtanh.f32 %v3644_v59  ;;  %v3999_v50 = vmul.f32 %v5381_v62, %v8703_v19  ;;  %v8752_v59 = vpop.permute.xlu1 %3973 }
 0x8c3   : > { %v5385_v11 = vpop.eup %5384  ;;  %5388 = vtanh.f32 %v3709_v49  ;;  %v3998_v3 = vmul.f32 %v5383_v61, %v8703_v19 }
 0x8c4   : > { %v3990_v2 = vmul.f32 %v5385_v11, %v8701_v28  ;;  %v4033_v36 = vadd.f32 %v4032_v57, %v3999_v50 }
 0x8c6   : > { %v4018_v8 = vadd.f32 %v3990_v2, %v3986_v31 }
 0x8c7   : > { %v3646_v25 = vpop.f32.mrf.mxu0 }
 0x8c8   : > { %v5387_v23 = vpop.eup %5386  ;;  %v3711_v17 = vpop.f32.mrf.mxu1  ;;  %v3647_v22 = vadd.f32 %v3646_v25, %v8665_v39  ;;  %v4019_v16 = vadd.f32 %v4018_v8, %v3994_v0 }
 0x8c9   : > { %v5389_v41 = vpop.eup %5388  ;;  %v3761_v15 = vpop.f32.mrf.mxu2  ;;  %v3712_v4 = vadd.f32 %v3711_v17, %v8665_v39  ;;  %v4002_v48 = vmul.f32 %v5387_v23, %v8741_v63 }
 0x8ca   : > { %v3826_v26 = vpop.f32.mrf.mxu3  ;;  %v3762_v34 = vadd.f32 %v3761_v15, %v8650_v35  ;;  %5390 = vtanh.f32 %v3647_v22  ;;  %v4003_v43 = vmul.f32 %v5389_v41, %v8741_v63  ;;  %v4020_v53 = vadd.f32 %v4019_v16, %v3998_v3  ;;  %v8761_v25 = vpop.permute.xlu2 %3978 }
 0x8cb   : > { %v3827_v52 = vadd.f32 %v3826_v26, %v8650_v35  ;;  %5392 = vtanh.f32 %v3712_v4 }
 0x8cc   : > { %5394 = vtanh.f32 %v3762_v34  ;;  %v4021_v45 = vadd.f32 %v4020_v53, %v4002_v48  ;;  %v4034_v29 = vadd.f32 %v4033_v36, %v4003_v43 }
 0x8cd   : > { %5396 = vtanh.f32 %v3827_v52 }
 0x8cf   : > { %v3649_v44 = vpop.f32.mrf.mxu0 }
 0x8d0   : > { %v5391_v60 = vpop.eup %5390  ;;  %v3714_v32 = vpop.f32.mrf.mxu1  ;;  %v3650_v5 = vadd.f32 %v3649_v44, %v8686_v12 }
 0x8d1   : > { %v5393_v51 = vpop.eup %5392  ;;  %v3764_v37 = vpop.f32.mrf.mxu2  ;;  %v3715_v62 = vadd.f32 %v3714_v32, %v8686_v12  ;;  %v4006_v35 = vmul.f32 %v5391_v60, %v8752_v59 }
 0x8d2   : > { %v5395_v49 = vpop.eup %5394  ;;  %v3829_v61 = vpop.f32.mrf.mxu3  ;;  %v3765_v31 = vadd.f32 %v3764_v37, %v8679_v55  ;;  %5398 = vtanh.f32 %v3650_v5  ;;  %v4007_v50 = vmul.f32 %v5393_v51, %v8752_v59 }
 0x8d3   : > { %v5397_v57 = vpop.eup %5396  ;;  %v3830_v11 = vadd.f32 %v3829_v61, %v8679_v55  ;;  %5400 = vtanh.f32 %v3715_v62  ;;  %v3988_v2 = vmul.f32 %v5395_v49, %v8697_v54  ;;  %v4022_v0 = vadd.f32 %v4021_v45, %v4006_v35  ;;  %v8771_v32 = vpop.permute.xlu1 %3983 }
 0x8d4   : > { %5402 = vtanh.f32 %v3765_v31  ;;  %v3989_v36 = vmul.f32 %v5397_v57, %v8697_v54  ;;  %v4035_v8 = vadd.f32 %v4034_v29, %v4007_v50 }
 0x8d5   : > { %5404 = vtanh.f32 %v3830_v11 }
 0x8d7   : > { %v3652_v3 = vpop.f32.mrf.mxu0 }
 0x8d8   : > { %v5399_v23 = vpop.eup %5398  ;;  %v3717_v17 = vpop.f32.mrf.mxu1  ;;  %v3653_v22 = vadd.f32 %v3652_v3, %v8670_v14 }
 0x8d9   : > { %v5401_v16 = vpop.eup %5400  ;;  %v3767_v41 = vpop.f32.mrf.mxu2  ;;  %v3718_v55 = vadd.f32 %v3717_v17, %v8670_v14  ;;  %v4010_v15 = vmul.f32 %v5399_v23, %v8761_v25 }
 0x8da   : > { %v5403_v4 = vpop.eup %5402  ;;  %v3832_v48 = vpop.f32.mrf.mxu3  ;;  %v3768_v26 = vadd.f32 %v3767_v41, %v8656_v10  ;;  %5406 = vtanh.f32 %v3653_v22  ;;  %v4011_v54 = vmul.f32 %v5401_v16, %v8761_v25 }
 0x8db   : > { %v5405_v34 = vpop.eup %5404  ;;  %v3833_v43 = vadd.f32 %v3832_v48, %v8656_v10  ;;  %5408 = vtanh.f32 %v3718_v55  ;;  %v3992_v53 = vmul.f32 %v5403_v4, %v8701_v28  ;;  %v4023_v52 = vadd.f32 %v4022_v0, %v4010_v15 }
 0x8dc   : > { %5410 = vtanh.f32 %v3768_v26  ;;  %v3993_v45 = vmul.f32 %v5405_v34, %v8701_v28  ;;  %v4036_v29 = vadd.f32 %v4035_v8, %v4011_v54 }
 0x8dd   : > { %5412 = vtanh.f32 %v3833_v43  ;;  %v4044_v44 = vadd.f32 %v3992_v53, %v3988_v2 }
 0x8de   : > { %v4057_v60 = vadd.f32 %v3993_v45, %v3989_v36 }
 0x8df   : > { %v3655_v5 = vpop.f32.mrf.mxu0 }
 0x8e0   : > { %v5407_v51 = vpop.eup %5406  ;;  %v3720_v37 = vpop.f32.mrf.mxu1 }
 0x8e1   : > { %v5409_v62 = vpop.eup %5408  ;;  %v3770_v35 = vpop.f32.mrf.mxu2  ;;  %v4014_v10 = vmul.f32 %v5407_v51, %v8771_v32 }
 0x8e2   : > { %v5411_v49 = vpop.eup %5410  ;;  %v3835_v61 = vpop.f32.mrf.mxu3  ;;  %v3771_v31 = vadd.f32 %v3770_v35, %v8658_v24  ;;  %v4015_v50 = vmul.f32 %v5409_v62, %v8771_v32 }
 0x8e3   : > { %v5413_v28 = vpop.eup %5412  ;;  %v3836_v57 = vadd.f32 %v3835_v61, %v8658_v24  ;;  %v3996_v11 = vmul.f32 %v5411_v49, %v8726_v13  ;;  %v8778_v2 = vadd.f32 %v4023_v52, %v4014_v10 }
 0x8e4   : > { %5414 = vtanh.f32 %v3771_v31  ;;  %v3997_v0 = vmul.f32 %v5413_v28, %v8726_v13  ;;  %v8781_v36 = vadd.f32 %v4036_v29, %v4015_v50 }
 0x8e5   : > { %5416 = vtanh.f32 %v3836_v57  ;;  %v4045_v8 = vadd.f32 %v4044_v44, %v3996_v11  ;;  %v3656_v11 = vadd.f32 %v3655_v5, %v8675_v20 }
 0x8e6   : > { %v4058_v3 = vadd.f32 %v4057_v60, %v3997_v0 }
 0x8e7   : > { %v3658_v23 = vpop.f32.mrf.mxu0 }
 0x8e8   : > { %v3723_v17 = vpop.f32.mrf.mxu1 }
 0x8e9   : > { %v3773_v22 = vpop.f32.mrf.mxu2 }
 0x8ea   : > { %v5415_v16 = vpop.eup %5414  ;;  %v3774_v41 = vadd.f32 %v3773_v22, %v8663_v6  ;;  %v3838_v55 = vpop.f32.mrf.mxu3 }
 0x8eb   : > { %v5417_v24 = vpop.eup %5416  ;;  %v3839_v15 = vadd.f32 %v3838_v55, %v8663_v6  ;;  %v4000_v4 = vmul.f32 %v5415_v16, %v8703_v19 }
 0x8ec   : > { %5418 = vtanh.f32 %v3774_v41  ;;  %v4001_v13 = vmul.f32 %v5417_v24, %v8703_v19  ;;  %v3659_v24 = vadd.f32 %v3658_v23, %v8693_v18 }
 0x8ed   : > { %5420 = vtanh.f32 %v3839_v15  ;;  %v4046_v48 = vadd.f32 %v4045_v8, %v4000_v4  ;;  %v3721_v8 = vadd.f32 %v3720_v37, %v8675_v20  ;;  %v3724_v4 = vadd.f32 %v3723_v17, %v8693_v18 }
 0x8ee   : > { %v4059_v26 = vadd.f32 %v4058_v3, %v4001_v13 }
 0x8ef   : > { %v3661_v54 = vpop.f32.mrf.mxu0 }
 0x8f0   : > { %v3726_v34 = vpop.f32.mrf.mxu1 }
 0x8f1   : > { %v3776_v43 = vpop.f32.mrf.mxu2 }
 0x8f2   : > { %v5419_v53 = vpop.eup %5418  ;;  %v3777_v52 = vadd.f32 %v3776_v43, %v8665_v39  ;;  %v3841_v45 = vpop.f32.mrf.mxu3  ;;  %v3727_v43 = vadd.f32 %v3726_v34, %v8677_v30 }
 0x8f3   : > { %v5421_v29 = vpop.eup %5420  ;;  %v3842_v44 = vadd.f32 %v3841_v45, %v8665_v39  ;;  %v4004_v6 = vmul.f32 %v5419_v53, %v8741_v63 }
 0x8f4   : > { %5422 = vtanh.f32 %v3777_v52  ;;  %v4005_v60 = vmul.f32 %v5421_v29, %v8741_v63 }
 0x8f5   : > { %5424 = vtanh.f32 %v3842_v44  ;;  %v4047_v19 = vadd.f32 %v4046_v48, %v4004_v6  ;;  %v3662_v48 = vadd.f32 %v3661_v54, %v8677_v30 }
 0x8f6   : > { %v4060_v51 = vadd.f32 %v4059_v26, %v4005_v60 }
 0x8f7   : > { %v3664_v62 = vpop.f32.mrf.mxu0 }
 0x8f8   : > { %v3729_v35 = vpop.f32.mrf.mxu1  ;;  %v3665_v29 = vadd.f32 %v3664_v62, %v8684_v27 }
 0x8f9   : > { %v3779_v10 = vpop.f32.mrf.mxu2  ;;  %v3730_v54 = vadd.f32 %v3729_v35, %v8684_v27 }
 0x8fa   : > { %v5423_v49 = vpop.eup %5422  ;;  %v3844_v61 = vpop.f32.mrf.mxu3  ;;  %v3780_v31 = vadd.f32 %v3779_v10, %v8686_v12 }
 0x8fb   : > { %v5425_v50 = vpop.eup %5424  ;;  %v3845_v28 = vadd.f32 %v3844_v61, %v8686_v12  ;;  %v4008_v39 = vmul.f32 %v5423_v49, %v8752_v59 }
 0x8fc   : > { %5426 = vtanh.f32 %v3780_v31  ;;  %v4009_v57 = vmul.f32 %v5425_v50, %v8752_v59 }
 0x8fd   : > { %5428 = vtanh.f32 %v3845_v28  ;;  %v4048_v63 = vadd.f32 %v4047_v19, %v4008_v39 }
 0x8fe   : > { %v4061_v0 = vadd.f32 %v4060_v51, %v4009_v57  ;;  %5430 = vtanh.f32 %v3656_v11 }
 0x8ff   : > { %v3667_v3 = vpop.f32.mrf.mxu0  ;;  %5432 = vtanh.f32 %v3721_v8 }
 0x900   : > { %v3732_v22 = vpop.f32.mrf.mxu1  ;;  %v3668_v60 = vadd.f32 %v3667_v3, %v8699_v56 }
 0x901   : > { %v3782_v16 = vpop.f32.mrf.mxu2  ;;  %v3733_v10 = vadd.f32 %v3732_v22, %v8699_v56 }
 0x902   : > { %v5427_v41 = vpop.eup %5426  ;;  %v3783_v55 = vadd.f32 %v3782_v16, %v8670_v14  ;;  %v3847_v12 = vpop.f32.mrf.mxu3 }
 0x903   : > { %v5429_v15 = vpop.eup %5428  ;;  %v3848_v59 = vadd.f32 %v3847_v12, %v8670_v14  ;;  %v4012_v5 = vmul.f32 %v5427_v41, %v8761_v25 }
 0x904   : > { %5434 = vtanh.f32 %v3783_v55  ;;  %v4013_v37 = vmul.f32 %v5429_v15, %v8761_v25  ;;  %v5431_v53 = vpop.eup %5430 }
 0x905   : > { %5436 = vtanh.f32 %v3848_v59  ;;  %v4049_v13 = vadd.f32 %v4048_v63, %v4012_v5  ;;  %v5433_v14 = vpop.eup %5432  ;;  %v4113_v35 = vmul.f32 %v5431_v53, %v8707_v47 }
 0x906   : > { %5438 = vtanh.f32 %v3659_v24  ;;  %v4062_v26 = vadd.f32 %v4061_v0, %v4013_v37 }
 0x907   : > { %5440 = vtanh.f32 %v3724_v4  ;;  %v3670_v23 = vpop.f32.mrf.mxu0 }
 0x908   : > { %v3735_v52 = vpop.f32.mrf.mxu1  ;;  %5442 = vtanh.f32 %v3662_v48  ;;  %v3671_v62 = vadd.f32 %v3670_v23, %v8688_v1 }
 0x909   : > { %v8805_v45 = vpop.f32.mrf.mxu2  ;;  %5444 = vtanh.f32 %v3727_v43  ;;  %v3736_v31 = vadd.f32 %v3735_v52, %v8688_v1 }
 0x90a   : > { %v5435_v17 = vpop.eup %5434  ;;  %v8808_v25 = vpop.f32.mrf.mxu3  ;;  %5446 = vtanh.f32 %v3665_v29 }
 0x90b   : > { %v5437_v44 = vpop.eup %5436  ;;  %v4016_v6 = vmul.f32 %v5435_v17, %v8771_v32  ;;  %5448 = vtanh.f32 %v3730_v54 }
 0x90c   : > { %v5439_v34 = vpop.eup %5438  ;;  %v4017_v19 = vmul.f32 %v5437_v44, %v8771_v32  ;;  %5450 = vtanh.f32 %v3668_v60  ;;  %v4114_v32 = vmul.f32 %v5433_v14, %v8707_v47 }
 0x90d   : > { %v5441_v51 = vpop.eup %5440  ;;  %v8815_v49 = vadd.f32 %v4049_v13, %v4016_v6  ;;  %v4117_v50 = vmul.f32 %v5439_v34, %v8709_v9  ;;  %5452 = vtanh.f32 %v3733_v10 }
 0x90e   : > { %v8818_v61 = vadd.f32 %v4062_v26, %v4017_v19  ;;  %v5443_v39 = vpop.eup %5442  ;;  %v4118_v57 = vmul.f32 %v5441_v51, %v8709_v9  ;;  %5454 = vtanh.f32 %v3671_v62 }
 0x90f   : > { %v3673_v28 = vpop.f32.mrf.mxu0  ;;  %v5445_v0 = vpop.eup %5444  ;;  %5456 = vtanh.f32 %v3736_v31  ;;  %v4145_v16 = vadd.f32 %v4117_v50, %v4113_v35  ;;  %v4121_v41 = vmul.f32 %v5443_v39, %v8720_v38 }
 0x910   : > { %v3738_v63 = vpop.f32.mrf.mxu1  ;;  %v3674_v11 = vadd.f32 %v3673_v28, %v8695_v58  ;;  %v5447_v55 = vpop.eup %5446  ;;  %v4158_v12 = vadd.f32 %v4118_v57, %v4114_v32  ;;  %v4122_v24 = vmul.f32 %v5445_v0, %v8720_v38 }
 0x911   : > { %v8826_v8 = vpop.f32.mrf.mxu2  ;;  %v3739_v3 = vadd.f32 %v3738_v63, %v8695_v58  ;;  %v5449_v15 = vpop.eup %5448  ;;  %v4146_v5 = vadd.f32 %v4145_v16, %v4121_v41  ;;  %v4125_v37 = vmul.f32 %v5447_v55, %v8711_v42 }
 0x912   : > { %v8829_v22 = vpop.f32.mrf.mxu3  ;;  %5458 = vtanh.f32 %v3674_v11  ;;  %v5451_v59 = vpop.eup %5450  ;;  %v4159_v26 = vadd.f32 %v4158_v12, %v4122_v24  ;;  %v4126_v43 = vmul.f32 %v5449_v15, %v8711_v42  ;;  %v4025_v12 = vrot.slane %v8778_v2, 4 }
 0x913   : > { %5460 = vtanh.f32 %v3739_v3  ;;  %v5453_v4 = vpop.eup %5452  ;;  %v4129_v17 = vmul.f32 %v5451_v59, %v8723_v46  ;;  %v4147_v60 = vadd.f32 %v4146_v5, %v4125_v37  ;;  %v4038_v15 = vrot.slane %v8781_v36, 4 }
 0x914   : > { %v5455_v48 = vpop.eup %5454  ;;  %v4130_v6 = vmul.f32 %v5453_v4, %v8723_v46  ;;  %v4160_v51 = vadd.f32 %v4159_v26, %v4126_v43  ;;  %v4026_v37 = vadd.f32 %v4025_v12, %v8778_v2 }
 0x915   : > { %v5457_v52 = vpop.eup %5456  ;;  %v4133_v19 = vmul.f32 %v5455_v48, %v8734_v7  ;;  %v4148_v62 = vadd.f32 %v4147_v60, %v4129_v17  ;;  %v4039_v48 = vadd.f32 %v4038_v15, %v8781_v36  ;;  %v3851_v60 = vadd.f32 %v8808_v25, %v8675_v20 }
 0x916   : > { %v4134_v10 = vmul.f32 %v5457_v52, %v8734_v7  ;;  %v4161_v31 = vadd.f32 %v4160_v51, %v4130_v6  ;;  %v4199_v52 = vpop.permute.xlu2 %4198  ;;  %v4027_v17 = vrot.slane %v4026_v37, 2  ;;  %v3789_v36 = vadd.f32 %v8826_v8, %v8693_v18 }
 0x917   : > { %v3676_v13 = vpop.f32.mrf.mxu0  ;;  %v4149_v28 = vadd.f32 %v4148_v62, %v4133_v19  ;;  %v4040_v6 = vrot.slane %v4039_v48, 2  ;;  %v8853_v2 = vperm.slane %v4199_v52, 0 }
 0x918   : > { %v3741_v23 = vpop.f32.mrf.mxu1  ;;  %v3677_v53 = vadd.f32 %v3676_v13, %v8705_v21  ;;  %v5459_v44 = vpop.eup %5458  ;;  %v4162_v32 = vadd.f32 %v4161_v31, %v4134_v10  ;;  %v3854_v10 = vadd.f32 %v8829_v22, %v8693_v18  ;;  %v4028_v62 = vadd.f32 %v4027_v17, %v4026_v37 }
 0x919   : > { %v3791_v14 = vpop.f32.mrf.mxu2  ;;  %v3742_v29 = vadd.f32 %v3741_v23, %v8705_v21  ;;  %v5461_v34 = vpop.eup %5460  ;;  %v4137_v35 = vmul.f32 %v5459_v44, %v8739_v40  ;;  %v3786_v44 = vadd.f32 %v8805_v45, %v8675_v20  ;;  %v4041_v31 = vadd.f32 %v4040_v6, %v4039_v48 }
 0x91a   : > { %v3856_v54 = vpop.f32.mrf.mxu3  ;;  %5462 = vtanh.f32 %v3677_v53  ;;  %v4138_v50 = vmul.f32 %v5461_v34, %v8739_v40  ;;  %v3792_v45 = vadd.f32 %v3791_v14, %v8677_v30  ;;  %v4029_v18 = vrot.slane %v4028_v62, 1 }
 0x91b   : > { %5464 = vtanh.f32 %v3742_v29  ;;  %v4150_v11 = vadd.f32 %v4149_v28, %v4137_v35  ;;  %v3857_v20 = vadd.f32 %v3856_v54, %v8677_v30 }
 0x91c   : > { %v4163_v16 = vadd.f32 %v4162_v32, %v4138_v50  ;;  %5466 = vtanh.f32 %v3786_v44  ;;  %v4042_v32 = vrot.slane %v4041_v31, 1 }
 0x91d   : > { %5468 = vtanh.f32 %v3851_v60 }
 0x91e   : > { %5470 = vtanh.f32 %v3789_v36  ;;  %v4043_v15 = vadd.f32 %v4042_v32, %v4041_v31 }
 0x91f   : > { %5472 = vtanh.f32 %v3854_v10 }
 0x920   : > { %v5463_v39 = vpop.eup %5462  ;;  %5474 = vtanh.f32 %v3792_v45 }
 0x921   : > { %v5465_v57 = vpop.eup %5464  ;;  %v3794_v63 = vpop.f32.mrf.mxu2  ;;  %v4141_v0 = vmul.f32 %v5463_v39, %v8749_v33  ;;  %5476 = vtanh.f32 %v3857_v20 }
 0x922   : > { %v3859_v3 = vpop.f32.mrf.mxu3  ;;  %v4142_v41 = vmul.f32 %v5465_v57, %v8749_v33  ;;  %v3795_v14 = vadd.f32 %v3794_v63, %v8684_v27  ;;  %v5467_v54 = vpop.eup %5466 }
 0x923   : > { %v4151_v55 = vadd.f32 %v4150_v11, %v4141_v0  ;;  %v4074_v11 = vpop.permute.xlu0 %4073  ;;  %v3860_v30 = vadd.f32 %v3859_v3, %v8684_v27 }
 0x924   : > { %v4164_v24 = vadd.f32 %v4163_v16, %v4142_v41  ;;  %v5469_v16 = vpop.eup %5468 }
 0x925   : > { %v4152_v59 = vrot.slane %v4151_v55, 4  ;;  %v5471_v12 = vpop.eup %5470 }
 0x926   : > { %v4165_v4 = vrot.slane %v4164_v24, 4 }
 0x927   : > { %v4153_v5 = vadd.f32 %v4152_v59, %v4151_v55  ;;  %v8870_v55 = vperm.slane %v4074_v11, 0  ;;  %v5473_v59 = vpop.eup %5472 }
 0x928   : > { %v4166_v13 = vadd.f32 %v4165_v4, %v4164_v24  ;;  %v4030_v24 = vadd.f32 %v4029_v18, %v4028_v62  ;;  %v5475_v4 = vpop.eup %5474  ;;  %v4120_v17 = vmul.f32 %v5473_v59, %v8709_v9 }
 0x929   : > { %v3797_v26 = vpop.f32.mrf.mxu2  ;;  %v4154_v43 = vrot.slane %v4153_v5, 2  ;;  %v5477_v37 = vpop.eup %5476  ;;  %v4123_v6 = vmul.f32 %v5475_v4, %v8720_v38  ;;  %v4051_v4 = vrot.slane %v8815_v49, 4 }
 0x92a   : > { %v3862_v23 = vpop.f32.mrf.mxu3  ;;  %v4167_v53 = vrot.slane %v4166_v13, 2  ;;  %v3798_v0 = vadd.f32 %v3797_v26, %v8699_v56  ;;  %v4077_v26 = vadd.f32 %v8870_v55, %v4030_v24  ;;  %v4124_v36 = vmul.f32 %v5477_v37, %v8720_v38 }
 0x92b   : > { %v4155_v29 = vadd.f32 %v4154_v43, %v4153_v5  ;;  %v3863_v41 = vadd.f32 %v3862_v23, %v8699_v56  ;;  %v4115_v23 = vmul.f32 %v5467_v54, %v8707_v47 }
 0x92c   : > { %v4168_v34 = vadd.f32 %v4167_v53, %v4166_v13  ;;  %v4119_v53 = vmul.f32 %v5471_v12, %v8709_v9 }
 0x92d   : > { %v4156_v19 = vrot.slane %v4155_v29, 1 }
 0x92e   : > { %v4169_v51 = vrot.slane %v4168_v34, 1  ;;  %v4171_v9 = vadd.f32 %v4119_v53, %v4115_v23 }
 0x92f   : > { %v4157_v35 = vadd.f32 %v4156_v19, %v4155_v29  ;;  %v4116_v19 = vmul.f32 %v5469_v16, %v8707_v47 }
 0x930   : > { %v4170_v50 = vadd.f32 %v4169_v51, %v4168_v34  ;;  %v4172_v38 = vadd.f32 %v4171_v9, %v4123_v6 }
 0x931   : > { %v3800_v25 = vpop.f32.mrf.mxu2  ;;  %v8862_v28 = vadd.f32 %v8853_v2, %v4157_v35 }
 0x932   : > { %v3865_v8 = vpop.f32.mrf.mxu3  ;;  %v4203_v39 = vadd.f32 %v8853_v2, %v4170_v50  ;;  %v3801_v63 = vadd.f32 %v3800_v25, %v8688_v1  ;;  %v4184_v50 = vadd.f32 %v4120_v17, %v4116_v19 }
 0x933   : > { %v4206_v22 = vmul.f32 1.442695, %v8862_v28  ;;  %v3866_v27 = vadd.f32 %v3865_v8, %v8688_v1  ;;  %v4078_v1 = vadd.f32 %v8870_v55, %v4043_v15 }
 0x934   : > { %v4208_v57 = vmul.f32 1.442695, %v4203_v39 }
 0x935   : > { %5478 = vpow2.f32 %v4206_v22 }
 0x936   : > { %5480 = vpow2.f32 %v4208_v57 }
 0x937   : > { %5482 = vtanh.f32 %v3795_v14  ;;  %v4185_v14 = vadd.f32 %v4184_v50, %v4124_v36 }
 0x938   : > { %5484 = vtanh.f32 %v3860_v30 }
 0x939   : > { %v3803_v3 = vpop.f32.mrf.mxu2  ;;  %5486 = vtanh.f32 %v3798_v0 }
 0x93a   : > { %v3804_v5 = vadd.f32 %v3803_v3, %v8695_v58  ;;  %v3868_v56 = vpop.f32.mrf.mxu3  ;;  %5488 = vtanh.f32 %v3863_v41 }
 0x93b   : > { %v3869_v13 = vadd.f32 %v3868_v56, %v8695_v58  ;;  %v5479_v48 = vpop.eup %5478  ;;  %5490 = vtanh.f32 %v3801_v63 }
 0x93c   : > { %v5481_v43 = vpop.eup %5480  ;;  %5492 = vtanh.f32 %v3866_v27  ;;  %v4215_v58 = vsel %vm4214_vm0, %v4077_v26, %v5479_v48 }
 0x93d   : > { %v5483_v52 = vpop.eup %5482  ;;  %5494 = vtanh.f32 %v3804_v5  ;;  %v4216_v29 = vsel %vm4214_vm0, %v4078_v1, %v5481_v43  ;;  %v4220_v45 = vsel %vm4219_vm1, %v4215_v58, %v8862_v28 }
 0x93e   : > { %v5485_v44 = vpop.eup %5484  ;;  %5496 = vtanh.f32 %v3869_v13  ;;  %v4221_v34 = vsel %vm4219_vm1, %v4216_v29, %v4203_v39  ;;  %v4127_v62 = vmul.f32 %v5483_v52, %v8711_v42 }
 0x93f   : > { %v5487_v60 = vpop.eup %5486  ;;  %v4228_v51 = vrot.slane %v4221_v34, 4  ;;  %v4128_v20 = vmul.f32 %v5485_v44, %v8711_v42 }
 0x940   : > { %v5489_v10 = vpop.eup %5488  ;;  %v4131_v18 = vmul.f32 %v5487_v60, %v8723_v46  ;;  %v4173_v57 = vadd.f32 %v4172_v38, %v4127_v62 }
 0x941   : > { %v3806_v35 = vpop.f32.mrf.mxu2  ;;  %v5491_v31 = vpop.eup %5490  ;;  %v4231_v47 = vsel %vm4230_vm2, %v4220_v45, %v4228_v51  ;;  %v4132_v32 = vmul.f32 %v5489_v10, %v8723_v46  ;;  %v4186_v30 = vadd.f32 %v4185_v14, %v4128_v20 }
 0x942   : > { %v3807_v25 = vadd.f32 %v3806_v35, %v8705_v21  ;;  %v3871_v8 = vpop.f32.mrf.mxu3  ;;  %v5493_v39 = vpop.eup %5492  ;;  %4235 = vst [vmem:[%s8898_s19] sm:$0x77] %v4231_v47  ;;  %v4135_v11 = vmul.f32 %v5491_v31, %v8734_v7  ;;  %v4174_v0 = vadd.f32 %v4173_v57, %v4131_v18 }
 0x943   : > { %v3872_v22 = vadd.f32 %v3871_v8, %v8705_v21  ;;  %v5495_v28 = vpop.eup %5494  ;;  %v4136_v54 = vmul.f32 %v5493_v39, %v8734_v7  ;;  %v4187_v16 = vadd.f32 %v4186_v30, %v4132_v32  ;;  %v4064_v7 = vrot.slane %v8818_v61, 4 }
 0x944   : > { %5498 = vtanh.f32 %v3807_v25  ;;  %v5497_v42 = vpop.eup %5496  ;;  %v4139_v21 = vmul.f32 %v5495_v28, %v8739_v40  ;;  %v4175_v12 = vadd.f32 %v4174_v0, %v4135_v11 }
 0x945   : > { %5500 = vtanh.f32 %v3872_v22  ;;  %v4140_v41 = vmul.f32 %v5497_v42, %v8739_v40  ;;  %v4188_v24 = vadd.f32 %v4187_v16, %v4136_v54  ;;  %v4052_v40 = vadd.f32 %v4051_v4, %v8815_v49 }
 0x946   : > { %v4176_v46 = vadd.f32 %v4175_v12, %v4139_v21  ;;  %v4065_v48 = vadd.f32 %v4064_v7, %v8818_v61 }
 0x947   : > { %v4189_v27 = vadd.f32 %v4188_v24, %v4140_v41  ;;  %v4053_v53 = vrot.slane %v4052_v40, 2 }
 0x948   : > { %v4066_v52 = vrot.slane %v4065_v48, 2 }
 0x949   : > { %v4054_v44 = vadd.f32 %v4053_v53, %v4052_v40 }
 0x94a   : > { %v5499_v63 = vpop.eup %5498  ;;  %v4067_v6 = vadd.f32 %v4066_v52, %v4065_v48 }
 0x94b   : > { %v5501_v15 = vpop.eup %5500  ;;  %v4143_v59 = vmul.f32 %v5499_v63, %v8749_v33  ;;  %v4055_v61 = vrot.slane %v4054_v44, 1 }
 0x94c   : > { %v4144_v3 = vmul.f32 %v5501_v15, %v8749_v33  ;;  %v4068_v36 = vrot.slane %v4067_v6, 1 }
 0x94d   : > { %v4177_v5 = vadd.f32 %v4176_v46, %v4143_v59  ;;  %v4056_v9 = vadd.f32 %v4055_v61, %v4054_v44 }
 0x94e   : > { %v4190_v56 = vadd.f32 %v4189_v27, %v4144_v3  ;;  %v4069_v62 = vadd.f32 %v4068_v36, %v4067_v6 }
 0x94f   : > { %v4178_v37 = vrot.slane %v4177_v5, 4  ;;  %v4079_v45 = vadd.f32 %v8870_v55, %v4056_v9 }
 0x950   : > { %v4191_v13 = vrot.slane %v4190_v56, 4 }
 0x951   : > { %v4179_v26 = vadd.f32 %v4178_v37, %v4177_v5 }
 0x952   : > { %v4192_v1 = vadd.f32 %v4191_v13, %v4190_v56 }
 0x953   : > { %v4180_v43 = vrot.slane %v4179_v26, 2 }
 0x954   : > { %v4193_v23 = vrot.slane %v4192_v1, 2 }
 0x955   : > { %v4181_v17 = vadd.f32 %v4180_v43, %v4179_v26 }
 0x956   : > { %v4194_v33 = vadd.f32 %v4193_v23, %v4192_v1 }
 0x957   : > { %v4182_v58 = vrot.slane %v4181_v17, 1 }
 0x958   : > { %v4195_v29 = vrot.slane %v4194_v33, 1 }
 0x959   : > { %v4183_v34 = vadd.f32 %v4182_v58, %v4181_v17 }
 0x95a   : > { %v4196_v60 = vadd.f32 %v4195_v29, %v4194_v33 }
 0x95b   : > { %v4204_v19 = vadd.f32 %v8853_v2, %v4183_v34 }
 0x95c   : > { %v4205_v49 = vadd.f32 %v8853_v2, %v4196_v60  ;;  %v4080_v2 = vadd.f32 %v8870_v55, %v4069_v62 }
 0x95d   : > { %v4210_v51 = vmul.f32 1.442695, %v4204_v19 }
 0x95e   : > { %v4212_v10 = vmul.f32 1.442695, %v4205_v49 }
 0x95f   : > { %5502 = vpow2.f32 %v4210_v51 }
 0x960   : > { %5504 = vpow2.f32 %v4212_v10 }
 0x965   : > { %v5503_v35 = vpop.eup %5502 }
 0x966   : > { %v5505_v31 = vpop.eup %5504  ;;  %v4217_v50 = vsel %vm4214_vm0, %v4079_v45, %v5503_v35 }
 0x967   : > { %v4218_v20 = vsel %vm4214_vm0, %v4080_v2, %v5505_v31  ;;  %v4222_v47 = vsel %vm4219_vm1, %v4217_v50, %v4204_v19 }
 0x968   : > { %v4223_v25 = vsel %vm4219_vm1, %v4218_v20, %v4205_v49 }
 0x969   : > { %v4229_v8 = vrot.slane %v4223_v25, 4 }
 0x96b   : > { %v4232_v39 = vsel %vm4230_vm2, %v4222_v47, %v4229_v8 }
 0x96c   : > { %4236 = vst [vmem:[%s8898_s19 + $0x8] sm:$0x77] %v4232_v39 }
 0x96d   : > { %5621 = shalt.err (!%p5618_p8)
}
 0x96e   : > { %4344 = dma.vmem_to_hbm [thread:$0]  (%p5751_p5), %s4252_s29, 256, %s4254_s8, %s4238_s28  }
 0x96f PF: > { %p4356_p9 = scmp.ge.s32.totalorder %s5660_s27, 2  ;;  %s4265_s17 = sand.u32 1, %s5648_s24  }
 0x970   : > { %s4266_s19 = scalar_lea.sflag [#allocation4], %s4265_s17 }
 0x971   : > { %p4351_p10 = pnand %p4356_p9, %p5755_p6 }
 0x973   : > { %p4352_p11 = pneg %p4351_p10 }
 0x975   : > { %5643 = dma.done.wait (%p4352_p11), %s4266_s19, 256  }
 0x976   : > { %5645 = vsyncadd (%p4352_p11), %s4266_s19, 4294967040  ;;  %p18_p12 = scmp.ge.s32.totalorder %s5738_s30, 4   ;;  %s9278_s24 = smov %s5652_s25 }
 0x977   : > { %s9279_s25 = smov %s5656_s26  ;;  %s9280_s26 = smov %s5749_s10 }
 0x978   : > { %s9281_s27 = smov %s5738_s30  ;;  %20 = sbr.rel (!%p18_p12) target bundleno = 4 (0x4), region = 93 }
 0x97d   :  { %4272 = vsyncpa [#allocation3], 1 }
 0x97e   :  { %4274 = vsyncpa [#allocation3 + $0x1], 1 }
 0x97f   :  { %4275 = vsyncpa [#allocation4], 1 }
 0x980   :  { %4277 = vsyncpa [#allocation4 + $0x1], 1 }

</bundles_post_ra>
